<compile_context>
chip_gen: v7x
topology: tpu7x:2x2x1
jax: 0.10.0
libtpu: 0.0.40
codegen_flags: <defaults>
</compile_context>

<pallas_src>
import jax
import jax.numpy as jnp
from jax.experimental import pallas as pl
from jax.experimental.pallas import tpu as pltpu

HIDDEN = 768
FC1 = 512
FC2 = 256
LABELS = 8
L_PAD = 128            # pad label lanes to one full 128-lane vreg
NEG_INF = -1e30        # bias for padded label lanes -> exp() underflows to 0


def _round_up(x, m):
    return ((x + m - 1) // m) * m


def _device_config():
    """Generation-aware tiling / megacore config."""
    kind = ""
    try:
        kind = jax.devices()[0].device_kind.lower()
    except Exception:
        pass
    is_v7 = "v7" in kind
    is_v5e = ("v5e" in kind) or ("v5 lite" in kind) or ("v5litepod" in kind)
    return {
        # >=2 grid steps for DMA/compute overlap; >=4 on v7x to feed 2 TCs.
        "target_steps": 4 if is_v7 else 2,
        # v5e: 1 vst slot / no bf16 VPU -> keep f32 intermediates small.
        "max_tile": 256 if is_v5e else 512,
        # Only core_parallel actually changes codegen for multi-TC sharding.
        "semantics": pltpu.CORE_PARALLEL if is_v7 else "parallel",
        "num_cores": 2 if is_v7 else 1,
    }


def _pick_batch_tile(batch, target_steps, max_tile):
    """Pick a 128-aligned batch tile minimizing pad rows with >=target_steps steps."""
    if batch <= 128:
        return _round_up(max(batch, 8), 8)
    best = None
    for tb in range(128, max_tile + 1, 128):
        nb = -(-batch // tb)
        pad = nb * tb - batch
        key = (nb < target_steps, pad, -tb)   # enough steps > minimal pad > bigger tile
        if best is None or key < best[0]:
            best = (key, tb)
    return best[1]


def bert_head_kernel(x_ref, w1_ref, b1_ref, w2_ref, b2_ref, w3_ref, b3_ref,
                     o_ref):
    """fc1 -> relu -> (dropout: identity) -> fc2 -> relu -> fc3 -> log_softmax.

    Inputs arrive as bf16 (weights resident in VMEM across the batch grid);
    matmuls accumulate in f32 on the MXU; bias/ReLU/log-softmax run in f32 on
    the VPU/EUP (free filler under the MXU/DMA slots).
    """
    x = x_ref[...]                                                     # (TB, 768) bf16

    h1 = jnp.dot(x, w1_ref[...], preferred_element_type=jnp.float32)   # (TB, 512)
    h1 = jnp.maximum(h1 + b1_ref[...], 0.0).astype(jnp.bfloat16)
    # dropout(0.2): identity at inference time

    h2 = jnp.dot(h1, w2_ref[...], preferred_element_type=jnp.float32)  # (TB, 256)
    h2 = jnp.maximum(h2 + b2_ref[...], 0.0).astype(jnp.bfloat16)
    # dropout(0.2): identity at inference time

    logits = jnp.dot(h2, w3_ref[...], preferred_element_type=jnp.float32)
    logits = logits + b3_ref[...]                                       # (TB, 128)
    # padded label lanes carry a -1e30 bias -> contribute exactly 0 below.

    # LogSoftmax over the label axis (dim=1)
    m = jnp.max(logits, axis=1, keepdims=True)
    shifted = logits - m
    lse = jnp.log(jnp.sum(jnp.exp(shifted), axis=1, keepdims=True))
    o_ref[...] = shifted - lse


def _head_pallas(x, p, *, nb, tb, semantics):
    """Batch-tiled pallas_call over the classifier head.  x: (nb*tb, 768) bf16."""
    b_pad = nb * tb

    def tile_spec(shape):
        # Activation / output tiles stream over the batch grid axis.
        return pl.BlockSpec(shape, lambda i: (i, 0))

    def resident_spec(shape):
        # Constant index_map -> block DMA'd from HBM once, resident in VMEM
        # across all batch tiles.
        return pl.BlockSpec(shape, lambda i: (0, 0))

    flops = 2 * b_pad * (HIDDEN * FC1 + FC1 * FC2 + FC2 * L_PAD)
    bytes_accessed = (b_pad * HIDDEN * 2
                      + (HIDDEN * FC1 + FC1 * FC2 + FC2 * L_PAD) * 2
                      + (FC1 + FC2 + L_PAD) * 4
                      + b_pad * L_PAD * 4)

    return pl.pallas_call(
        bert_head_kernel,
        out_shape=jax.ShapeDtypeStruct((b_pad, L_PAD), jnp.float32),
        grid_spec=pltpu.PrefetchScalarGridSpec(
            num_scalar_prefetch=0,
            grid=(nb,),
            in_specs=[
                tile_spec((tb, HIDDEN)),
                resident_spec((HIDDEN, FC1)), resident_spec((1, FC1)),
                resident_spec((FC1, FC2)), resident_spec((1, FC2)),
                resident_spec((FC2, L_PAD)), resident_spec((1, L_PAD)),
            ],
            out_specs=tile_spec((tb, L_PAD)),
        ),
        compiler_params=pltpu.CompilerParams(
            dimension_semantics=(semantics,)),
        cost_estimate=pl.CostEstimate(
            flops=flops,
            transcendentals=b_pad * (L_PAD + 1),
            bytes_accessed=bytes_accessed),
    )(x, p["w1"], p["b1"], p["w2"], p["b2"], p["w3"], p["b3"])


def prepare_params(params):
    """One-time (outside the forward path) cast/pad of weights into kernel form."""
    labels = params["w3"].shape[-1]
    w3p = jnp.zeros((FC2, L_PAD), jnp.bfloat16).at[:, :labels].set(
        params["w3"].astype(jnp.bfloat16))
    b3p = jnp.full((1, L_PAD), NEG_INF, jnp.float32).at[:, :labels].set(
        params["b3"].astype(jnp.float32).reshape(1, -1))
    return {
        "embed": params["embed"].astype(jnp.bfloat16),   # gather emits bf16 directly
        "w1": params["w1"].astype(jnp.bfloat16),
        "b1": params["b1"].astype(jnp.float32).reshape(1, -1),
        "w2": params["w2"].astype(jnp.bfloat16),
        "b2": params["b2"].astype(jnp.float32).reshape(1, -1),
        "w3": w3p,
        "b3": b3p,
    }


def make_forward(labels, cfg):
    target_steps = cfg["target_steps"]
    max_tile = cfg["max_tile"]
    semantics = cfg["semantics"]
    num_cores = cfg["num_cores"]

    @jax.jit
    def forward(sent_id, mask, prepped):
        del mask  # consumed only by the real (external) encoder's attention
        B = sent_id.shape[0]
        tb = _pick_batch_tile(B, target_steps, max_tile)
        nb = -(-B // tb)
        nb = _round_up(nb, num_cores)          # CORE_PARALLEL grid divisible by #TCs
        b_pad = nb * tb

        # Pad the (cheap) int32 id vector, not the (B,768) activation.
        ids = sent_id[:, 0]
        if b_pad != B:
            ids = jnp.pad(ids, (0, b_pad - B))

        # TODO(synk): stand-in for the external pretrained encoder
        # `self.bert(sent_id, attention_mask=mask)[0][:, 0]`: gather the
        # CLS-position embedding.  The bf16 table means this gather already
        # produces the kernel-ready (b_pad, 768) bf16 activation with no extra
        # cast/pad passes; fusing it into the kernel (scalar prefetch +
        # in-kernel gather / row DMA) is possible for this small synthetic
        # table but it replaces an external module, so it stays as XLA glue
        # co-scheduled with the kernel inside this jit region.
        x = jnp.take(prepped["embed"], ids, axis=0)

        out_padded = _head_pallas(x, prepped, nb=nb, tb=tb, semantics=semantics)
        # Slice consumed inside the same jit so XLA fuses it (no extra copy
        # beyond the tiny (B, labels) result).
        return out_padded[:B, :labels]

    return forward


def head_reference(cls_bf16, prepped, labels):
    """Pure-JAX reference with the same bf16 dtype flow as the kernel."""
    f32 = lambda a: a.astype(jnp.float32)
    x = f32(cls_bf16)
    h1 = f32(jnp.maximum(x @ f32(prepped["w1"]) + prepped["b1"], 0.0)
             .astype(jnp.bfloat16))
    h2 = f32(jnp.maximum(h1 @ f32(prepped["w2"]) + prepped["b2"], 0.0)
             .astype(jnp.bfloat16))
    logits = h2 @ f32(prepped["w3"][:, :labels]) + prepped["b3"][:, :labels]
    return jax.nn.log_softmax(logits, axis=1)


def init_params(key, vocab_size=128, labels=LABELS):
    ks = jax.random.split(key, 7)
    scale = lambda fan_in: 1.0 / jnp.sqrt(jnp.float32(fan_in))
    return {
        "embed": jax.random.normal(ks[0], (vocab_size, HIDDEN), jnp.float32) * 0.02,
        "w1": jax.random.normal(ks[1], (HIDDEN, FC1), jnp.float32) * scale(HIDDEN),
        "b1": jax.random.normal(ks[2], (1, FC1), jnp.float32) * 0.01,
        "w2": jax.random.normal(ks[3], (FC1, FC2), jnp.float32) * scale(FC1),
        "b2": jax.random.normal(ks[4], (1, FC2), jnp.float32) * 0.01,
        "w3": jax.random.normal(ks[5], (FC2, labels), jnp.float32) * scale(FC2),
        "b3": jax.random.normal(ks[6], (1, labels), jnp.float32) * 0.01,
    }


if __name__ == "__main__":
    key = jax.random.PRNGKey(0)
    k_param, k_ids, k_mask = jax.random.split(key, 3)

    B, S, VOCAB = 512, 16, 128
    params = init_params(k_param, vocab_size=VOCAB, labels=LABELS)
    prepped = prepare_params(params)      # one-time cast/pad, outside the forward

    sent_id = jax.random.randint(k_ids, (B, S), 0, VOCAB, dtype=jnp.int32)
    # attention mask: first few tokens valid (used only by the real encoder)
    mask = (jnp.arange(S)[None, :] <
            jax.random.randint(k_mask, (B, 1), 1, S + 1)).astype(jnp.int32)

    cfg = _device_config()
    # Demo batch must exercise the multi-tile grid (>= 2 steps).
    tb_demo = _pick_batch_tile(B, cfg["target_steps"], cfg["max_tile"])
    assert -(-B // tb_demo) >= 2

    forward = make_forward(LABELS, cfg)
    try:
        out = jax.block_until_ready(forward(sent_id, mask, prepped))
    except Exception:
        if cfg["semantics"] == "parallel":
            raise
        # Fallback if CORE_PARALLEL lowering is unavailable on this chip.
        cfg = dict(cfg, semantics="parallel", num_cores=1)
        forward = make_forward(LABELS, cfg)
        out = jax.block_until_ready(forward(sent_id, mask, prepped))

    assert out.shape == (B, LABELS)
    # log-softmax rows must sum to 1 in probability space
    assert bool(jnp.allclose(jnp.sum(jnp.exp(out), axis=1), 1.0, atol=1e-4))

    # correctness check against a pure-JAX reference (same bf16 dtype flow)
    cls = jnp.take(prepped["embed"], sent_id[:, 0], axis=0)
    ref = head_reference(cls, prepped, LABELS)
    assert bool(jnp.allclose(out, ref, atol=5e-3, rtol=0.0)), \
        float(jnp.max(jnp.abs(out - ref)))

    print("KERNEL_OK")
</pallas_src>

<mosaic_0001>
module attributes {stable_mosaic.version = 11 : i64} {
  func.func @bert_head_kernel(%arg0: i32, %arg1: memref<256x768xbf16, #tpu.memory_space<vmem>>, %arg2: memref<768x512xbf16, #tpu.memory_space<vmem>>, %arg3: memref<1x512xf32, #tpu.memory_space<vmem>>, %arg4: memref<512x256xbf16, #tpu.memory_space<vmem>>, %arg5: memref<1x256xf32, #tpu.memory_space<vmem>>, %arg6: memref<256x128xbf16, #tpu.memory_space<vmem>>, %arg7: memref<1x128xf32, #tpu.memory_space<vmem>>, %arg8: memref<256x128xf32, #tpu.memory_space<vmem>>) attributes {dimension_semantics = [#tpu.dimension_semantics<parallel>], iteration_bounds = array<i64: 2>, scalar_prefetch = 0 : i64, scratch_operands = 0 : i64, tpu.core_type = #tpu.core_type<tc>, window_params = [{transform_indices = @transform_0, window_bounds = array<i64: 256, 768>}, {pipeline_mode = #tpu.pipeline_mode<synchronous>, transform_indices = @transform_1, window_bounds = array<i64: 768, 512>}, {pipeline_mode = #tpu.pipeline_mode<synchronous>, transform_indices = @transform_2, window_bounds = array<i64: 1, 512>}, {pipeline_mode = #tpu.pipeline_mode<synchronous>, transform_indices = @transform_3, window_bounds = array<i64: 512, 256>}, {pipeline_mode = #tpu.pipeline_mode<synchronous>, transform_indices = @transform_4, window_bounds = array<i64: 1, 256>}, {pipeline_mode = #tpu.pipeline_mode<synchronous>, transform_indices = @transform_5, window_bounds = array<i64: 256, 128>}, {pipeline_mode = #tpu.pipeline_mode<synchronous>, transform_indices = @transform_6, window_bounds = array<i64: 1, 128>}, {transform_indices = @transform_7, window_bounds = array<i64: 256, 128>}]} {
    %c0 = arith.constant 0 : index
    %c0_0 = arith.constant 0 : index
    %0 = vector.load %arg1[%c0, %c0_0] : memref<256x768xbf16, #tpu.memory_space<vmem>>, vector<256x768xbf16>
    %c0_1 = arith.constant 0 : index
    %c0_2 = arith.constant 0 : index
    %1 = vector.load %arg2[%c0_1, %c0_2] : memref<768x512xbf16, #tpu.memory_space<vmem>>, vector<768x512xbf16>
    %cst = arith.constant dense<0.000000e+00> : vector<256x512xf32>
    %2 = tpu.matmul %0, %1, %cst {dimension_numbers = #tpu.dot_dimension_numbers<[1], [0], [0], [1], [0, 0, 1, 1], [], []>} : vector<256x768xbf16>, vector<768x512xbf16>, vector<256x512xf32> -> vector<256x512xf32>
    %c0_3 = arith.constant 0 : index
    %c0_4 = arith.constant 0 : index
    %3 = vector.load %arg3[%c0_3, %c0_4] : memref<1x512xf32, #tpu.memory_space<vmem>>, vector<1x512xf32>
    %4 = vector.broadcast %3 : vector<1x512xf32> to vector<256x512xf32>
    %5 = arith.addf %2, %4 : vector<256x512xf32>
    %cst_5 = arith.constant 0.000000e+00 : f32
    %6 = vector.broadcast %cst_5 : f32 to vector<256x512xf32>
    %7 = arith.maximumf %5, %6 : vector<256x512xf32>
    %8 = arith.truncf %7 : vector<256x512xf32> to vector<256x512xbf16>
    %c0_6 = arith.constant 0 : index
    %c0_7 = arith.constant 0 : index
    %9 = vector.load %arg4[%c0_6, %c0_7] : memref<512x256xbf16, #tpu.memory_space<vmem>>, vector<512x256xbf16>
    %cst_8 = arith.constant dense<0.000000e+00> : vector<256x256xf32>
    %10 = tpu.matmul %8, %9, %cst_8 {dimension_numbers = #tpu.dot_dimension_numbers<[1], [0], [0], [1], [0, 0, 1, 1], [], []>} : vector<256x512xbf16>, vector<512x256xbf16>, vector<256x256xf32> -> vector<256x256xf32>
    %c0_9 = arith.constant 0 : index
    %c0_10 = arith.constant 0 : index
    %11 = vector.load %arg5[%c0_9, %c0_10] : memref<1x256xf32, #tpu.memory_space<vmem>>, vector<1x256xf32>
    %12 = vector.broadcast %11 : vector<1x256xf32> to vector<256x256xf32>
    %13 = arith.addf %10, %12 : vector<256x256xf32>
    %cst_11 = arith.constant 0.000000e+00 : f32
    %14 = vector.broadcast %cst_11 : f32 to vector<256x256xf32>
    %15 = arith.maximumf %13, %14 : vector<256x256xf32>
    %16 = arith.truncf %15 : vector<256x256xf32> to vector<256x256xbf16>
    %c0_12 = arith.constant 0 : index
    %c0_13 = arith.constant 0 : index
    %17 = vector.load %arg6[%c0_12, %c0_13] : memref<256x128xbf16, #tpu.memory_space<vmem>>, vector<256x128xbf16>
    %cst_14 = arith.constant dense<0.000000e+00> : vector<256x128xf32>
    %18 = tpu.matmul %16, %17, %cst_14 {dimension_numbers = #tpu.dot_dimension_numbers<[1], [0], [0], [1], [0, 0, 1, 1], [], []>} : vector<256x256xbf16>, vector<256x128xbf16>, vector<256x128xf32> -> vector<256x128xf32>
    %c0_15 = arith.constant 0 : index
    %c0_16 = arith.constant 0 : index
    %19 = vector.load %arg7[%c0_15, %c0_16] : memref<1x128xf32, #tpu.memory_space<vmem>>, vector<1x128xf32>
    %20 = vector.broadcast %19 : vector<1x128xf32> to vector<256x128xf32>
    %21 = arith.addf %18, %20 : vector<256x128xf32>
    %cst_17 = arith.constant dense<0xFF800000> : vector<256xf32>
    %22 = vector.multi_reduction <maximumf>, %21, %cst_17 [1] : vector<256x128xf32> to vector<256xf32>
    %23 = vector.shape_cast %22 : vector<256xf32> to vector<256x1xf32>
    %24 = vector.broadcast %23 : vector<256x1xf32> to vector<256x128xf32>
    %25 = arith.subf %21, %24 : vector<256x128xf32>
    %26 = math.exp %25 : vector<256x128xf32>
    %cst_18 = arith.constant dense<0.000000e+00> : vector<256xf32>
    %27 = vector.multi_reduction <add>, %26, %cst_18 [1] : vector<256x128xf32> to vector<256xf32>
    %28 = vector.shape_cast %27 : vector<256xf32> to vector<256x1xf32>
    %29 = math.log %28 : vector<256x1xf32>
    %30 = vector.broadcast %29 : vector<256x1xf32> to vector<256x128xf32>
    %31 = arith.subf %25, %30 : vector<256x128xf32>
    %c0_19 = arith.constant 0 : index
    %c0_20 = arith.constant 0 : index
    %32 = vector.load %arg8[%c0_19, %c0_20] : memref<256x128xf32, #tpu.memory_space<vmem>>, vector<256x128xf32>
    tpu.vector_store %arg8[%c0_19, %c0_20], %31 {strides = array<i32>} : memref<256x128xf32, #tpu.memory_space<vmem>>, vector<256x128xf32>,
    return
  }
  func.func @transform_0(%arg0: i32) -> (i32, i32) {
    %c0_i32 = arith.constant 0 : i32
    %c0_i32_0 = arith.constant 0 : i32
    return %arg0, %c0_i32 : i32, i32
  }
  func.func @transform_1(%arg0: i32) -> (i32, i32) {
    %c0_i32 = arith.constant 0 : i32
    %c0_i32_0 = arith.constant 0 : i32
    %c0_i32_1 = arith.constant 0 : i32
    return %c0_i32, %c0_i32_0 : i32, i32
  }
  func.func @transform_2(%arg0: i32) -> (i32, i32) {
    %c0_i32 = arith.constant 0 : i32
    %c0_i32_0 = arith.constant 0 : i32
    %c0_i32_1 = arith.constant 0 : i32
    return %c0_i32, %c0_i32_0 : i32, i32
  }
  func.func @transform_3(%arg0: i32) -> (i32, i32) {
    %c0_i32 = arith.constant 0 : i32
    %c0_i32_0 = arith.constant 0 : i32
    %c0_i32_1 = arith.constant 0 : i32
    return %c0_i32, %c0_i32_0 : i32, i32
  }
  func.func @transform_4(%arg0: i32) -> (i32, i32) {
    %c0_i32 = arith.constant 0 : i32
    %c0_i32_0 = arith.constant 0 : i32
    %c0_i32_1 = arith.constant 0 : i32
    return %c0_i32, %c0_i32_0 : i32, i32
  }
  func.func @transform_5(%arg0: i32) -> (i32, i32) {
    %c0_i32 = arith.constant 0 : i32
    %c0_i32_0 = arith.constant 0 : i32
    %c0_i32_1 = arith.constant 0 : i32
    return %c0_i32, %c0_i32_0 : i32, i32
  }
  func.func @transform_6(%arg0: i32) -> (i32, i32) {
    %c0_i32 = arith.constant 0 : i32
    %c0_i32_0 = arith.constant 0 : i32
    %c0_i32_1 = arith.constant 0 : i32
    return %c0_i32, %c0_i32_0 : i32, i32
  }
  func.func @transform_7(%arg0: i32) -> (i32, i32) {
    %c0_i32 = arith.constant 0 : i32
    %c0_i32_0 = arith.constant 0 : i32
    return %arg0, %c0_i32 : i32, i32
  }
}

</mosaic_0001>

<bundles_post_ra>
// kernel: forward.1
= control target key start
LH: loop header
LB: loop body
LE: loop exit
PB: predicated region body
PF: predicated region fallthrough
CT: control target
= control target key end

     0   :  { %s6745_s24 = smov 0   ;;  %s8681_s0 = inlined_call_operand.vmem [shape: bf16[512,768], index: 0, kind: input, shape index: {}]   ;;  %s8682_s1 = inlined_call_operand.vmem [shape: bf16[768,512], index: 1, kind: input, shape index: {}]   ;;  %s8683_s2 = inlined_call_operand.vmem [shape: f32[1,512], index: 2, kind: input, shape index: {}]   ;;  %s8684_s3 = inlined_call_operand.vmem [shape: bf16[512,256], index: 3, kind: input, shape index: {}]   ;;  %s8685_s4 = inlined_call_operand.vmem [shape: f32[1,256], index: 4, kind: input, shape index: {}]   ;;  %s8686_s5 = inlined_call_operand.vmem [shape: bf16[256,128], index: 5, kind: input, shape index: {}]   ;;  %s8687_s6 = inlined_call_operand.vmem [shape: f32[1,128], index: 6, kind: input, shape index: {}]   ;;  %s8688_s7 = inlined_call_operand.vmem [shape: f32[512,128], index: 7, kind: output, shape index: {}]  }
   0x1 LB: > { %s4968_s25 = sadd.s32 4294967295, %s6703_s24   ;;  %p4972_p0 = scmp.ge.s32.totalorder %s6703_s24, 1  ;;  %s6703_s24 = sphi %s6745_s24, %s17_s24  }
   0x2   : > { %p239_p1 = scmp.lt.s32.totalorder %s6703_s24, 3 }
   0x4   : > { %p240_p2 = pnand %p4972_p0, %p239_p1 }
   0x6   : > { %243 = sbr.rel (%p240_p2) target bundleno = 1496 (0x5d8), region = 48 }
   0xd   : > { %v6013_v0 = vld [vmem:[%s8682_s1 + $0x4] ss:$16 sps:$4 sm:$0xff]   ;;  %v6015_v1 = vld [vmem:[%s8682_s1] ss:$16 sps:$4 sm:$0xff]   ;;  %s4973_s13 = sshll.u32 %s4968_s25, 5 }
   0xe   : > { %2036 = vmatprep.subr.bf16.mxu0 %v6013_v0  ;;  %5460 = vmatprep.subr.bf16.mxu1 %v6013_v0  ;;  %v6016_v2 = vld [vmem:[%s8682_s1 + $0x24] ss:$16 sps:$4 sm:$0xff]   ;;  %v6018_v3 = vld [vmem:[%s8682_s1 + $0x20] ss:$16 sps:$4 sm:$0xff]   ;;  %p273_p3 = scmp.lt.s32.totalorder %s4973_s13, 63 }
   0xf   : > { %2037 = vmatpush1.bf16.msra.mxu0 %v6015_v1  ;;  %5476 = vmatpush1.bf16.msra.mxu1 %v6015_v1  ;;  %v6019_v4 = vld [vmem:[%s8682_s1 + $0x44] ss:$16 sps:$4 sm:$0xff]   ;;  %v6021_v5 = vld [vmem:[%s8682_s1 + $0x40] ss:$16 sps:$4 sm:$0xff]   ;;  %v6072_v36 = vld [vmem:[%s8682_s1 + $0xc] ss:$16 sps:$4 sm:$0xff]  }
  0x10   : > { %2038 = vmatprep.subr.bf16.mxu0 %v6016_v2  ;;  %5461 = vmatprep.subr.bf16.mxu1 %v6016_v2  ;;  %v6022_v6 = vld [vmem:[%s8682_s1 + $0x64] ss:$16 sps:$4 sm:$0xff]   ;;  %v6024_v7 = vld [vmem:[%s8682_s1 + $0x60] ss:$16 sps:$4 sm:$0xff]   ;;  %s8702_s13 = smov (!%p273_p3, %s4973_s13), 63 }
  0x11   : > { %v6025_v8 = vld [vmem:[%s8682_s1 + $0x84] ss:$16 sps:$4 sm:$0xff]   ;;  %v6027_v9 = vld [vmem:[%s8682_s1 + $0x80] ss:$16 sps:$4 sm:$0xff]   ;;  %s6004_s25 = smul.u32 24, %s8702_s13  ;;  %s4976_s11 = sshll.u32 %s8702_s13, 3 }
  0x12   : > { %v6028_v10 = vld [vmem:[%s8682_s1 + $0xa4] ss:$16 sps:$4 sm:$0xff]   ;;  %v6030_v11 = vld [vmem:[%s8682_s1 + $0xa0] ss:$16 sps:$4 sm:$0xff]   ;;  %v6070_v39 = vld [vmem:[%s8682_s1 + $0x8] ss:$16 sps:$4 sm:$0xff]   ;;  %s8612_s15 = scalar_lea.vmem %s8688_s7, %s4976_s11 }
  0x13   : > { %2039 = vmatpush1.bf16.msra.mxu0 %v6018_v3  ;;  %5477 = vmatpush1.bf16.msra.mxu1 %v6018_v3  ;;  %s6795_s9 = scalar_lea.vmem %s8681_s0, %s6004_s25  ;;  %v6031_v12 = vld [vmem:[%s8682_s1 + $0xc4] ss:$16 sps:$4 sm:$0xff]   ;;  %v6033_v14 = vld [vmem:[%s8682_s1 + $0xc0] ss:$16 sps:$4 sm:$0xff]   ;;  %v6078_v41 = vld [vmem:[%s8682_s1 + $0x2c] ss:$16 sps:$4 sm:$0xff]  }
  0x14   : > { %2040 = vmatprep.subr.bf16.mxu0 %v6019_v4  ;;  %5462 = vmatprep.subr.bf16.mxu1 %v6019_v4  ;;  %v6801_v13 = vld [vmem:[%s6795_s9 + $0x4] ss:$24 sps:$4 sm:$0xff]   ;;  %v6036_v17 = vld [vmem:[%s8682_s1 + $0xe0] ss:$16 sps:$4 sm:$0xff]   ;;  %v6885_v42 = vld [vmem:[%s6795_s9 + $0x34] ss:$24 sps:$4 sm:$0xff]  }
  0x15   : > { %v6066_v15 = vld [vmem:[%s6795_s9 + $0x184] ss:$24 sps:$4 sm:$0xff]   ;;  %2068 = vmatprep.mubr.bf16.mxu0 %v6801_v13  ;;  %v6039_v19 = vld [vmem:[%s8682_s1 + $0x100] ss:$16 sps:$4 sm:$0xff]   ;;  %v6081_v43 = vld [vmem:[%s6795_s9 + $0x1b4] ss:$24 sps:$4 sm:$0xff]  }
  0x16   : > { %v6034_v16 = vld [vmem:[%s8682_s1 + $0xe4] ss:$16 sps:$4 sm:$0xff]   ;;  %2148 = vmatprep.mubr.bf16.mxu1 %v6066_v15  ;;  %v6042_v21 = vld [vmem:[%s8682_s1 + $0x120] ss:$16 sps:$4 sm:$0xff]   ;;  %v6076_v45 = vld [vmem:[%s8682_s1 + $0x28] ss:$16 sps:$4 sm:$0xff]  }
  0x17   : > { %2041 = vmatpush1.bf16.msra.mxu0 %v6021_v5  ;;  %5478 = vmatpush1.bf16.msra.mxu1 %v6021_v5  ;;  %v6037_v18 = vld [vmem:[%s8682_s1 + $0x104] ss:$16 sps:$4 sm:$0xff]   ;;  %v6045_v23 = vld [vmem:[%s8682_s1 + $0x140] ss:$16 sps:$4 sm:$0xff]   ;;  %v6090_v48 = vld [vmem:[%s8682_s1 + $0x4c] ss:$16 sps:$4 sm:$0xff]  }
  0x18   : > { %2042 = vmatprep.subr.bf16.mxu0 %v6022_v6  ;;  %5463 = vmatprep.subr.bf16.mxu1 %v6022_v6  ;;  %v6040_v20 = vld [vmem:[%s8682_s1 + $0x124] ss:$16 sps:$4 sm:$0xff]   ;;  %v6048_v25 = vld [vmem:[%s8682_s1 + $0x160] ss:$16 sps:$4 sm:$0xff]   ;;  %v6088_v51 = vld [vmem:[%s8682_s1 + $0x48] ss:$16 sps:$4 sm:$0xff]  }
  0x19   : > { %v6043_v22 = vld [vmem:[%s8682_s1 + $0x144] ss:$16 sps:$4 sm:$0xff]   ;;  %v6051_v27 = vld [vmem:[%s8682_s1 + $0x180] ss:$16 sps:$4 sm:$0xff]   ;;  %v6096_v53 = vld [vmem:[%s8682_s1 + $0x6c] ss:$16 sps:$4 sm:$0xff]  }
  0x1a   : > { %v6046_v24 = vld [vmem:[%s8682_s1 + $0x164] ss:$16 sps:$4 sm:$0xff]   ;;  %v6054_v29 = vld [vmem:[%s8682_s1 + $0x1a0] ss:$16 sps:$4 sm:$0xff]   ;;  %v6094_v57 = vld [vmem:[%s8682_s1 + $0x68] ss:$16 sps:$4 sm:$0xff]  }
  0x1b   : > { %2043 = vmatpush1.bf16.msra.mxu0 %v6024_v7  ;;  %5479 = vmatpush1.bf16.msra.mxu1 %v6024_v7  ;;  %v6049_v26 = vld [vmem:[%s8682_s1 + $0x184] ss:$16 sps:$4 sm:$0xff]   ;;  %v6057_v31 = vld [vmem:[%s8682_s1 + $0x1c0] ss:$16 sps:$4 sm:$0xff]   ;;  %v6108_v60 = vld [vmem:[%s8682_s1 + $0x8c] ss:$16 sps:$4 sm:$0xff]  }
  0x1c   : > { %2044 = vmatprep.subr.bf16.mxu0 %v6025_v8  ;;  %5464 = vmatprep.subr.bf16.mxu1 %v6025_v8  ;;  %v6052_v28 = vld [vmem:[%s8682_s1 + $0x1a4] ss:$16 sps:$4 sm:$0xff]   ;;  %v6060_v33 = vld [vmem:[%s8682_s1 + $0x1e0] ss:$16 sps:$4 sm:$0xff]   ;;  %v6106_v63 = vld [vmem:[%s8682_s1 + $0x88] ss:$16 sps:$4 sm:$0xff]  }
  0x1d   : > { %v6055_v30 = vld [vmem:[%s8682_s1 + $0x1c4] ss:$16 sps:$4 sm:$0xff]   ;;  %v6866_v35 = vld [vmem:[%s6795_s9] ss:$24 sps:$4 sm:$0xff]   ;;  %v6899_v47 = vld [vmem:[%s6795_s9 + $0x30] ss:$24 sps:$4 sm:$0xff]  }
  0x1e   : > { %v6058_v32 = vld [vmem:[%s8682_s1 + $0x1e4] ss:$16 sps:$4 sm:$0xff]   ;;  %v6064_v37 = vld [vmem:[%s6795_s9 + $0x180] ss:$24 sps:$4 sm:$0xff]   ;;  %v6084_v49 = vld [vmem:[%s6795_s9 + $0x1b0] ss:$24 sps:$4 sm:$0xff]  }
  0x1f   : > { %2045 = vmatpush1.bf16.msra.mxu0 %v6027_v9  ;;  %5480 = vmatpush1.bf16.msra.mxu1 %v6027_v9  ;;  %v6069_v34 = vld [vmem:[%s8682_s1 + $0x204] ss:$16 sps:$4 sm:$0xff]   ;;  %v6067_v38 = vld [vmem:[%s8682_s1 + $0x200] ss:$16 sps:$4 sm:$0xff]   ;;  %v6114_v1 = vld [vmem:[%s8682_s1 + $0xac] ss:$16 sps:$4 sm:$0xff]  }
  0x20   : > { %2046 = vmatprep.subr.bf16.mxu0 %v6028_v10  ;;  %5465 = vmatprep.subr.bf16.mxu1 %v6028_v10  ;;  %v6075_v40 = vld [vmem:[%s8682_s1 + $0x224] ss:$16 sps:$4 sm:$0xff]   ;;  %v6073_v44 = vld [vmem:[%s8682_s1 + $0x220] ss:$16 sps:$4 sm:$0xff]   ;;  %v6112_v5 = vld [vmem:[%s8682_s1 + $0xa8] ss:$16 sps:$4 sm:$0xff]  }
  0x21   : > { %v6087_v46 = vld [vmem:[%s8682_s1 + $0x244] ss:$16 sps:$4 sm:$0xff]   ;;  %v6085_v50 = vld [vmem:[%s8682_s1 + $0x240] ss:$16 sps:$4 sm:$0xff]   ;;  %v6126_v8 = vld [vmem:[%s8682_s1 + $0xcc] ss:$16 sps:$4 sm:$0xff]  }
  0x22   : > { %v6093_v52 = vld [vmem:[%s8682_s1 + $0x264] ss:$16 sps:$4 sm:$0xff]   ;;  %v6091_v56 = vld [vmem:[%s8682_s1 + $0x260] ss:$16 sps:$4 sm:$0xff]  }
  0x23   : > { %2047 = vmatpush1.bf16.msra.mxu0 %v6030_v11  ;;  %5481 = vmatpush1.bf16.msra.mxu1 %v6030_v11  ;;  %v6919_v54 = vld [vmem:[%s6795_s9 + $0x64] ss:$24 sps:$4 sm:$0xff]   ;;  %v6933_v59 = vld [vmem:[%s6795_s9 + $0x60] ss:$24 sps:$4 sm:$0xff]   ;;  %v6953_v2 = vld [vmem:[%s6795_s9 + $0x94] ss:$24 sps:$4 sm:$0xff]  }
  0x24   : > { %2048 = vmatprep.subr.bf16.mxu0 %v6031_v12  ;;  %5466 = vmatprep.subr.bf16.mxu1 %v6031_v12  ;;  %v6099_v55 = vld [vmem:[%s6795_s9 + $0x1e4] ss:$24 sps:$4 sm:$0xff]   ;;  %v6102_v61 = vld [vmem:[%s6795_s9 + $0x1e0] ss:$24 sps:$4 sm:$0xff]   ;;  %v6117_v3 = vld [vmem:[%s6795_s9 + $0x214] ss:$24 sps:$4 sm:$0xff]  }
  0x25   : > { %v6105_v58 = vld [vmem:[%s8682_s1 + $0x284] ss:$16 sps:$4 sm:$0xff]   ;;  %v6103_v62 = vld [vmem:[%s8682_s1 + $0x280] ss:$16 sps:$4 sm:$0xff]   ;;  %v6124_v11 = vld [vmem:[%s8682_s1 + $0xc8] ss:$16 sps:$4 sm:$0xff]  }
  0x26   : > { %v6111_v0 = vld [vmem:[%s8682_s1 + $0x2a4] ss:$16 sps:$4 sm:$0xff]   ;;  %v6109_v4 = vld [vmem:[%s8682_s1 + $0x2a0] ss:$16 sps:$4 sm:$0xff]  }
  0x27   : > { %2049 = vmatpush1.bf16.msra.mxu0 %v6033_v14  ;;  %5482 = vmatpush1.bf16.msra.mxu1 %v6033_v14  ;;  %v6123_v6 = vld [vmem:[%s8682_s1 + $0x2c4] ss:$16 sps:$4 sm:$0xff]   ;;  %v6967_v7 = vld [vmem:[%s6795_s9 + $0x90] ss:$24 sps:$4 sm:$0xff]   ;;  %v6132_v14 = vld [vmem:[%s8682_s1 + $0xec] ss:$16 sps:$4 sm:$0xff]  }
  0x28   : > { %2050 = vmatprep.subr.bf16.mxu0 %v6034_v16  ;;  %5467 = vmatprep.subr.bf16.mxu1 %v6034_v16  ;;  %v6120_v9 = vld [vmem:[%s6795_s9 + $0x210] ss:$24 sps:$4 sm:$0xff]   ;;  %v6129_v12 = vld [vmem:[%s8682_s1 + $0x2e4] ss:$16 sps:$4 sm:$0xff]  }
  0x29   : > { %v6121_v10 = vld [vmem:[%s8682_s1 + $0x2c0] ss:$16 sps:$4 sm:$0xff]   ;;  %v6987_v15 = vld [vmem:[%s6795_s9 + $0xc4] ss:$24 sps:$4 sm:$0xff]  }
  0x2a   : > { %v6135_v16 = vld [vmem:[%s6795_s9 + $0x244] ss:$24 sps:$4 sm:$0xff]  }
  0x2b   : > { %2051 = vmatpush1.bf16.msra.mxu0 %v6036_v17  ;;  %5483 = vmatpush1.bf16.msra.mxu1 %v6036_v17  ;;  %v6127_v17 = vld [vmem:[%s8682_s1 + $0x2e0] ss:$16 sps:$4 sm:$0xff]  }
  0x2c   : > { %2052 = vmatprep.subr.bf16.mxu0 %v6037_v18  ;;  %5468 = vmatprep.subr.bf16.mxu1 %v6037_v18  ;;  %v6130_v18 = vld [vmem:[%s8682_s1 + $0xe8] ss:$16 sps:$4 sm:$0xff]  }
  0x2f   : > { %2053 = vmatpush1.bf16.msra.mxu0 %v6039_v19  ;;  %5484 = vmatpush1.bf16.msra.mxu1 %v6039_v19  ;;  %v6141_v19 = vld [vmem:[%s8682_s1 + $0x304] ss:$16 sps:$4 sm:$0xff]  }
  0x30   : > { %2054 = vmatprep.subr.bf16.mxu0 %v6040_v20  ;;  %5469 = vmatprep.subr.bf16.mxu1 %v6040_v20  ;;  %v7001_v20 = vld [vmem:[%s6795_s9 + $0xc0] ss:$24 sps:$4 sm:$0xff]  }
  0x33   : > { %2055 = vmatpush1.bf16.msra.mxu0 %v6042_v21  ;;  %5485 = vmatpush1.bf16.msra.mxu1 %v6042_v21  ;;  %v6144_v21 = vld [vmem:[%s8682_s1 + $0x10c] ss:$16 sps:$4 sm:$0xff]  }
  0x34   : > { %2056 = vmatprep.subr.bf16.mxu0 %v6043_v22  ;;  %5470 = vmatprep.subr.bf16.mxu1 %v6043_v22  ;;  %v6138_v22 = vld [vmem:[%s6795_s9 + $0x240] ss:$24 sps:$4 sm:$0xff]  }
  0x37   : > { %2057 = vmatpush1.bf16.msra.mxu0 %v6045_v23  ;;  %5486 = vmatpush1.bf16.msra.mxu1 %v6045_v23  ;;  %v6139_v23 = vld [vmem:[%s8682_s1 + $0x300] ss:$16 sps:$4 sm:$0xff]  }
  0x38   : > { %2058 = vmatprep.subr.bf16.mxu0 %v6046_v24  ;;  %5471 = vmatprep.subr.bf16.mxu1 %v6046_v24  ;;  %v6142_v24 = vld [vmem:[%s8682_s1 + $0x108] ss:$16 sps:$4 sm:$0xff]  }
  0x3b   : > { %2059 = vmatpush1.bf16.msra.mxu0 %v6048_v25  ;;  %5487 = vmatpush1.bf16.msra.mxu1 %v6048_v25  ;;  %v6147_v25 = vld [vmem:[%s8682_s1 + $0x324] ss:$16 sps:$4 sm:$0xff]  }
  0x3c   : > { %2060 = vmatprep.subr.bf16.mxu0 %v6049_v26  ;;  %5472 = vmatprep.subr.bf16.mxu1 %v6049_v26  ;;  %v6150_v26 = vld [vmem:[%s8682_s1 + $0x12c] ss:$16 sps:$4 sm:$0xff]  }
  0x3f   : > { %2061 = vmatpush1.bf16.msra.mxu0 %v6051_v27  ;;  %5488 = vmatpush1.bf16.msra.mxu1 %v6051_v27  ;;  %v7021_v27 = vld [vmem:[%s6795_s9 + $0xf4] ss:$24 sps:$4 sm:$0xff]  }
  0x40   : > { %2062 = vmatprep.subr.bf16.mxu0 %v6052_v28  ;;  %5473 = vmatprep.subr.bf16.mxu1 %v6052_v28  ;;  %v6153_v28 = vld [vmem:[%s6795_s9 + $0x274] ss:$24 sps:$4 sm:$0xff]  }
  0x43   : > { %2063 = vmatpush1.bf16.msra.mxu0 %v6054_v29  ;;  %5489 = vmatpush1.bf16.msra.mxu1 %v6054_v29  ;;  %v6145_v29 = vld [vmem:[%s8682_s1 + $0x320] ss:$16 sps:$4 sm:$0xff]  }
  0x44   : > { %2064 = vmatprep.subr.bf16.mxu0 %v6055_v30  ;;  %5474 = vmatprep.subr.bf16.mxu1 %v6055_v30  ;;  %v6148_v30 = vld [vmem:[%s8682_s1 + $0x128] ss:$16 sps:$4 sm:$0xff]  }
  0x47   : > { %2065 = vmatpush1.bf16.msra.mxu0 %v6057_v31  ;;  %5490 = vmatpush1.bf16.msra.mxu1 %v6057_v31  ;;  %v6159_v31 = vld [vmem:[%s8682_s1 + $0x344] ss:$16 sps:$4 sm:$0xff]  }
  0x48   : > { %2066 = vmatprep.subr.bf16.mxu0 %v6058_v32  ;;  %5475 = vmatprep.subr.bf16.mxu1 %v6058_v32  ;;  %v7035_v32 = vld [vmem:[%s6795_s9 + $0xf0] ss:$24 sps:$4 sm:$0xff]  }
  0x4b   : > { %2067 = vmatpush1.bf16.msra.mxu0 %v6060_v33  ;;  %5491 = vmatpush1.bf16.msra.mxu1 %v6060_v33  ;;  %v6162_v33 = vld [vmem:[%s8682_s1 + $0x14c] ss:$16 sps:$4 sm:$0xff]  }
  0x4c   : > { %2229 = vmatprep.subr.bf16.mxu0 %v6069_v34  ;;  %2615 = vmatprep.subr.bf16.mxu1 %v6072_v36  ;;  %v6156_v34 = vld [vmem:[%s6795_s9 + $0x270] ss:$24 sps:$4 sm:$0xff]  }
  0x4d   : > { %v6157_v36 = vld [vmem:[%s8682_s1 + $0x340] ss:$16 sps:$4 sm:$0xff]  }
  0x4e   : > { %2069 = vmatmul.mubr.bf16.vlgmr.msra.gmra.mrb[0].mxu0 %v6866_v35  ;;  %2149 = vmatmul.mubr.bf16.vlgmr.msra.gmra.mrb[0].mxu1 %v6064_v37  ;;  %v6160_v37 = vld [vmem:[%s8682_s1 + $0x148] ss:$16 sps:$4 sm:$0xff]  }
  0x4f   : > { %2230 = vmatpush1.bf16.msra.mxu0 %v6067_v38  ;;  %2616 = vmatpush1.bf16.msra.mxu1 %v6070_v39  ;;  %v6165_v38 = vld [vmem:[%s8682_s1 + $0x364] ss:$16 sps:$4 sm:$0xff]   ;;  %v6168_v39 = vld [vmem:[%s8682_s1 + $0x16c] ss:$16 sps:$4 sm:$0xff]  }
  0x50   : > { %2231 = vmatprep.subr.bf16.mxu0 %v6075_v40  ;;  %2617 = vmatprep.subr.bf16.mxu1 %v6078_v41  ;;  %v7055_v40 = vld [vmem:[%s6795_s9 + $0x124] ss:$24 sps:$4 sm:$0xff]  }
  0x51   : > { %2078 = vmatprep.mubr.bf16.mxu0 %v6885_v42  ;;  %2158 = vmatprep.mubr.bf16.mxu1 %v6081_v43  ;;  %v7058_v41 = vld [vmem:[%s6795_s9 + $0x2a4] ss:$24 sps:$4 sm:$0xff]   ;;  %v6163_v43 = vld [vmem:[%s8682_s1 + $0x360] ss:$16 sps:$4 sm:$0xff]  }
  0x53   : > { %2232 = vmatpush1.bf16.msra.mxu0 %v6073_v44  ;;  %2618 = vmatpush1.bf16.msra.mxu1 %v6076_v45  ;;  %v6166_v44 = vld [vmem:[%s8682_s1 + $0x168] ss:$16 sps:$4 sm:$0xff]   ;;  %v6177_v45 = vld [vmem:[%s8682_s1 + $0x384] ss:$16 sps:$4 sm:$0xff]  }
  0x54   : > { %2233 = vmatprep.subr.bf16.mxu0 %v6087_v46  ;;  %2619 = vmatprep.subr.bf16.mxu1 %v6090_v48  ;;  %v7071_v46 = vld [vmem:[%s6795_s9 + $0x120] ss:$24 sps:$4 sm:$0xff]   ;;  %v6180_v48 = vld [vmem:[%s8682_s1 + $0x18c] ss:$16 sps:$4 sm:$0xff]  }
  0x56   : > { %2079 = vmatmul.mubr.bf16.gmra.mrb[4].mxu0 %v6899_v47  ;;  %2159 = vmatmul.mubr.bf16.gmra.mrb[4].mxu1 %v6084_v49  ;;  %v7079_v49 = vld [vmem:[%s6795_s9 + $0x2a0] ss:$24 sps:$4 sm:$0xff]  }
  0x57   : > { %2234 = vmatpush1.bf16.msra.mxu0 %v6085_v50  ;;  %2620 = vmatpush1.bf16.msra.mxu1 %v6088_v51  ;;  %v6175_v50 = vld [vmem:[%s8682_s1 + $0x380] ss:$16 sps:$4 sm:$0xff]   ;;  %v6178_v51 = vld [vmem:[%s8682_s1 + $0x188] ss:$16 sps:$4 sm:$0xff]  }
  0x58   : > { %2235 = vmatprep.subr.bf16.mxu0 %v6093_v52  ;;  %2621 = vmatprep.subr.bf16.mxu1 %v6096_v53  ;;  %v6183_v52 = vld [vmem:[%s8682_s1 + $0x3a4] ss:$16 sps:$4 sm:$0xff]   ;;  %v6186_v53 = vld [vmem:[%s8682_s1 + $0x1ac] ss:$16 sps:$4 sm:$0xff]  }
  0x59   : > { %2088 = vmatprep.mubr.bf16.mxu0 %v6919_v54  ;;  %2168 = vmatprep.mubr.bf16.mxu1 %v6099_v55  ;;  %v7094_v55 = vld [vmem:[%s6795_s9 + $0x154] ss:$24 sps:$4 sm:$0xff]  }
  0x5b   : > { %2236 = vmatpush1.bf16.msra.mxu0 %v6091_v56  ;;  %2622 = vmatpush1.bf16.msra.mxu1 %v6094_v57  ;;  %v7097_v56 = vld [vmem:[%s6795_s9 + $0x2d4] ss:$24 sps:$4 sm:$0xff]   ;;  %v6181_v57 = vld [vmem:[%s8682_s1 + $0x3a0] ss:$16 sps:$4 sm:$0xff]  }
  0x5c   : > { %2237 = vmatprep.subr.bf16.mxu0 %v6105_v58  ;;  %2623 = vmatprep.subr.bf16.mxu1 %v6108_v60  ;;  %v6184_v58 = vld [vmem:[%s8682_s1 + $0x1a8] ss:$16 sps:$4 sm:$0xff]   ;;  %v6195_v60 = vld [vmem:[%s8682_s1 + $0x3c4] ss:$16 sps:$4 sm:$0xff]  }
  0x5e   : > { %2089 = vmatmul.mubr.bf16.gmra.mrb[8].mxu0 %v6933_v59  ;;  %2169 = vmatmul.mubr.bf16.gmra.mrb[8].mxu1 %v6102_v61  ;;  %v6198_v61 = vld [vmem:[%s8682_s1 + $0x1cc] ss:$16 sps:$4 sm:$0xff]  }
  0x5f   : > { %2238 = vmatpush1.bf16.msra.mxu0 %v6103_v62  ;;  %2624 = vmatpush1.bf16.msra.mxu1 %v6106_v63  ;;  %v7116_v62 = vld [vmem:[%s6795_s9 + $0x150] ss:$24 sps:$4 sm:$0xff]  }
  0x60   : > { %2239 = vmatprep.subr.bf16.mxu0 %v6111_v0  ;;  %2625 = vmatprep.subr.bf16.mxu1 %v6114_v1  ;;  %v7119_v63 = vld [vmem:[%s6795_s9 + $0x2d0] ss:$24 sps:$4 sm:$0xff]  }
  0x61   : > { %2098 = vmatprep.mubr.bf16.mxu0 %v6953_v2  ;;  %2178 = vmatprep.mubr.bf16.mxu1 %v6117_v3  ;;  %v6193_v0 = vld [vmem:[%s8682_s1 + $0x3c0] ss:$16 sps:$4 sm:$0xff]   ;;  %v6196_v1 = vld [vmem:[%s8682_s1 + $0x1c8] ss:$16 sps:$4 sm:$0xff]   ;;  %v6201_v3 = vld [vmem:[%s8682_s1 + $0x3e4] ss:$16 sps:$4 sm:$0xff]  }
  0x63   : > { %2240 = vmatpush1.bf16.msra.mxu0 %v6109_v4  ;;  %2626 = vmatpush1.bf16.msra.mxu1 %v6112_v5  ;;  %v6204_v4 = vld [vmem:[%s8682_s1 + $0x1ec] ss:$16 sps:$4 sm:$0xff]  }
  0x64   : > { %2241 = vmatprep.subr.bf16.mxu0 %v6123_v6  ;;  %2627 = vmatprep.subr.bf16.mxu1 %v6126_v8  ;;  %v7134_v5 = vld [vmem:[%s6795_s9 + $0xc] ss:$24 sps:$4 sm:$0xff]   ;;  %v6199_v6 = vld [vmem:[%s8682_s1 + $0x3e0] ss:$16 sps:$4 sm:$0xff]   ;;  %v6202_v8 = vld [vmem:[%s8682_s1 + $0x1e8] ss:$16 sps:$4 sm:$0xff]  }
  0x66   : > { %2099 = vmatmul.mubr.bf16.gmra.mrb[12].mxu0 %v6967_v7  ;;  %2179 = vmatmul.mubr.bf16.gmra.mrb[12].mxu1 %v6120_v9  ;;  %v6210_v9 = vld [vmem:[%s8682_s1 + $0x404] ss:$16 sps:$4 sm:$0xff]  }
  0x67   : > { %2242 = vmatpush1.bf16.msra.mxu0 %v6121_v10  ;;  %2628 = vmatpush1.bf16.msra.mxu1 %v6124_v11  ;;  %v6213_v10 = vld [vmem:[%s8682_s1 + $0x20c] ss:$16 sps:$4 sm:$0xff]   ;;  %v7153_v11 = vld [vmem:[%s6795_s9 + $0x8] ss:$24 sps:$4 sm:$0xff]  }
  0x68   : > { %2243 = vmatprep.subr.bf16.mxu0 %v6129_v12  ;;  %2629 = vmatprep.subr.bf16.mxu1 %v6132_v14  ;;  %v6208_v12 = vld [vmem:[%s8682_s1 + $0x400] ss:$16 sps:$4 sm:$0xff]   ;;  %v6211_v14 = vld [vmem:[%s8682_s1 + $0x208] ss:$16 sps:$4 sm:$0xff]  }
  0x69   : > { %2108 = vmatprep.mubr.bf16.mxu0 %v6987_v15  ;;  %2188 = vmatprep.mubr.bf16.mxu1 %v6135_v16  ;;  %v7162_v16 = vld [vmem:[%s6795_s9 + $0x3c] ss:$24 sps:$4 sm:$0xff]  }
  0x6b   : > { %2244 = vmatpush1.bf16.msra.mxu0 %v6127_v17  ;;  %2630 = vmatpush1.bf16.msra.mxu1 %v6130_v18  ;;  %v6222_v17 = vld [vmem:[%s8682_s1 + $0x22c] ss:$16 sps:$4 sm:$0xff]   ;;  %v6217_v18 = vld [vmem:[%s8682_s1 + $0x420] ss:$16 sps:$4 sm:$0xff]  }
  0x6c   : > { %2245 = vmatprep.subr.bf16.mxu0 %v6141_v19  ;;  %2631 = vmatprep.subr.bf16.mxu1 %v6144_v21  ;;  %v6220_v19 = vld [vmem:[%s8682_s1 + $0x228] ss:$16 sps:$4 sm:$0xff]   ;;  %v6228_v21 = vld [vmem:[%s8682_s1 + $0x444] ss:$16 sps:$4 sm:$0xff]  }
  0x6e   : > { %2109 = vmatmul.mubr.bf16.gmra.mrb[16].mxu0 %v7001_v20  ;;  %2189 = vmatmul.mubr.bf16.gmra.mrb[16].mxu1 %v6138_v22  ;;  %v7187_v22 = vld [vmem:[%s6795_s9 + $0x38] ss:$24 sps:$4 sm:$0xff]  }
  0x6f   : > { %2246 = vmatpush1.bf16.msra.mxu0 %v6139_v23  ;;  %2632 = vmatpush1.bf16.msra.mxu1 %v6142_v24  ;;  %v7190_v23 = vld [vmem:[%s6795_s9 + $0x6c] ss:$24 sps:$4 sm:$0xff]   ;;  %v6226_v24 = vld [vmem:[%s8682_s1 + $0x440] ss:$16 sps:$4 sm:$0xff]  }
  0x70   : > { %2247 = vmatprep.subr.bf16.mxu0 %v6147_v25  ;;  %2633 = vmatprep.subr.bf16.mxu1 %v6150_v26  ;;  %v6237_v25 = vld [vmem:[%s8682_s1 + $0x464] ss:$16 sps:$4 sm:$0xff]   ;;  %v6240_v26 = vld [vmem:[%s8682_s1 + $0x26c] ss:$16 sps:$4 sm:$0xff]  }
  0x71   : > { %2118 = vmatprep.mubr.bf16.mxu0 %v7021_v27  ;;  %2198 = vmatprep.mubr.bf16.mxu1 %v6153_v28  ;;  %v6235_v28 = vld [vmem:[%s8682_s1 + $0x460] ss:$16 sps:$4 sm:$0xff]  }
  0x73   : > { %2248 = vmatpush1.bf16.msra.mxu0 %v6145_v29  ;;  %2634 = vmatpush1.bf16.msra.mxu1 %v6148_v30  ;;  %v6238_v29 = vld [vmem:[%s8682_s1 + $0x268] ss:$16 sps:$4 sm:$0xff]   ;;  %v6246_v30 = vld [vmem:[%s8682_s1 + $0x484] ss:$16 sps:$4 sm:$0xff]  }
  0x74   : > { %2249 = vmatprep.subr.bf16.mxu0 %v6159_v31  ;;  %2635 = vmatprep.subr.bf16.mxu1 %v6162_v33  ;;  %v7224_v31 = vld [vmem:[%s6795_s9 + $0x9c] ss:$24 sps:$4 sm:$0xff]   ;;  %v6244_v33 = vld [vmem:[%s8682_s1 + $0x480] ss:$16 sps:$4 sm:$0xff]  }
  0x76   : > { %2119 = vmatmul.mubr.bf16.gmra.mrb[20].mxu0 %v7035_v32  ;;  %2199 = vmatmul.mubr.bf16.gmra.mrb[20].mxu1 %v6156_v34  ;;  %v6247_v34 = vld [vmem:[%s8682_s1 + $0x288] ss:$16 sps:$4 sm:$0xff]  }
  0x77   : > { %2250 = vmatpush1.bf16.msra.mxu0 %v6157_v36  ;;  %2636 = vmatpush1.bf16.msra.mxu1 %v6160_v37  ;;  %v6255_v36 = vld [vmem:[%s8682_s1 + $0x4a4] ss:$16 sps:$4 sm:$0xff]   ;;  %v6258_v37 = vld [vmem:[%s8682_s1 + $0x2ac] ss:$16 sps:$4 sm:$0xff]  }
  0x78   : > { %2251 = vmatprep.subr.bf16.mxu0 %v6165_v38  ;;  %2637 = vmatprep.subr.bf16.mxu1 %v6168_v39  ;;  %v6253_v38 = vld [vmem:[%s8682_s1 + $0x4a0] ss:$16 sps:$4 sm:$0xff]   ;;  %v6256_v39 = vld [vmem:[%s8682_s1 + $0x2a8] ss:$16 sps:$4 sm:$0xff]  }
  0x79   : > { %2128 = vmatprep.mubr.bf16.mxu0 %v7055_v40  ;;  %2208 = vmatprep.mubr.bf16.mxu1 %v7058_v41 }
  0x7b   : > { %2252 = vmatpush1.bf16.msra.mxu0 %v6163_v43  ;;  %2638 = vmatpush1.bf16.msra.mxu1 %v6166_v44  ;;  %v6264_v43 = vld [vmem:[%s8682_s1 + $0x4c4] ss:$16 sps:$4 sm:$0xff]  }
  0x7c   : > { %2253 = vmatprep.subr.bf16.mxu0 %v6177_v45  ;;  %2639 = vmatprep.subr.bf16.mxu1 %v6180_v48  ;;  %v7258_v44 = vld [vmem:[%s6795_s9 + $0xcc] ss:$24 sps:$4 sm:$0xff]   ;;  %v6262_v45 = vld [vmem:[%s8682_s1 + $0x4c0] ss:$16 sps:$4 sm:$0xff]   ;;  %v6265_v48 = vld [vmem:[%s8682_s1 + $0x2c8] ss:$16 sps:$4 sm:$0xff]  }
  0x7e   : > { %2129 = vmatmul.mubr.bf16.gmra.mrb[24].mxu0 %v7071_v46  ;;  %2209 = vmatmul.mubr.bf16.gmra.mrb[24].mxu1 %v7079_v49 }
  0x7f   : > { %2254 = vmatpush1.bf16.msra.mxu0 %v6175_v50  ;;  %2640 = vmatpush1.bf16.msra.mxu1 %v6178_v51  ;;  %v6273_v50 = vld [vmem:[%s8682_s1 + $0x4e4] ss:$16 sps:$4 sm:$0xff]   ;;  %v6276_v51 = vld [vmem:[%s8682_s1 + $0x2ec] ss:$16 sps:$4 sm:$0xff]  }
  0x80   : > { %2255 = vmatprep.subr.bf16.mxu0 %v6183_v52  ;;  %2641 = vmatprep.subr.bf16.mxu1 %v6186_v53  ;;  %v6271_v52 = vld [vmem:[%s8682_s1 + $0x4e0] ss:$16 sps:$4 sm:$0xff]   ;;  %v6274_v53 = vld [vmem:[%s8682_s1 + $0x2e8] ss:$16 sps:$4 sm:$0xff]  }
  0x81   : > { %2138 = vmatprep.mubr.bf16.mxu0 %v7094_v55  ;;  %2218 = vmatprep.mubr.bf16.mxu1 %v7097_v56 }
  0x83   : > { %2256 = vmatpush1.bf16.msra.mxu0 %v6181_v57  ;;  %2642 = vmatpush1.bf16.msra.mxu1 %v6184_v58  ;;  %v7289_v57 = vld [vmem:[%s6795_s9 + $0xc8] ss:$24 sps:$4 sm:$0xff]   ;;  %v7292_v58 = vld [vmem:[%s6795_s9 + $0xfc] ss:$24 sps:$4 sm:$0xff]  }
  0x84   : > { %2257 = vmatprep.subr.bf16.mxu0 %v6195_v60  ;;  %2643 = vmatprep.subr.bf16.mxu1 %v6198_v61  ;;  %v6280_v60 = vld [vmem:[%s8682_s1 + $0x500] ss:$16 sps:$4 sm:$0xff]   ;;  %v6283_v61 = vld [vmem:[%s8682_s1 + $0x308] ss:$16 sps:$4 sm:$0xff]  }
  0x86   : > { %2139 = vmatmul.mubr.bf16.gmra.mrb[28].mxu0 %v7116_v62  ;;  %2219 = vmatmul.mubr.bf16.gmra.mrb[28].mxu1 %v7119_v63 }
  0x87   : > { %2258 = vmatpush1.bf16.msra.mxu0 %v6193_v0  ;;  %2644 = vmatpush1.bf16.msra.mxu1 %v6196_v1  ;;  %v6291_v0 = vld [vmem:[%s8682_s1 + $0x524] ss:$16 sps:$4 sm:$0xff]   ;;  %v6294_v1 = vld [vmem:[%s8682_s1 + $0x32c] ss:$16 sps:$4 sm:$0xff]  }
  0x88   : > { %2259 = vmatprep.subr.bf16.mxu0 %v6201_v3  ;;  %2645 = vmatprep.subr.bf16.mxu1 %v6204_v4  ;;  %v6289_v3 = vld [vmem:[%s8682_s1 + $0x520] ss:$16 sps:$4 sm:$0xff]   ;;  %v6292_v4 = vld [vmem:[%s8682_s1 + $0x328] ss:$16 sps:$4 sm:$0xff]  }
  0x89   : > { %2261 = vmatprep.mubr.bf16.mxu0 %v7134_v5  ;;  %2647 = vmatprep.mubr.bf16.mxu1 %v6801_v13  ;;  %v6219_v13 = vld [vmem:[%s8682_s1 + $0x424] ss:$16 sps:$4 sm:$0xff]  }
  0x8b   : > { %2260 = vmatpush1.bf16.msra.mxu0 %v6199_v6  ;;  %2646 = vmatpush1.bf16.msra.mxu1 %v6202_v8  ;;  %v6300_v6 = vld [vmem:[%s8682_s1 + $0x544] ss:$16 sps:$4 sm:$0xff]   ;;  %v7323_v8 = vld [vmem:[%s6795_s9 + $0xf8] ss:$24 sps:$4 sm:$0xff]  }
  0x8c   : > { %2422 = vmatprep.subr.bf16.mxu0 %v6210_v9  ;;  %2808 = vmatprep.subr.bf16.mxu1 %v6213_v10  ;;  %v7326_v9 = vld [vmem:[%s6795_s9 + $0x12c] ss:$24 sps:$4 sm:$0xff]   ;;  %v6301_v10 = vld [vmem:[%s8682_s1 + $0x348] ss:$16 sps:$4 sm:$0xff]  }
  0x8e   : > { %2262 = vmatmul.mubr.bf16.vlgmr.msra.gmra.mrb[0].mxu0 %v7153_v11  ;;  %2648 = vmatmul.mubr.bf16.vlgmr.msra.gmra.mrb[32].mxu1 %v6866_v35  ;;  %v6231_v35 = vld [vmem:[%s8682_s1 + $0x24c] ss:$16 sps:$4 sm:$0xff]  }
  0x8f   : > { %2423 = vmatpush1.bf16.msra.mxu0 %v6208_v12  ;;  %2809 = vmatpush1.bf16.msra.mxu1 %v6211_v14  ;;  %v6309_v12 = vld [vmem:[%s8682_s1 + $0x564] ss:$16 sps:$4 sm:$0xff]   ;;  %v6312_v14 = vld [vmem:[%s8682_s1 + $0x36c] ss:$16 sps:$4 sm:$0xff]  }
  0x90   : > { %2271 = vmatprep.mubr.bf16.mxu0 %v7162_v16  ;;  %2657 = vmatprep.mubr.bf16.mxu1 %v6885_v42  ;;  %v6229_v42 = vld [vmem:[%s8682_s1 + $0x248] ss:$16 sps:$4 sm:$0xff]  }
  0x91   : > { %2424 = vmatprep.subr.bf16.mxu0 %v6219_v13  ;;  %2810 = vmatprep.subr.bf16.mxu1 %v6222_v17  ;;  %v6307_v13 = vld [vmem:[%s8682_s1 + $0x560] ss:$16 sps:$4 sm:$0xff]   ;;  %v6310_v17 = vld [vmem:[%s8682_s1 + $0x368] ss:$16 sps:$4 sm:$0xff]  }
  0x93   : > { %2425 = vmatpush1.bf16.msra.mxu0 %v6217_v18  ;;  %2811 = vmatpush1.bf16.msra.mxu1 %v6220_v19  ;;  %v6318_v18 = vld [vmem:[%s8682_s1 + $0x584] ss:$16 sps:$4 sm:$0xff]   ;;  %v7357_v19 = vld [vmem:[%s6795_s9 + $0x128] ss:$24 sps:$4 sm:$0xff]  }
  0x94   : > { %2426 = vmatprep.subr.bf16.mxu0 %v6228_v21  ;;  %2812 = vmatprep.subr.bf16.mxu1 %v6231_v35  ;;  %v7360_v21 = vld [vmem:[%s6795_s9 + $0x15c] ss:$24 sps:$4 sm:$0xff]   ;;  %v6319_v35 = vld [vmem:[%s8682_s1 + $0x388] ss:$16 sps:$4 sm:$0xff]  }
  0x96   : > { %2272 = vmatmul.mubr.bf16.gmra.mrb[4].mxu0 %v7187_v22  ;;  %2658 = vmatmul.mubr.bf16.gmra.mrb[36].mxu1 %v6899_v47  ;;  %v6249_v47 = vld [vmem:[%s8682_s1 + $0x28c] ss:$16 sps:$4 sm:$0xff]  }
  0x97   : > { %2281 = vmatprep.mubr.bf16.mxu0 %v7190_v23  ;;  %2667 = vmatprep.mubr.bf16.mxu1 %v6919_v54  ;;  %v7221_v54 = vld [vmem:[%s6795_s9 + $0x68] ss:$24 sps:$4 sm:$0xff]  }
  0x98   : > { %2427 = vmatpush1.bf16.msra.mxu0 %v6226_v24  ;;  %2813 = vmatpush1.bf16.msra.mxu1 %v6229_v42  ;;  %v6327_v24 = vld [vmem:[%s8682_s1 + $0x5a4] ss:$16 sps:$4 sm:$0xff]   ;;  %v6330_v42 = vld [vmem:[%s8682_s1 + $0x3ac] ss:$16 sps:$4 sm:$0xff]  }
  0x99   : > { %2428 = vmatprep.subr.bf16.mxu0 %v6237_v25  ;;  %2814 = vmatprep.subr.bf16.mxu1 %v6240_v26  ;;  %v6325_v25 = vld [vmem:[%s8682_s1 + $0x5a0] ss:$16 sps:$4 sm:$0xff]   ;;  %v6328_v26 = vld [vmem:[%s8682_s1 + $0x3a8] ss:$16 sps:$4 sm:$0xff]  }
  0x9c   : > { %2429 = vmatpush1.bf16.msra.mxu0 %v6235_v28  ;;  %2815 = vmatpush1.bf16.msra.mxu1 %v6238_v29  ;;  %v6336_v28 = vld [vmem:[%s8682_s1 + $0x5c4] ss:$16 sps:$4 sm:$0xff]   ;;  %v7391_v29 = vld [vmem:[%s6795_s9 + $0x158] ss:$24 sps:$4 sm:$0xff]  }
  0x9d   : > { %2430 = vmatprep.subr.bf16.mxu0 %v6246_v30  ;;  %2816 = vmatprep.subr.bf16.mxu1 %v6249_v47  ;;  %v7394_v30 = vld [vmem:[%s6795_s9 + $0x18c] ss:$24 sps:$4 sm:$0xff]   ;;  %v6337_v47 = vld [vmem:[%s8682_s1 + $0x3c8] ss:$16 sps:$4 sm:$0xff]  }
  0x9e   : > { %2282 = vmatmul.mubr.bf16.gmra.mrb[8].mxu0 %v7221_v54  ;;  %2668 = vmatmul.mubr.bf16.gmra.mrb[40].mxu1 %v6933_v59  ;;  %v6267_v59 = vld [vmem:[%s8682_s1 + $0x2cc] ss:$16 sps:$4 sm:$0xff]  }
  0x9f   : > { %2291 = vmatprep.mubr.bf16.mxu0 %v7224_v31  ;;  %2677 = vmatprep.mubr.bf16.mxu1 %v6953_v2  ;;  %v7255_v2 = vld [vmem:[%s6795_s9 + $0x98] ss:$24 sps:$4 sm:$0xff]  }
  0xa0   : > { %2431 = vmatpush1.bf16.msra.mxu0 %v6244_v33  ;;  %2817 = vmatpush1.bf16.msra.mxu1 %v6247_v34  ;;  %v6345_v33 = vld [vmem:[%s8682_s1 + $0x5e4] ss:$16 sps:$4 sm:$0xff]   ;;  %v6348_v34 = vld [vmem:[%s8682_s1 + $0x3ec] ss:$16 sps:$4 sm:$0xff]  }
  0xa1   : > { %2432 = vmatprep.subr.bf16.mxu0 %v6255_v36  ;;  %2818 = vmatprep.subr.bf16.mxu1 %v6258_v37  ;;  %v6343_v36 = vld [vmem:[%s8682_s1 + $0x5e0] ss:$16 sps:$4 sm:$0xff]   ;;  %v6346_v37 = vld [vmem:[%s8682_s1 + $0x3e8] ss:$16 sps:$4 sm:$0xff]  }
  0xa4   : > { %2433 = vmatpush1.bf16.msra.mxu0 %v6253_v38  ;;  %2819 = vmatpush1.bf16.msra.mxu1 %v6256_v39  ;;  %v6685_v38 = vld [vmem:[%s6795_s9 + $0x184] ss:$24 sps:$4 sm:$0xff]  }
  0xa5   : > { %2434 = vmatprep.subr.bf16.mxu0 %v6264_v43  ;;  %2820 = vmatprep.subr.bf16.mxu1 %v6267_v59  ;;  %v6354_v39 = vld [vmem:[%s8682_s1 + $0x40c] ss:$16 sps:$4 sm:$0xff]   ;;  %v6686_v59 = vld [vmem:[%s6795_s9 + $0x180] ss:$24 sps:$4 sm:$0xff]  }
  0xa6   : > { %2292 = vmatmul.mubr.bf16.gmra.mrb[12].mxu0 %v7255_v2  ;;  %2678 = vmatmul.mubr.bf16.gmra.mrb[44].mxu1 %v6967_v7  ;;  %v6282_v7 = vld [vmem:[%s8682_s1 + $0x504] ss:$16 sps:$4 sm:$0xff]  }
  0xa7   : > { %2301 = vmatprep.mubr.bf16.mxu0 %v7258_v44  ;;  %2687 = vmatprep.mubr.bf16.mxu1 %v6987_v15  ;;  %v6285_v15 = vld [vmem:[%s8682_s1 + $0x30c] ss:$16 sps:$4 sm:$0xff]  }
  0xa8   : > { %2435 = vmatpush1.bf16.msra.mxu0 %v6262_v45  ;;  %2821 = vmatpush1.bf16.msra.mxu1 %v6265_v48  ;;  %v7425_v43 = vld [vmem:[%s6795_s9 + $0x1bc] ss:$24 sps:$4 sm:$0xff]   ;;  %v7432_v48 = vld [vmem:[%s6795_s9 + $0x1b8] ss:$24 sps:$4 sm:$0xff]  }
  0xa9   : > { %2436 = vmatprep.subr.bf16.mxu0 %v6273_v50  ;;  %2822 = vmatprep.subr.bf16.mxu1 %v6276_v51  ;;  %v6687_v45 = vld [vmem:[%s6795_s9 + $0x1b4] ss:$24 sps:$4 sm:$0xff]   ;;  %v6688_v51 = vld [vmem:[%s6795_s9 + $0x1b0] ss:$24 sps:$4 sm:$0xff]  }
  0xaa   : > { %v7435_v50 = vld [vmem:[%s6795_s9 + $0x1ec] ss:$24 sps:$4 sm:$0xff]  }
  0xac   : > { %2437 = vmatpush1.bf16.msra.mxu0 %v6271_v52  ;;  %2823 = vmatpush1.bf16.msra.mxu1 %v6274_v53  ;;  %v6689_v52 = vld [vmem:[%s6795_s9 + $0x1e4] ss:$24 sps:$4 sm:$0xff]   ;;  %v7442_v53 = vld [vmem:[%s6795_s9 + $0x1e8] ss:$24 sps:$4 sm:$0xff]  }
  0xad   : > { %2438 = vmatprep.subr.bf16.mxu0 %v6282_v7  ;;  %2824 = vmatprep.subr.bf16.mxu1 %v6285_v15  ;;  %v7445_v7 = vld [vmem:[%s6795_s9 + $0x21c] ss:$24 sps:$4 sm:$0xff]   ;;  %v6690_v15 = vld [vmem:[%s6795_s9 + $0x1e0] ss:$24 sps:$4 sm:$0xff]  }
  0xae   : > { %2302 = vmatmul.mubr.bf16.gmra.mrb[16].mxu0 %v7289_v57  ;;  %2688 = vmatmul.mubr.bf16.gmra.mrb[48].mxu1 %v7001_v20  ;;  %v6303_v20 = vld [vmem:[%s8682_s1 + $0x34c] ss:$16 sps:$4 sm:$0xff]  }
  0xaf   : > { %2311 = vmatprep.mubr.bf16.mxu0 %v7292_v58  ;;  %2697 = vmatprep.mubr.bf16.mxu1 %v7021_v27  ;;  %v6298_v27 = vld [vmem:[%s8682_s1 + $0x540] ss:$16 sps:$4 sm:$0xff]  }
  0xb0   : > { %2439 = vmatpush1.bf16.msra.mxu0 %v6280_v60  ;;  %2825 = vmatpush1.bf16.msra.mxu1 %v6283_v61  ;;  %v6691_v60 = vld [vmem:[%s6795_s9 + $0x214] ss:$24 sps:$4 sm:$0xff]   ;;  %v7452_v61 = vld [vmem:[%s6795_s9 + $0x218] ss:$24 sps:$4 sm:$0xff]  }
  0xb1   : > { %2440 = vmatprep.subr.bf16.mxu0 %v6291_v0  ;;  %2826 = vmatprep.subr.bf16.mxu1 %v6294_v1  ;;  %v7455_v0 = vld [vmem:[%s6795_s9 + $0x24c] ss:$24 sps:$4 sm:$0xff]   ;;  %v6692_v1 = vld [vmem:[%s6795_s9 + $0x210] ss:$24 sps:$4 sm:$0xff]  }
  0xb4   : > { %2441 = vmatpush1.bf16.msra.mxu0 %v6289_v3  ;;  %2827 = vmatpush1.bf16.msra.mxu1 %v6292_v4  ;;  %v6693_v3 = vld [vmem:[%s6795_s9 + $0x244] ss:$24 sps:$4 sm:$0xff]  }
  0xb5   : > { %2442 = vmatprep.subr.bf16.mxu0 %v6300_v6  ;;  %2828 = vmatprep.subr.bf16.mxu1 %v6303_v20  ;;  %v6423_v4 = vld [vmem:[%s8684_s3 + $0x4] ss:$8 sps:$4 sm:$0xff]   ;;  %v7465_v6 = vld [vmem:[%s6795_s9 + $0x248] ss:$24 sps:$4 sm:$0xff]   ;;  %v7468_v20 = vld [vmem:[%s6795_s9 + $0x27c] ss:$24 sps:$4 sm:$0xff]  }
  0xb6   : > { %2312 = vmatmul.mubr.bf16.gmra.mrb[20].mxu0 %v7323_v8  ;;  %2698 = vmatmul.mubr.bf16.gmra.mrb[52].mxu1 %v7035_v32  ;;  %v6321_v32 = vld [vmem:[%s8682_s1 + $0x38c] ss:$16 sps:$4 sm:$0xff]  }
  0xb7   : > { %2321 = vmatprep.mubr.bf16.mxu0 %v7326_v9  ;;  %2707 = vmatprep.mubr.bf16.mxu1 %v7055_v40  ;;  %v6316_v40 = vld [vmem:[%s8682_s1 + $0x580] ss:$16 sps:$4 sm:$0xff]  }
  0xb8   : > { %2443 = vmatpush1.bf16.msra.mxu0 %v6298_v27  ;;  %2829 = vmatpush1.bf16.msra.mxu1 %v6301_v10  ;;  %v6694_v27 = vld [vmem:[%s6795_s9 + $0x240] ss:$24 sps:$4 sm:$0xff]   ;;  %v6695_v10 = vld [vmem:[%s6795_s9 + $0x274] ss:$24 sps:$4 sm:$0xff]  }
  0xb9   : > { %2444 = vmatprep.subr.bf16.mxu0 %v6309_v12  ;;  %2830 = vmatprep.subr.bf16.mxu1 %v6312_v14  ;;  %v7475_v12 = vld [vmem:[%s6795_s9 + $0x278] ss:$24 sps:$4 sm:$0xff]   ;;  %v7478_v14 = vld [vmem:[%s6795_s9 + $0x2ac] ss:$24 sps:$4 sm:$0xff]  }
  0xbc   : > { %2445 = vmatpush1.bf16.msra.mxu0 %v6307_v13  ;;  %2831 = vmatpush1.bf16.msra.mxu1 %v6310_v17  ;;  %v6696_v13 = vld [vmem:[%s6795_s9 + $0x270] ss:$24 sps:$4 sm:$0xff]  }
  0xbd   : > { %2446 = vmatprep.subr.bf16.mxu0 %v6318_v18  ;;  %2832 = vmatprep.subr.bf16.mxu1 %v6321_v32  ;;  %v7485_v17 = vld [vmem:[%s6795_s9 + $0x2a8] ss:$24 sps:$4 sm:$0xff]   ;;  %v7488_v18 = vld [vmem:[%s6795_s9 + $0x2dc] ss:$24 sps:$4 sm:$0xff]   ;;  %v7495_v32 = vld [vmem:[%s6795_s9 + $0x2d8] ss:$24 sps:$4 sm:$0xff]  }
  0xbe   : > { %2322 = vmatmul.mubr.bf16.gmra.mrb[24].mxu0 %v7357_v19  ;;  %2708 = vmatmul.mubr.bf16.gmra.mrb[56].mxu1 %v7071_v46  ;;  %v6339_v46 = vld [vmem:[%s8682_s1 + $0x3cc] ss:$16 sps:$4 sm:$0xff]  }
  0xbf   : > { %2331 = vmatprep.mubr.bf16.mxu0 %v7360_v21  ;;  %2717 = vmatprep.mubr.bf16.mxu1 %v7094_v55  ;;  %v6334_v55 = vld [vmem:[%s8682_s1 + $0x5c0] ss:$16 sps:$4 sm:$0xff]  }
  0xc0   : > { %2447 = vmatpush1.bf16.msra.mxu0 %v6316_v40  ;;  %2833 = vmatpush1.bf16.msra.mxu1 %v6319_v35  ;;  %v7498_v40 = vld [vmem:[%s6795_s9 + $0x14] ss:$24 sps:$4 sm:$0xff]  }
  0xc1   : > { %2448 = vmatprep.subr.bf16.mxu0 %v6327_v24  ;;  %2834 = vmatprep.subr.bf16.mxu1 %v6330_v42  ;;  %v6360_v35 = vld [vmem:[%s8682_s1 + $0x42c] ss:$16 sps:$4 sm:$0xff]   ;;  %v6358_v24 = vld [vmem:[%s8682_s1 + $0x428] ss:$16 sps:$4 sm:$0xff]  }
  0xc2   : > { %v6366_v42 = vld [vmem:[%s8682_s1 + $0x44c] ss:$16 sps:$4 sm:$0xff]  }
  0xc4   : > { %2449 = vmatpush1.bf16.msra.mxu0 %v6325_v25  ;;  %2835 = vmatpush1.bf16.msra.mxu1 %v6328_v26  ;;  %v7536_v25 = vld [vmem:[%s6795_s9 + $0x40] ss:$24 sps:$4 sm:$0xff]   ;;  %v7539_v26 = vld [vmem:[%s6795_s9 + $0x74] ss:$24 sps:$4 sm:$0xff]  }
  0xc5   : > { %2450 = vmatprep.subr.bf16.mxu0 %v6336_v28  ;;  %2836 = vmatprep.subr.bf16.mxu1 %v6339_v46  ;;  %v6441_v28 = vld [vmem:[%s8684_s3 + $0x24] ss:$8 sps:$4 sm:$0xff]  }
  0xc6   : > { %2332 = vmatmul.mubr.bf16.gmra.mrb[28].mxu0 %v7391_v29  ;;  %2718 = vmatmul.mubr.bf16.gmra.mrb[60].mxu1 %v7116_v62  ;;  %v7422_v62 = vld [vmem:[%s6795_s9 + $0x188] ss:$24 sps:$4 sm:$0xff]   ;;  %v6372_v46 = vld [vmem:[%s8682_s1 + $0x46c] ss:$16 sps:$4 sm:$0xff]  }
  0xc7   : > { %2341 = vmatprep.mubr.bf16.mxu0 %v7394_v30  ;;  %2727 = vmatprep.mubr.bf16.mxu1 %v6685_v38  ;;  %v6459_v38 = vld [vmem:[%s8684_s3 + $0x44] ss:$8 sps:$4 sm:$0xff]  }
  0xc8   : > { %2451 = vmatpush1.bf16.msra.mxu0 %v6334_v55  ;;  %2837 = vmatpush1.bf16.msra.mxu1 %v6337_v47  ;;  %v6439_v55 = vld [vmem:[%s8684_s3 + $0x20] ss:$8 sps:$4 sm:$0xff]   ;;  %v6450_v47 = vld [vmem:[%s8684_s3 + $0x34] ss:$8 sps:$4 sm:$0xff]  }
  0xc9   : > { %2452 = vmatprep.subr.bf16.mxu0 %v6345_v33  ;;  %2838 = vmatprep.subr.bf16.mxu1 %v6348_v34  ;;  %v6370_v33 = vld [vmem:[%s8682_s1 + $0x468] ss:$16 sps:$4 sm:$0xff]   ;;  %v6378_v34 = vld [vmem:[%s8682_s1 + $0x48c] ss:$16 sps:$4 sm:$0xff]  }
  0xcc   : > { %2453 = vmatpush1.bf16.msra.mxu0 %v6343_v36  ;;  %2839 = vmatpush1.bf16.msra.mxu1 %v6346_v37  ;;  %v7570_v36 = vld [vmem:[%s6795_s9 + $0x70] ss:$24 sps:$4 sm:$0xff]  }
  0xcd   : > { %3001 = vmatprep.subr.bf16.mxu1 %v6354_v39  ;;  %3782 = vmatprep.subr.bf16.mxu0 %v6423_v4  ;;  %v6376_v37 = vld [vmem:[%s8682_s1 + $0x488] ss:$16 sps:$4 sm:$0xff]   ;;  %v6384_v39 = vld [vmem:[%s8682_s1 + $0x4ac] ss:$16 sps:$4 sm:$0xff]  }
  0xce   : > { %2342 = vmatmul.mubr.bf16.gmra.mrb[32].mxu0 %v7422_v62  ;;  %2728 = vmatmul.mubr.bf16.gmra.mrb[64].mxu1 %v6686_v59  ;;  %v6457_v59 = vld [vmem:[%s8684_s3 + $0x40] ss:$8 sps:$4 sm:$0xff]  }
  0xcf   : > { %2351 = vmatprep.mubr.bf16.mxu0 %v7425_v43  ;;  %2737 = vmatprep.mubr.bf16.mxu1 %v6687_v45  ;;  %v6462_v45 = vld [vmem:[%s8684_s3 + $0x54] ss:$8 sps:$4 sm:$0xff]  }
  0xd6   : > { %2352 = vmatmul.mubr.bf16.gmra.mrb[36].mxu0 %v7432_v48  ;;  %2738 = vmatmul.mubr.bf16.gmra.mrb[68].mxu1 %v6688_v51  ;;  %v6382_v51 = vld [vmem:[%s8682_s1 + $0x4a8] ss:$16 sps:$4 sm:$0xff]  }
  0xd7   : > { %2361 = vmatprep.mubr.bf16.mxu0 %v7435_v50  ;;  %2747 = vmatprep.mubr.bf16.mxu1 %v6689_v52 }
  0xde   : > { %2362 = vmatmul.mubr.bf16.gmra.mrb[40].mxu0 %v7442_v53  ;;  %2748 = vmatmul.mubr.bf16.gmra.mrb[72].mxu1 %v6690_v15  ;;  %v6460_v15 = vld [vmem:[%s8684_s3 + $0x50] ss:$8 sps:$4 sm:$0xff]  }
  0xdf   : > { %2371 = vmatprep.mubr.bf16.mxu0 %v7445_v7  ;;  %2757 = vmatprep.mubr.bf16.mxu1 %v6691_v60 }
  0xe6   : > { %2372 = vmatmul.mubr.bf16.gmra.mrb[44].mxu0 %v7452_v61  ;;  %2758 = vmatmul.mubr.bf16.gmra.mrb[76].mxu1 %v6692_v1 }
  0xe7   : > { %2381 = vmatprep.mubr.bf16.mxu0 %v7455_v0  ;;  %2767 = vmatprep.mubr.bf16.mxu1 %v6693_v3  ;;  %v7613_v3 = vld [vmem:[%s6795_s9 + $0xd4] ss:$24 sps:$4 sm:$0xff]  }
  0xee   : > { %2382 = vmatmul.mubr.bf16.gmra.mrb[48].mxu0 %v7465_v6  ;;  %2768 = vmatmul.mubr.bf16.gmra.mrb[80].mxu1 %v6694_v27  ;;  %v6388_v27 = vld [vmem:[%s8682_s1 + $0x4c8] ss:$16 sps:$4 sm:$0xff]  }
  0xef   : > { %2391 = vmatprep.mubr.bf16.mxu0 %v7468_v20  ;;  %2777 = vmatprep.mubr.bf16.mxu1 %v6695_v10  ;;  %v6465_v10 = vld [vmem:[%s8684_s3 + $0x64] ss:$8 sps:$4 sm:$0xff]  }
  0xf6   : > { %2392 = vmatmul.mubr.bf16.gmra.mrb[52].mxu0 %v7475_v12  ;;  %2778 = vmatmul.mubr.bf16.gmra.mrb[84].mxu1 %v6696_v13  ;;  %v6396_v13 = vld [vmem:[%s8682_s1 + $0x4ec] ss:$16 sps:$4 sm:$0xff]  }
  0xf7   : > { %2401 = vmatprep.mubr.bf16.mxu0 %v7478_v14  ;;  %2787 = vmatprep.mubr.bf16.mxu1 %v7058_v41  ;;  %v7505_v41 = vld [vmem:[%s6795_s9 + $0x10] ss:$24 sps:$4 sm:$0xff]  }
  0xfe   : > { %2402 = vmatmul.mubr.bf16.gmra.mrb[56].mxu0 %v7485_v17  ;;  %2788 = vmatmul.mubr.bf16.gmra.mrb[88].mxu1 %v7079_v49  ;;  %v6352_v49 = vld [vmem:[%s8682_s1 + $0x408] ss:$16 sps:$4 sm:$0xff]  }
  0xff   : > { %2411 = vmatprep.mubr.bf16.mxu0 %v7488_v18  ;;  %2797 = vmatprep.mubr.bf16.mxu1 %v7097_v56  ;;  %v7511_v56 = vld [vmem:[%s6795_s9 + $0x44] ss:$24 sps:$4 sm:$0xff]  }
 0x106   : > { %2412 = vmatmul.mubr.bf16.gmra.mrb[60].mxu0 %v7495_v32  ;;  %2798 = vmatmul.mubr.bf16.gmra.mrb[92].mxu1 %v7119_v63  ;;  %v6421_v63 = vld [vmem:[%s8684_s3] ss:$8 sps:$4 sm:$0xff]  }
 0x107   : > { %2454 = vmatprep.mubr.bf16.mxu0 %v7498_v40  ;;  %2840 = vmatprep.mubr.bf16.mxu1 %v7134_v5  ;;  %v6432_v5 = vld [vmem:[%s8684_s3 + $0x14] ss:$8 sps:$4 sm:$0xff]  }
 0x10e   : > { %2455 = vmatmul.mubr.bf16.vlgmr.msra.gmra.mrb[0].mxu0 %v7505_v41  ;;  %2841 = vmatmul.mubr.bf16.vlgmr.msra.gmra.mrb[32].mxu1 %v7153_v11  ;;  %v6430_v11 = vld [vmem:[%s8684_s3 + $0x10] ss:$8 sps:$4 sm:$0xff]  }
 0x10f   : > { %3002 = vmatpush1.bf16.msra.mxu1 %v6352_v49  ;;  %2464 = vmatprep.mubr.bf16.mxu0 %v7511_v56  ;;  %v6463_v49 = vld [vmem:[%s8684_s3 + $0x60] ss:$8 sps:$4 sm:$0xff]  }
 0x110   : > { %2850 = vmatprep.mubr.bf16.mxu1 %v7162_v16  ;;  %3003 = vmatprep.subr.bf16.mxu1 %v6360_v35  ;;  %v6364_v16 = vld [vmem:[%s8682_s1 + $0x448] ss:$16 sps:$4 sm:$0xff]   ;;  %v6468_v35 = vld [vmem:[%s8684_s3 + $0x74] ss:$8 sps:$4 sm:$0xff]  }
 0x111   : > { %3783 = vmatpush1.bf16.msra.mxu0 %v6421_v63  ;;  %v6394_v63 = vld [vmem:[%s8682_s1 + $0x4e8] ss:$16 sps:$4 sm:$0xff]  }
 0x112   : > { %3784 = vmatprep.subr.bf16.mxu0 %v6432_v5 }
 0x113   : > { %3004 = vmatpush1.bf16.msra.mxu1 %v6358_v24  ;;  %v6466_v24 = vld [vmem:[%s8684_s3 + $0x70] ss:$8 sps:$4 sm:$0xff]  }
 0x114   : > { %3005 = vmatprep.subr.bf16.mxu1 %v6366_v42 }
 0x115   : > { %3785 = vmatpush1.bf16.msra.mxu0 %v6430_v11 }
 0x116   : > { %2465 = vmatmul.mubr.bf16.gmra.mrb[4].mxu0 %v7536_v25  ;;  %2851 = vmatmul.mubr.bf16.gmra.mrb[36].mxu1 %v7187_v22  ;;  %v6448_v22 = vld [vmem:[%s8684_s3 + $0x30] ss:$8 sps:$4 sm:$0xff]  }
 0x117   : > { %2474 = vmatprep.mubr.bf16.mxu0 %v7539_v26  ;;  %2860 = vmatprep.mubr.bf16.mxu1 %v7190_v23  ;;  %v7573_v23 = vld [vmem:[%s6795_s9 + $0xa4] ss:$24 sps:$4 sm:$0xff]  }
 0x118   : > { %3006 = vmatpush1.bf16.msra.mxu1 %v6364_v16  ;;  %3786 = vmatprep.subr.bf16.mxu0 %v6441_v28  ;;  %v7655_v16 = vld [vmem:[%s6795_s9 + $0x104] ss:$24 sps:$4 sm:$0xff]  }
 0x119   : > { %3007 = vmatprep.subr.bf16.mxu1 %v6372_v46  ;;  %3787 = vmatpush1.bf16.msra.mxu0 %v6439_v55  ;;  %v6400_v46 = vld [vmem:[%s8682_s1 + $0x508] ss:$16 sps:$4 sm:$0xff]   ;;  %v6471_v55 = vld [vmem:[%s8684_s3 + $0x84] ss:$8 sps:$4 sm:$0xff]  }
 0x11a   : > { %3788 = vmatprep.subr.bf16.mxu0 %v6450_v47  ;;  %v6408_v47 = vld [vmem:[%s8682_s1 + $0x52c] ss:$16 sps:$4 sm:$0xff]  }
 0x11c   : > { %3008 = vmatpush1.bf16.msra.mxu1 %v6370_v33  ;;  %v6469_v33 = vld [vmem:[%s8684_s3 + $0x80] ss:$8 sps:$4 sm:$0xff]  }
 0x11d   : > { %3009 = vmatprep.subr.bf16.mxu1 %v6378_v34  ;;  %3789 = vmatpush1.bf16.msra.mxu0 %v6448_v22  ;;  %v6474_v34 = vld [vmem:[%s8684_s3 + $0x94] ss:$8 sps:$4 sm:$0xff]   ;;  %v6406_v22 = vld [vmem:[%s8682_s1 + $0x528] ss:$16 sps:$4 sm:$0xff]  }
 0x11e   : > { %2475 = vmatmul.mubr.bf16.gmra.mrb[8].mxu0 %v7570_v36  ;;  %2861 = vmatmul.mubr.bf16.gmra.mrb[40].mxu1 %v7221_v54  ;;  %v6390_v54 = vld [vmem:[%s8682_s1 + $0x4cc] ss:$16 sps:$4 sm:$0xff]  }
 0x11f   : > { %2484 = vmatprep.mubr.bf16.mxu0 %v7573_v23  ;;  %2870 = vmatprep.mubr.bf16.mxu1 %v7224_v31  ;;  %v7608_v31 = vld [vmem:[%s6795_s9 + $0xa0] ss:$24 sps:$4 sm:$0xff]  }
 0x120   : > { %3010 = vmatpush1.bf16.msra.mxu1 %v6376_v37  ;;  %3790 = vmatprep.subr.bf16.mxu0 %v6459_v38  ;;  %v6472_v38 = vld [vmem:[%s8684_s3 + $0x90] ss:$8 sps:$4 sm:$0xff]  }
 0x121   : > { %v7597_v52 = vpop.f32.mrb[0].mxu1  ;;  %3011 = vmatprep.subr.bf16.mxu1 %v6384_v39  ;;  %3791 = vmatpush1.bf16.msra.mxu0 %v6457_v59 }
 0x122   : > { %v7605_v60 = vpop.f32.mrb[1].mxu1  ;;  %3792 = vmatprep.subr.bf16.mxu0 %v6462_v45  ;;  %v7697_v45 = vld [vmem:[%s6795_s9 + $0x134] ss:$24 sps:$4 sm:$0xff]  }
 0x123   : > { %v7610_v1 = vpop.f32.mrb[2].mxu1 }
 0x124   : > { %v7615_v4 = vpop.f32.mrb[3].mxu1  ;;  %3012 = vmatpush1.bf16.msra.mxu1 %v6382_v51 }
 0x125   : > { %3013 = vmatprep.subr.bf16.mxu1 %v6390_v54  ;;  %3793 = vmatpush1.bf16.msra.mxu0 %v6460_v15  ;;  %v6412_v54 = vld [vmem:[%s8682_s1 + $0x548] ss:$16 sps:$4 sm:$0xff]   ;;  %v6420_v15 = vld [vmem:[%s8682_s1 + $0x56c] ss:$16 sps:$4 sm:$0xff]  }
 0x126   : > { %2485 = vmatmul.mubr.bf16.gmra.mrb[12].mxu0 %v7608_v31  ;;  %2871 = vmatmul.mubr.bf16.gmra.mrb[44].mxu1 %v7255_v2  ;;  %v6402_v2 = vld [vmem:[%s8682_s1 + $0x50c] ss:$16 sps:$4 sm:$0xff]  }
 0x127   : > { %2494 = vmatprep.mubr.bf16.mxu0 %v7613_v3  ;;  %2880 = vmatprep.mubr.bf16.mxu1 %v7258_v44  ;;  %v7650_v44 = vld [vmem:[%s6795_s9 + $0xd0] ss:$24 sps:$4 sm:$0xff]  }
 0x128   : > { %3014 = vmatpush1.bf16.msra.mxu1 %v6388_v27  ;;  %3794 = vmatprep.subr.bf16.mxu0 %v6465_v10  ;;  %v6475_v27 = vld [vmem:[%s8684_s3 + $0xa0] ss:$8 sps:$4 sm:$0xff]   ;;  %v6477_v10 = vld [vmem:[%s8684_s3 + $0xa4] ss:$8 sps:$4 sm:$0xff]  }
 0x129   : > { %v7639_v5 = vpop.f32.mrb[4].mxu1  ;;  %3015 = vmatprep.subr.bf16.mxu1 %v6396_v13  ;;  %3795 = vmatpush1.bf16.msra.mxu0 %v6463_v49  ;;  %v6418_v13 = vld [vmem:[%s8682_s1 + $0x568] ss:$16 sps:$4 sm:$0xff]  }
 0x12a   : > { %v7647_v42 = vpop.f32.mrb[5].mxu1  ;;  %3796 = vmatprep.subr.bf16.mxu0 %v6468_v35 }
 0x12b   : > { %v7652_v11 = vpop.f32.mrb[6].mxu1 }
 0x12c   : > { %v7657_v28 = vpop.f32.mrb[7].mxu1  ;;  %3016 = vmatpush1.bf16.msra.mxu1 %v6394_v63  ;;  %v7728_v63 = vld [vmem:[%s6795_s9 + $0x130] ss:$24 sps:$4 sm:$0xff]  }
 0x12d   : > { %3017 = vmatprep.subr.bf16.mxu1 %v6402_v2  ;;  %3797 = vmatpush1.bf16.msra.mxu0 %v6466_v24 }
 0x12e   : > { %2495 = vmatmul.mubr.bf16.gmra.mrb[16].mxu0 %v7650_v44  ;;  %2881 = vmatmul.mubr.bf16.gmra.mrb[48].mxu1 %v7289_v57  ;;  %v6414_v57 = vld [vmem:[%s8682_s1 + $0x54c] ss:$16 sps:$4 sm:$0xff]  }
 0x12f   : > { %2504 = vmatprep.mubr.bf16.mxu0 %v7655_v16  ;;  %2890 = vmatprep.mubr.bf16.mxu1 %v7292_v58  ;;  %v7692_v58 = vld [vmem:[%s6795_s9 + $0x100] ss:$24 sps:$4 sm:$0xff]  }
 0x130   : > { %3018 = vmatpush1.bf16.msra.mxu1 %v6400_v46  ;;  %3798 = vmatprep.subr.bf16.mxu0 %v6471_v55  ;;  %v6427_v46 = vld [vmem:[%s8682_s1 + $0x588] ss:$16 sps:$4 sm:$0xff]   ;;  %v6438_v55 = vld [vmem:[%s8682_s1 + $0x5ac] ss:$16 sps:$4 sm:$0xff]  }
 0x131   : > { %v7681_v37 = vpop.f32.mrb[8].mxu1  ;;  %3019 = vmatprep.subr.bf16.mxu1 %v6408_v47  ;;  %3799 = vmatpush1.bf16.msra.mxu0 %v6469_v33  ;;  %v6478_v47 = vld [vmem:[%s8684_s3 + $0xb0] ss:$8 sps:$4 sm:$0xff]   ;;  %v6480_v33 = vld [vmem:[%s8684_s3 + $0xb4] ss:$8 sps:$4 sm:$0xff]  }
 0x132   : > { %v7689_v39 = vpop.f32.mrb[9].mxu1  ;;  %3800 = vmatprep.subr.bf16.mxu0 %v6474_v34  ;;  %v6436_v34 = vld [vmem:[%s8682_s1 + $0x5a8] ss:$16 sps:$4 sm:$0xff]  }
 0x133   : > { %v7694_v59 = vpop.f32.mrb[10].mxu1 }
 0x134   : > { %v7699_v51 = vpop.f32.mrb[11].mxu1  ;;  %3020 = vmatpush1.bf16.msra.mxu1 %v6406_v22 }
 0x135   : > { %3021 = vmatprep.subr.bf16.mxu1 %v6414_v57  ;;  %3801 = vmatpush1.bf16.msra.mxu0 %v6472_v38  ;;  %v7764_v38 = vld [vmem:[%s6795_s9 + $0x160] ss:$24 sps:$4 sm:$0xff]  }
 0x136   : > { %2505 = vmatmul.mubr.bf16.gmra.mrb[20].mxu0 %v7692_v58  ;;  %2891 = vmatmul.mubr.bf16.gmra.mrb[52].mxu1 %v7323_v8  ;;  %v6429_v8 = vld [vmem:[%s8682_s1 + $0x58c] ss:$16 sps:$4 sm:$0xff]  }
 0x137   : > { %2514 = vmatprep.mubr.bf16.mxu0 %v7697_v45  ;;  %2900 = vmatprep.mubr.bf16.mxu1 %v7326_v9  ;;  %v7733_v9 = vld [vmem:[%s6795_s9 + $0x164] ss:$24 sps:$4 sm:$0xff]  }
 0x138   : > { %3022 = vmatpush1.bf16.msra.mxu1 %v6412_v54  ;;  %3802 = vmatprep.subr.bf16.mxu0 %v6477_v10  ;;  %v6456_v10 = vld [vmem:[%s8682_s1 + $0x5ec] ss:$16 sps:$4 sm:$0xff]  }
 0x139   : > { %v7720_v49 = vpop.f32.mrb[12].mxu1  ;;  %3023 = vmatprep.subr.bf16.mxu1 %v6420_v15  ;;  %3803 = vmatpush1.bf16.msra.mxu0 %v6475_v27  ;;  %v6445_v27 = vld [vmem:[%s8682_s1 + $0x5c8] ss:$16 sps:$4 sm:$0xff]  }
 0x13a   : > { %v7725_v35 = vpop.f32.mrb[13].mxu1  ;;  %3804 = vmatprep.subr.bf16.mxu0 %v6480_v33 }
 0x13b   : > { %v7730_v2 = vpop.f32.mrb[14].mxu1 }
 0x13c   : > { %v7735_v24 = vpop.f32.mrb[15].mxu1  ;;  %3024 = vmatpush1.bf16.msra.mxu1 %v6418_v13  ;;  %v6481_v13 = vld [vmem:[%s8684_s3 + $0xc0] ss:$8 sps:$4 sm:$0xff]  }
 0x13d   : > { %3025 = vmatprep.subr.bf16.mxu1 %v6429_v8  ;;  %3805 = vmatpush1.bf16.msra.mxu0 %v6478_v47  ;;  %v6483_v8 = vld [vmem:[%s8684_s3 + $0xc4] ss:$8 sps:$4 sm:$0xff]   ;;  %v7797_v47 = vld [vmem:[%s6795_s9 + $0x190] ss:$24 sps:$4 sm:$0xff]  }
 0x13e   : > { %2515 = vmatmul.mubr.bf16.gmra.mrb[24].mxu0 %v7728_v63  ;;  %2901 = vmatmul.mubr.bf16.gmra.mrb[56].mxu1 %v7357_v19  ;;  %v6447_v19 = vld [vmem:[%s8682_s1 + $0x5cc] ss:$16 sps:$4 sm:$0xff]  }
 0x13f   : > { %2524 = vmatprep.mubr.bf16.mxu0 %v7733_v9  ;;  %2910 = vmatprep.mubr.bf16.mxu1 %v7360_v21  ;;  %v7769_v21 = vld [vmem:[%s6795_s9 + $0x194] ss:$24 sps:$4 sm:$0xff]  }
 0x140   : > { %3026 = vmatpush1.bf16.msra.mxu1 %v6427_v46  ;;  %v6454_v46 = vld [vmem:[%s8682_s1 + $0x5e8] ss:$16 sps:$4 sm:$0xff]   ;;  %3806 = vmatprep.subr.bf16.mxu0 %v6483_v8 }
 0x141   : > { %v7756_v22 = vpop.f32.mrb[16].mxu1  ;;  %3027 = vmatprep.subr.bf16.mxu1 %v6438_v55  ;;  %3807 = vmatpush1.bf16.msra.mxu0 %v6481_v13 }
 0x142   : > { %v7761_v57 = vpop.f32.mrb[17].mxu1 }
 0x143   : > { %v7766_v54 = vpop.f32.mrb[18].mxu1 }
 0x144   : > { %v7771_v15 = vpop.f32.mrb[19].mxu1  ;;  %3028 = vmatpush1.bf16.msra.mxu1 %v6436_v34  ;;  %v7802_v34 = vld [vmem:[%s6795_s9 + $0x1c4] ss:$24 sps:$4 sm:$0xff]  }
 0x145   : > { %3029 = vmatprep.subr.bf16.mxu1 %v6447_v19  ;;  %v6484_v19 = vld [vmem:[%s8684_s3 + $0xd0] ss:$8 sps:$4 sm:$0xff]  }
 0x146   : > { %2525 = vmatmul.mubr.bf16.gmra.mrb[28].mxu0 %v7764_v38  ;;  %2911 = vmatmul.mubr.bf16.gmra.mrb[60].mxu1 %v7391_v29 }
 0x147   : > { %2534 = vmatprep.mubr.bf16.mxu0 %v7769_v21  ;;  %2920 = vmatprep.mubr.bf16.mxu1 %v7394_v30 }
 0x148   : > { %3030 = vmatpush1.bf16.msra.mxu1 %v6445_v27  ;;  %v6486_v27 = vld [vmem:[%s8684_s3 + $0xd4] ss:$8 sps:$4 sm:$0xff]  }
 0x149   : > { %v7792_v55 = vpop.f32.mrb[20].mxu1  ;;  %3031 = vmatprep.subr.bf16.mxu1 %v6456_v10  ;;  %3808 = vmatprep.subr.bf16.mxu0 %v6486_v27 }
 0x14a   : > { %v7794_v29 = vpop.f32.mrb[21].mxu1  ;;  %3809 = vmatpush1.bf16.msra.mxu0 %v6484_v19  ;;  %v6489_v19 = vld [vmem:[%s8684_s3 + $0xe4] ss:$8 sps:$4 sm:$0xff]  }
 0x14b   : > { %v7799_v33 = vpop.f32.mrb[22].mxu1  ;;  %3810 = vmatprep.subr.bf16.mxu0 %v6489_v19  ;;  %v6492_v19 = vld [vmem:[%s8684_s3 + $0xf4] ss:$8 sps:$4 sm:$0xff]  }
 0x14c   : > { %v7804_v30 = vpop.f32.mrb[23].mxu1  ;;  %3032 = vmatpush1.bf16.msra.mxu1 %v6454_v46  ;;  %v7826_v46 = vld [vmem:[%s6795_s9 + $0x1f4] ss:$24 sps:$4 sm:$0xff]  }
 0x14d   : > { %8689 = vst [vmem:[#allocation2_spill] sm:$0xff] %v7804_v30 }
 0x14e   : > { %2535 = vmatmul.mubr.bf16.gmra.mrb[32].mxu0 %v7797_v47  ;;  %2921 = vmatmul.mubr.bf16.gmra.mrb[64].mxu1 %v7422_v62  ;;  %v7821_v62 = vld [vmem:[%s6795_s9 + $0x1c0] ss:$24 sps:$4 sm:$0xff]  }
 0x14f   : > { %2544 = vmatprep.mubr.bf16.mxu0 %v7802_v34  ;;  %2930 = vmatprep.mubr.bf16.mxu1 %v7425_v43  ;;  %v6487_v43 = vld [vmem:[%s8684_s3 + $0xe0] ss:$8 sps:$4 sm:$0xff]  }
 0x150   : > { %3811 = vmatpush1.bf16.msra.mxu0 %v6487_v43  ;;  %v7862_v43 = vld [vmem:[%s6795_s9 + $0x254] ss:$24 sps:$4 sm:$0xff]  }
 0x151   : > { %v7816_v10 = vpop.f32.mrb[24].mxu1  ;;  %3812 = vmatprep.subr.bf16.mxu0 %v6492_v19  ;;  %v7891_v19 = vld [vmem:[%s6795_s9 + $0x2b4] ss:$24 sps:$4 sm:$0xff]  }
 0x152   : > { %8690 = vst [vmem:[#allocation3_spill] sm:$0xff] %v7816_v10  ;;  %v7818_v13 = vpop.f32.mrb[25].mxu1 }
 0x153   : > { %8691 = vst [vmem:[#allocation4_spill] sm:$0xff] %v7818_v13  ;;  %v7823_v8 = vpop.f32.mrb[26].mxu1  ;;  %v7850_v13 = vld [vmem:[%s6795_s9 + $0x224] ss:$24 sps:$4 sm:$0xff]  }
 0x154   : > { %8692 = vst [vmem:[#allocation5_spill] sm:$0xff] %v7823_v8  ;;  %v7828_v30 = vpop.f32.mrb[27].mxu1 }
 0x155   : > { %8693 = vst [vmem:[#allocation6_spill] sm:$0xff] %v7828_v30 }
 0x156   : > { %2545 = vmatmul.mubr.bf16.gmra.mrb[36].mxu0 %v7821_v62  ;;  %2931 = vmatmul.mubr.bf16.gmra.mrb[68].mxu1 %v7432_v48  ;;  %v7845_v48 = vld [vmem:[%s6795_s9 + $0x1f0] ss:$24 sps:$4 sm:$0xff]  }
 0x157   : > { %2554 = vmatprep.mubr.bf16.mxu0 %v7826_v46  ;;  %2940 = vmatprep.mubr.bf16.mxu1 %v7435_v50  ;;  %v7859_v50 = vld [vmem:[%s6795_s9 + $0x220] ss:$24 sps:$4 sm:$0xff]  }
 0x159   : > { %v7840_v27 = vpop.f32.mrb[28].mxu1 }
 0x15a   : > { %v7842_v30 = vpop.f32.mrb[29].mxu1 }
 0x15b   : > { %v7847_v8 = vpop.f32.mrb[30].mxu1 }
 0x15c   : > { %v7852_v10 = vpop.f32.mrb[31].mxu1 }
 0x15d   : > { %8694 = vst [vmem:[#allocation7_spill] sm:$0xff] %v7852_v10  ;;  %v7878_v10 = vld [vmem:[%s6795_s9 + $0x284] ss:$24 sps:$4 sm:$0xff]  }
 0x15e   : > { %2555 = vmatmul.mubr.bf16.gmra.mrb[40].mxu0 %v7845_v48  ;;  %2941 = vmatmul.mubr.bf16.gmra.mrb[72].mxu1 %v7442_v53  ;;  %v6490_v53 = vld [vmem:[%s8684_s3 + $0xf0] ss:$8 sps:$4 sm:$0xff]  }
 0x15f   : > { %2564 = vmatprep.mubr.bf16.mxu0 %v7850_v13  ;;  %2950 = vmatprep.mubr.bf16.mxu1 %v7445_v7  ;;  %v7875_v7 = vld [vmem:[%s6795_s9 + $0x250] ss:$24 sps:$4 sm:$0xff]  }
 0x160   : > { %3813 = vmatpush1.bf16.msra.mxu0 %v6490_v53  ;;  %v7908_v53 = vld [vmem:[%s6795_s9 + $0x2e0] ss:$24 sps:$4 sm:$0xff]  }
 0x166   : > { %2565 = vmatmul.mubr.bf16.gmra.mrb[44].mxu0 %v7859_v50  ;;  %2951 = vmatmul.mubr.bf16.gmra.mrb[76].mxu1 %v7452_v61  ;;  %v6495_v61 = vld [vmem:[%s8684_s3 + $0x104] ss:$8 sps:$4 sm:$0xff]  }
 0x167   : > { %2574 = vmatprep.mubr.bf16.mxu0 %v7862_v43  ;;  %2960 = vmatprep.mubr.bf16.mxu1 %v7455_v0  ;;  %v7888_v0 = vld [vmem:[%s6795_s9 + $0x280] ss:$24 sps:$4 sm:$0xff]  }
 0x168   : > { %3975 = vmatprep.subr.bf16.mxu0 %v6495_v61 }
 0x16e   : > { %2575 = vmatmul.mubr.bf16.gmra.mrb[48].mxu0 %v7875_v7  ;;  %2961 = vmatmul.mubr.bf16.gmra.mrb[80].mxu1 %v7465_v6  ;;  %v7898_v6 = vld [vmem:[%s6795_s9 + $0x2b0] ss:$24 sps:$4 sm:$0xff]  }
 0x16f   : > { %2584 = vmatprep.mubr.bf16.mxu0 %v7878_v10  ;;  %2970 = vmatprep.mubr.bf16.mxu1 %v7468_v20  ;;  %v7901_v20 = vld [vmem:[%s6795_s9 + $0x2e4] ss:$24 sps:$4 sm:$0xff]  }
 0x176   : > { %2585 = vmatmul.mubr.bf16.gmra.mrb[52].mxu0 %v7888_v0  ;;  %2971 = vmatmul.mubr.bf16.gmra.mrb[84].mxu1 %v7475_v12  ;;  %v576_v12 = vlaneseq }
 0x177   : > { %2594 = vmatprep.mubr.bf16.mxu0 %v7891_v19  ;;  %2980 = vmatprep.mubr.bf16.mxu1 %v7478_v14 }
 0x178   : > { %v7933_v14 = vshrl.u32 %v576_v12, 7  ;;  %v6496_v12 = vld [vmem:[%s8684_s3 + $0x110] ss:$8 sps:$4 sm:$0xff]  }
 0x17e   : > { %2595 = vmatmul.mubr.bf16.gmra.mrb[56].mxu0 %v7898_v6  ;;  %2981 = vmatmul.mubr.bf16.gmra.mrb[88].mxu1 %v7485_v17  ;;  %v578_v17 = vsub.s32 0, %v7933_v14 }
 0x17f   : > { %2604 = vmatprep.mubr.bf16.mxu0 %v7901_v20  ;;  %2990 = vmatprep.mubr.bf16.mxu1 %v7488_v18  ;;  %v7939_v18 = vld [vmem:[%s8683_s2] sm:$0xf] }
 0x186   : > { %2605 = vmatmul.mubr.bf16.gmra.mrb[60].mxu0 %v7908_v53  ;;  %2991 = vmatmul.mubr.bf16.gmra.mrb[92].mxu1 %v7495_v32  ;;  %v582_v32 = vsub.s32 1, %v7933_v14 }
 0x187   : > { %3033 = vmatprep.mubr.bf16.mxu1 %v7498_v40  ;;  %v7947_v40 = vrot.slane %v7939_v18, %v578_v17 }
 0x18e   : > { %3034 = vmatmul.mubr.bf16.vlgmr.msra.gmra.mrb[32].mxu1 %v7505_v41  ;;  %v7952_v41 = vrot.slane %v7939_v18, %v582_v32 }
 0x18f   : > { %3043 = vmatprep.mubr.bf16.mxu1 %v7511_v56 }
 0x196   : > { %3044 = vmatmul.mubr.bf16.gmra.mrb[36].mxu1 %v7536_v25 }
 0x197   : > { %3053 = vmatprep.mubr.bf16.mxu1 %v7539_v26 }
 0x19e   : > { %3054 = vmatmul.mubr.bf16.gmra.mrb[40].mxu1 %v7570_v36 }
 0x19f   : > { %3063 = vmatprep.mubr.bf16.mxu1 %v7573_v23 }
 0x1a6   : > { %3064 = vmatmul.mubr.bf16.gmra.mrb[44].mxu1 %v7608_v31 }
 0x1a7   : > { %3073 = vmatprep.mubr.bf16.mxu1 %v7613_v3 }
 0x1ae   : > { %3074 = vmatmul.mubr.bf16.gmra.mrb[48].mxu1 %v7650_v44 }
 0x1af   : > { %3083 = vmatprep.mubr.bf16.mxu1 %v7655_v16 }
 0x1b6   : > { %3084 = vmatmul.mubr.bf16.gmra.mrb[52].mxu1 %v7692_v58 }
 0x1b7   : > { %3093 = vmatprep.mubr.bf16.mxu1 %v7697_v45 }
 0x1be   : > { %3094 = vmatmul.mubr.bf16.gmra.mrb[56].mxu1 %v7728_v63 }
 0x1bf   : > { %3103 = vmatprep.mubr.bf16.mxu1 %v7733_v9 }
 0x1c6   : > { %3104 = vmatmul.mubr.bf16.gmra.mrb[60].mxu1 %v7764_v38 }
 0x1c7   : > { %3113 = vmatprep.mubr.bf16.mxu1 %v7769_v21 }
 0x1ce   : > { %3114 = vmatmul.mubr.bf16.gmra.mrb[64].mxu1 %v7797_v47  ;;  %v6493_v47 = vld [vmem:[%s8684_s3 + $0x100] ss:$8 sps:$4 sm:$0xff]  }
 0x1cf   : > { %3123 = vmatprep.mubr.bf16.mxu1 %v7802_v34 }
 0x1d6   : > { %3124 = vmatmul.mubr.bf16.gmra.mrb[68].mxu1 %v7821_v62  ;;  %v6498_v62 = vld [vmem:[%s8684_s3 + $0x114] ss:$8 sps:$4 sm:$0xff]  }
 0x1d7   : > { %3133 = vmatprep.mubr.bf16.mxu1 %v7826_v46 }
 0x1de   : > { %3134 = vmatmul.mubr.bf16.gmra.mrb[72].mxu1 %v7845_v48 }
 0x1df   : > { %3143 = vmatprep.mubr.bf16.mxu1 %v7850_v13 }
 0x1e1   : > { %v2456_v56 = vpop.f32.mrb[0].mxu0 }
 0x1e2   : > { %v5492_v25 = vadd.f32 %v2456_v56, %v7947_v40  ;;  %v2458_v26 = vpop.f32.mrb[1].mxu0 }
 0x1e3   : > { %v5493_v36 = vadd.f32 %v2458_v26, %v7952_v41  ;;  %v2460_v23 = vpop.f32.mrb[2].mxu0  ;;  %v6501_v26 = vld [vmem:[%s8684_s3 + $0x124] ss:$8 sps:$4 sm:$0xff]  }
 0x1e4   : > { %v5494_v31 = vadd.f32 %v2460_v23, %v7947_v40  ;;  %v2462_v3 = vpop.f32.mrb[3].mxu0  ;;  %v3194_v16 = vmax.f32 %v5492_v25, 0.0 }
 0x1e5   : > { %v5495_v44 = vadd.f32 %v2462_v3, %v7952_v41  ;;  %v3195_v45 = vmax.f32 %v5493_v36, 0.0 }
 0x1e6   : > { %v3198_v58 = vmax.f32 %v5494_v31, 0.0  ;;  %3144 = vmatmul.mubr.bf16.gmra.mrb[76].mxu1 %v7859_v50 }
 0x1e7   : > { %v3199_v63 = vmax.f32 %v5495_v44, 0.0  ;;  %3153 = vmatprep.mubr.bf16.mxu1 %v7862_v43 }
 0x1e8   : > { %v3322_v9 = vpack.c.bf16 %v3198_v58, %v3194_v16  ;;  %v6499_v16 = vld [vmem:[%s8684_s3 + $0x120] ss:$8 sps:$4 sm:$0xff]  }
 0x1e9   : > { %v3323_v38 = vpack.c.bf16 %v3199_v63, %v3195_v45  ;;  %v2466_v21 = vpop.f32.mrb[4].mxu0  ;;  %v6504_v45 = vld [vmem:[%s8684_s3 + $0x134] ss:$8 sps:$4 sm:$0xff]  }
 0x1ea   : > { %v5496_v34 = vadd.f32 %v2466_v21, %v7947_v40  ;;  %v2468_v13 = vpop.f32.mrb[5].mxu0 }
 0x1eb   : > { %v5497_v46 = vadd.f32 %v2468_v13, %v7952_v41  ;;  %v2470_v48 = vpop.f32.mrb[6].mxu0  ;;  %3814 = vmatprep.mubr.bf16.mxu0 %v3323_v38 }
 0x1ec   : > { %v5498_v50 = vadd.f32 %v2470_v48, %v7947_v40  ;;  %v2472_v43 = vpop.f32.mrb[7].mxu0  ;;  %3815 = vmatmul.mubr.bf16.vlgmr.msra.gmra.mrb[64].mxu0 %v3322_v9  ;;  %v3202_v56 = vmax.f32 %v5496_v34, 0.0 }
 0x1ed   : > { %v5499_v61 = vadd.f32 %v2472_v43, %v7952_v41  ;;  %3976 = vmatpush1.bf16.msra.mxu0 %v6493_v47  ;;  %v3203_v36 = vmax.f32 %v5497_v46, 0.0  ;;  %v6502_v47 = vld [vmem:[%s8684_s3 + $0x130] ss:$8 sps:$4 sm:$0xff]  }
 0x1ee   : > { %v3206_v25 = vmax.f32 %v5498_v50, 0.0  ;;  %3154 = vmatmul.mubr.bf16.gmra.mrb[80].mxu1 %v7875_v7  ;;  %3977 = vmatprep.subr.bf16.mxu0 %v6498_v62  ;;  %v6507_v62 = vld [vmem:[%s8684_s3 + $0x144] ss:$8 sps:$4 sm:$0xff]  }
 0x1ef   : > { %v3207_v23 = vmax.f32 %v5499_v61, 0.0  ;;  %3163 = vmatprep.mubr.bf16.mxu1 %v7878_v10 }
 0x1f0   : > { %v3326_v31 = vpack.c.bf16 %v3206_v25, %v3202_v56  ;;  %v6510_v25 = vld [vmem:[%s8684_s3 + $0x154] ss:$8 sps:$4 sm:$0xff]  }
 0x1f1   : > { %v3327_v3 = vpack.c.bf16 %v3207_v23, %v3203_v36  ;;  %v2476_v44 = vpop.f32.mrb[8].mxu0  ;;  %3978 = vmatpush1.bf16.msra.mxu0 %v6496_v12  ;;  %v6505_v12 = vld [vmem:[%s8684_s3 + $0x140] ss:$8 sps:$4 sm:$0xff]  }
 0x1f2   : > { %v5500_v58 = vadd.f32 %v2476_v44, %v7947_v40  ;;  %v2478_v7 = vpop.f32.mrb[9].mxu0  ;;  %3979 = vmatprep.subr.bf16.mxu0 %v6501_v26 }
 0x1f3   : > { %v5501_v63 = vadd.f32 %v2478_v7, %v7952_v41  ;;  %v2480_v9 = vpop.f32.mrb[10].mxu0  ;;  %3824 = vmatprep.mubr.bf16.mxu0 %v3327_v3  ;;  %v6508_v3 = vld [vmem:[%s8684_s3 + $0x150] ss:$8 sps:$4 sm:$0xff]  }
 0x1f4   : > { %v5502_v10 = vadd.f32 %v2480_v9, %v7947_v40  ;;  %v2482_v38 = vpop.f32.mrb[11].mxu0  ;;  %3825 = vmatmul.mubr.bf16.gmra.mrb[68].mxu0 %v3326_v31  ;;  %v3210_v34 = vmax.f32 %v5500_v58, 0.0  ;;  %v6513_v58 = vld [vmem:[%s8684_s3 + $0x164] ss:$8 sps:$4 sm:$0xff]  }
 0x1f5   : > { %v5503_v21 = vadd.f32 %v2482_v38, %v7952_v41  ;;  %3980 = vmatpush1.bf16.msra.mxu0 %v6499_v16  ;;  %v3211_v46 = vmax.f32 %v5501_v63, 0.0  ;;  %v6511_v38 = vld [vmem:[%s8684_s3 + $0x160] ss:$8 sps:$4 sm:$0xff]  }
 0x1f6   : > { %v3214_v13 = vmax.f32 %v5502_v10, 0.0  ;;  %3164 = vmatmul.mubr.bf16.gmra.mrb[84].mxu1 %v7888_v0  ;;  %3981 = vmatprep.subr.bf16.mxu0 %v6504_v45 }
 0x1f7   : > { %v3215_v48 = vmax.f32 %v5503_v21, 0.0  ;;  %3173 = vmatprep.mubr.bf16.mxu1 %v7891_v19 }
 0x1f8   : > { %v3330_v50 = vpack.c.bf16 %v3214_v13, %v3210_v34 }
 0x1f9   : > { %v3331_v43 = vpack.c.bf16 %v3215_v48, %v3211_v46  ;;  %v2486_v61 = vpop.f32.mrb[12].mxu0  ;;  %3982 = vmatpush1.bf16.msra.mxu0 %v6502_v47  ;;  %v6516_v47 = vld [vmem:[%s8684_s3 + $0x174] ss:$8 sps:$4 sm:$0xff]   ;;  %v6514_v48 = vld [vmem:[%s8684_s3 + $0x170] ss:$8 sps:$4 sm:$0xff]  }
 0x1fa   : > { %v5504_v56 = vadd.f32 %v2486_v61, %v7947_v40  ;;  %v2488_v0 = vpop.f32.mrb[13].mxu0  ;;  %3983 = vmatprep.subr.bf16.mxu0 %v6507_v62  ;;  %v6519_v61 = vld [vmem:[%s8684_s3 + $0x184] ss:$8 sps:$4 sm:$0xff]  }
 0x1fb   : > { %v5505_v26 = vadd.f32 %v2488_v0, %v7952_v41  ;;  %v2490_v36 = vpop.f32.mrb[14].mxu0  ;;  %3834 = vmatprep.mubr.bf16.mxu0 %v3331_v43 }
 0x1fc   : > { %v5506_v19 = vadd.f32 %v2490_v36, %v7947_v40  ;;  %v2492_v23 = vpop.f32.mrb[15].mxu0  ;;  %3835 = vmatmul.mubr.bf16.gmra.mrb[72].mxu0 %v3330_v50  ;;  %v3218_v44 = vmax.f32 %v5504_v56, 0.0  ;;  %v6517_v36 = vld [vmem:[%s8684_s3 + $0x180] ss:$8 sps:$4 sm:$0xff]  }
 0x1fd   : > { %v5507_v31 = vadd.f32 %v2492_v23, %v7952_v41  ;;  %3984 = vmatpush1.bf16.msra.mxu0 %v6505_v12  ;;  %v3219_v7 = vmax.f32 %v5505_v26, 0.0 }
 0x1fe   : > { %v3222_v16 = vmax.f32 %v5506_v19, 0.0  ;;  %3174 = vmatmul.mubr.bf16.gmra.mrb[88].mxu1 %v7898_v6  ;;  %3985 = vmatprep.subr.bf16.mxu0 %v6510_v25 }
 0x1ff   : > { %v3223_v45 = vmax.f32 %v5507_v31, 0.0  ;;  %3183 = vmatprep.mubr.bf16.mxu1 %v7901_v20 }
 0x200   : > { %v3334_v63 = vpack.c.bf16 %v3222_v16, %v3218_v44 }
 0x201   : > { %v3335_v9 = vpack.c.bf16 %v3223_v45, %v3219_v7  ;;  %v2496_v10 = vpop.f32.mrb[16].mxu0  ;;  %3986 = vmatpush1.bf16.msra.mxu0 %v6508_v3  ;;  %v6520_v7 = vld [vmem:[%s8684_s3 + $0x190] ss:$8 sps:$4 sm:$0xff]  }
 0x202   : > { %v5508_v21 = vadd.f32 %v2496_v10, %v7947_v40  ;;  %v2498_v6 = vpop.f32.mrb[17].mxu0  ;;  %3987 = vmatprep.subr.bf16.mxu0 %v6513_v58 }
 0x203   : > { %v5509_v34 = vadd.f32 %v2498_v6, %v7952_v41  ;;  %v2500_v13 = vpop.f32.mrb[18].mxu0  ;;  %3844 = vmatprep.mubr.bf16.mxu0 %v3335_v9  ;;  %v6525_v9 = vld [vmem:[%s8684_s3 + $0x1a4] ss:$8 sps:$4 sm:$0xff]  }
 0x204   : > { %v5510_v20 = vadd.f32 %v2500_v13, %v7947_v40  ;;  %v2502_v62 = vpop.f32.mrb[19].mxu0  ;;  %3845 = vmatmul.mubr.bf16.gmra.mrb[76].mxu0 %v3334_v63  ;;  %v3226_v50 = vmax.f32 %v5508_v21, 0.0 }
 0x205   : > { %v5511_v46 = vadd.f32 %v2502_v62, %v7952_v41  ;;  %3988 = vmatpush1.bf16.msra.mxu0 %v6511_v38  ;;  %v3227_v12 = vmax.f32 %v5509_v34, 0.0  ;;  %v6523_v34 = vld [vmem:[%s8684_s3 + $0x1a0] ss:$8 sps:$4 sm:$0xff]   ;;  %v6528_v62 = vld [vmem:[%s8684_s3 + $0x1b4] ss:$8 sps:$4 sm:$0xff]  }
 0x206   : > { %v3230_v43 = vmax.f32 %v5510_v20, 0.0  ;;  %3184 = vmatmul.mubr.bf16.gmra.mrb[92].mxu1 %v7908_v53  ;;  %3989 = vmatprep.subr.bf16.mxu0 %v6516_v47  ;;  %v6522_v53 = vld [vmem:[%s8684_s3 + $0x194] ss:$8 sps:$4 sm:$0xff]  }
 0x207   : > { %v3231_v56 = vmax.f32 %v5511_v46, 0.0 }
 0x208   : > { %v3338_v0 = vpack.c.bf16 %v3230_v43, %v3226_v50 }
 0x209   : > { %v3339_v25 = vpack.c.bf16 %v3231_v56, %v3227_v12  ;;  %v2506_v26 = vpop.f32.mrb[20].mxu0  ;;  %3990 = vmatpush1.bf16.msra.mxu0 %v6514_v48  ;;  %v6526_v12 = vld [vmem:[%s8684_s3 + $0x1b0] ss:$8 sps:$4 sm:$0xff]  }
 0x20a   : > { %v5512_v19 = vadd.f32 %v2506_v26, %v7947_v40  ;;  %v2508_v23 = vpop.f32.mrb[21].mxu0  ;;  %3991 = vmatprep.subr.bf16.mxu0 %v6519_v61 }
 0x20b   : > { %v5513_v31 = vadd.f32 %v2508_v23, %v7952_v41  ;;  %v2510_v3 = vpop.f32.mrb[22].mxu0  ;;  %3854 = vmatprep.mubr.bf16.mxu0 %v3339_v25  ;;  %v6531_v25 = vld [vmem:[%s8684_s3 + $0x1c4] ss:$8 sps:$4 sm:$0xff]  }
 0x20c   : > { %v5514_v44 = vadd.f32 %v2510_v3, %v7947_v40  ;;  %v2512_v16 = vpop.f32.mrb[23].mxu0  ;;  %3855 = vmatmul.mubr.bf16.gmra.mrb[80].mxu0 %v3338_v0  ;;  %v3234_v45 = vmax.f32 %v5512_v19, 0.0 }
 0x20d   : > { %v5515_v58 = vadd.f32 %v2512_v16, %v7952_v41  ;;  %3992 = vmatpush1.bf16.msra.mxu0 %v6517_v36  ;;  %v3235_v10 = vmax.f32 %v5513_v31, 0.0  ;;  %v6529_v31 = vld [vmem:[%s8684_s3 + $0x1c0] ss:$8 sps:$4 sm:$0xff]   ;;  %v6534_v16 = vld [vmem:[%s8684_s3 + $0x1d4] ss:$8 sps:$4 sm:$0xff]  }
 0x20e   : > { %v3238_v63 = vmax.f32 %v5514_v44, 0.0  ;;  %3993 = vmatprep.subr.bf16.mxu0 %v6522_v53 }
 0x20f   : > { %v3239_v38 = vmax.f32 %v5515_v58, 0.0 }
 0x210   : > { %v3342_v21 = vpack.c.bf16 %v3238_v63, %v3234_v45 }
 0x211   : > { %v3343_v6 = vpack.c.bf16 %v3239_v38, %v3235_v10  ;;  %v2516_v47 = vpop.f32.mrb[24].mxu0  ;;  %3994 = vmatpush1.bf16.msra.mxu0 %v6520_v7  ;;  %v6532_v10 = vld [vmem:[%s8684_s3 + $0x1d0] ss:$8 sps:$4 sm:$0xff]  }
 0x212   : > { %v5516_v13 = vadd.f32 %v2516_v47, %v7947_v40  ;;  %v2518_v20 = vpop.f32.mrb[25].mxu0  ;;  %3995 = vmatprep.subr.bf16.mxu0 %v6525_v9 }
 0x213   : > { %v5517_v46 = vadd.f32 %v2518_v20, %v7952_v41  ;;  %v2520_v48 = vpop.f32.mrb[26].mxu0  ;;  %3864 = vmatprep.mubr.bf16.mxu0 %v3343_v6  ;;  %v6537_v6 = vld [vmem:[%s8684_s3 + $0x1e4] ss:$8 sps:$4 sm:$0xff]  }
 0x214   : > { %v5518_v50 = vadd.f32 %v2520_v48, %v7947_v40  ;;  %v2522_v43 = vpop.f32.mrb[27].mxu0  ;;  %3865 = vmatmul.mubr.bf16.gmra.mrb[84].mxu0 %v3342_v21  ;;  %v3242_v56 = vmax.f32 %v5516_v13, 0.0  ;;  %v2151_v13 = vadd.f32 %v7597_v52, %v7947_v40  ;;  %v6540_v52 = vld [vmem:[%s8684_s3 + $0x1f4] ss:$8 sps:$4 sm:$0xff]  }
 0x215   : > { %v5519_v61 = vadd.f32 %v2522_v43, %v7952_v41  ;;  %3996 = vmatpush1.bf16.msra.mxu0 %v6523_v34  ;;  %v3243_v26 = vmax.f32 %v5517_v46, 0.0  ;;  %v2155_v43 = vadd.f32 %v7610_v1, %v7947_v40  ;;  %v6538_v1 = vld [vmem:[%s8684_s3 + $0x1f0] ss:$8 sps:$4 sm:$0xff]  }
 0x216   : > { %v3246_v0 = vmax.f32 %v5518_v50, 0.0  ;;  %3997 = vmatprep.subr.bf16.mxu0 %v6528_v62  ;;  %v2153_v62 = vadd.f32 %v7605_v60, %v7952_v41  ;;  %v6535_v50 = vld [vmem:[%s8684_s3 + $0x1e0] ss:$8 sps:$4 sm:$0xff]   ;;  %v2157_v60 = vadd.f32 %v7615_v4, %v7952_v41  ;;  %v2161_v4 = vadd.f32 %v7639_v5, %v7947_v40 }
 0x217   : > { %v3247_v36 = vmax.f32 %v5519_v61, 0.0 }
 0x218   : > { %v3346_v19 = vpack.c.bf16 %v3246_v0, %v3242_v56 }
 0x219   : > { %v3347_v23 = vpack.c.bf16 %v3247_v36, %v3243_v26  ;;  %v2526_v53 = vpop.f32.mrb[28].mxu0  ;;  %3998 = vmatpush1.bf16.msra.mxu0 %v6526_v12 }
 0x21a   : > { %v5520_v3 = vadd.f32 %v2526_v53, %v7947_v40  ;;  %v2528_v44 = vpop.f32.mrb[29].mxu0  ;;  %3999 = vmatprep.subr.bf16.mxu0 %v6531_v25 }
 0x21b   : > { %v5521_v58 = vadd.f32 %v2528_v44, %v7952_v41  ;;  %v2530_v7 = vpop.f32.mrb[30].mxu0  ;;  %3874 = vmatprep.mubr.bf16.mxu0 %v3347_v23  ;;  %v2163_v44 = vadd.f32 %v7647_v42, %v7952_v41 }
 0x21c   : > { %v5522_v45 = vadd.f32 %v2530_v7, %v7947_v40  ;;  %v2532_v63 = vpop.f32.mrb[31].mxu0  ;;  %3875 = vmatmul.mubr.bf16.gmra.mrb[88].mxu0 %v3346_v19  ;;  %v3250_v38 = vmax.f32 %v5520_v3, 0.0  ;;  %v2165_v7 = vadd.f32 %v7652_v11, %v7947_v40 }
 0x21d   : > { %v5523_v9 = vadd.f32 %v2532_v63, %v7952_v41  ;;  %4000 = vmatpush1.bf16.msra.mxu0 %v6529_v31  ;;  %v3251_v47 = vmax.f32 %v5521_v58, 0.0 }
 0x21e   : > { %v3254_v21 = vmax.f32 %v5522_v45, 0.0  ;;  %4001 = vmatprep.subr.bf16.mxu0 %v6534_v16 }
 0x21f   : > { %v3255_v34 = vmax.f32 %v5523_v9, 0.0  ;;  %v2167_v9 = vadd.f32 %v7657_v28, %v7952_v41 }
 0x220   : > { %v3350_v20 = vpack.c.bf16 %v3254_v21, %v3250_v38 }
 0x221   : > { %v3351_v46 = vpack.c.bf16 %v3255_v34, %v3251_v47  ;;  %v2536_v48 = vpop.f32.mrb[32].mxu0  ;;  %4002 = vmatpush1.bf16.msra.mxu0 %v6532_v10 }
 0x222   : > { %v5525_v61 = vadd.f32 %v2536_v48, %v2151_v13  ;;  %v2538_v12 = vpop.f32.mrb[33].mxu0  ;;  %4003 = vmatprep.subr.bf16.mxu0 %v6537_v6  ;;  %v2175_v48 = vadd.f32 %v7694_v59, %v7947_v40 }
 0x223   : > { %v5527_v56 = vadd.f32 %v2538_v12, %v2153_v62  ;;  %v2540_v0 = vpop.f32.mrb[34].mxu0  ;;  %3884 = vmatprep.mubr.bf16.mxu0 %v3351_v46  ;;  %v2173_v62 = vadd.f32 %v7689_v39, %v7952_v41 }
 0x224   : > { %v5529_v25 = vadd.f32 %v2540_v0, %v2155_v43  ;;  %v2542_v26 = vpop.f32.mrb[35].mxu0  ;;  %3885 = vmatmul.mubr.bf16.gmra.mrb[92].mxu0 %v3350_v20  ;;  %v3258_v19 = vmax.f32 %v5525_v61, 0.0  ;;  %v2171_v20 = vadd.f32 %v7681_v37, %v7947_v40  ;;  %v2177_v61 = vadd.f32 %v7699_v51, %v7952_v41 }
 0x225   : > { %v5531_v36 = vadd.f32 %v2542_v26, %v2157_v60  ;;  %4004 = vmatpush1.bf16.msra.mxu0 %v6535_v50  ;;  %v3259_v53 = vmax.f32 %v5527_v56, 0.0 }
 0x226   : > { %v3262_v23 = vmax.f32 %v5529_v25, 0.0  ;;  %4005 = vmatprep.subr.bf16.mxu0 %v6540_v52 }
 0x227   : > { %v3263_v31 = vmax.f32 %v5531_v36, 0.0  ;;  %v2181_v36 = vadd.f32 %v7720_v49, %v7947_v40 }
 0x228   : > { %v3354_v3 = vpack.c.bf16 %v3262_v23, %v3258_v19  ;;  %v2185_v23 = vadd.f32 %v7730_v2, %v7947_v40 }
 0x229   : > { %v3355_v16 = vpack.c.bf16 %v3263_v31, %v3259_v53  ;;  %v2546_v58 = vpop.f32.mrb[36].mxu0  ;;  %4006 = vmatpush1.bf16.msra.mxu0 %v6538_v1  ;;  %v2183_v1 = vadd.f32 %v7725_v35, %v7952_v41 }
 0x22a   : > { %v5533_v45 = vadd.f32 %v2546_v58, %v2161_v4  ;;  %v2548_v63 = vpop.f32.mrb[37].mxu0  ;;  %v2187_v4 = vadd.f32 %v7735_v24, %v7952_v41 }
 0x22b   : > { %v5535_v10 = vadd.f32 %v2548_v63, %v2163_v44  ;;  %v2550_v38 = vpop.f32.mrb[38].mxu0  ;;  %3894 = vmatprep.mubr.bf16.mxu0 %v3355_v16 }
 0x22c   : > { %v5537_v21 = vadd.f32 %v2550_v38, %v2165_v7  ;;  %v2552_v5 = vpop.f32.mrb[39].mxu0  ;;  %3895 = vmatmul.mubr.bf16.gmra.mrb[96].mxu0 %v3354_v3  ;;  %v3266_v47 = vmax.f32 %v5533_v45, 0.0 }
 0x22d   : > { %v5539_v6 = vadd.f32 %v2552_v5, %v2167_v9  ;;  %v3267_v34 = vmax.f32 %v5535_v10, 0.0  ;;  %v2191_v9 = vadd.f32 %v7756_v22, %v7947_v40  ;;  %v2193_v10 = vadd.f32 %v7761_v57, %v7952_v41 }
 0x22e   : > { %v3270_v42 = vmax.f32 %v5537_v21, 0.0  ;;  %v2195_v21 = vadd.f32 %v7766_v54, %v7947_v40 }
 0x22f   : > { %v3271_v13 = vmax.f32 %v5539_v6, 0.0 }
 0x230   : > { %v3358_v11 = vpack.c.bf16 %v3270_v42, %v3266_v47  ;;  %v2197_v47 = vadd.f32 %v7771_v15, %v7952_v41 }
 0x231   : > { %v3359_v46 = vpack.c.bf16 %v3271_v13, %v3267_v34  ;;  %v2556_v28 = vpop.f32.mrb[40].mxu0 }
 0x232   : > { %v5541_v50 = vadd.f32 %v2556_v28, %v2171_v20  ;;  %v2558_v43 = vpop.f32.mrb[41].mxu0  ;;  %v2201_v28 = vadd.f32 %v7792_v55, %v7947_v40 }
 0x233   : > { %v5543_v12 = vadd.f32 %v2558_v43, %v2173_v62  ;;  %v2560_v52 = vpop.f32.mrb[42].mxu0  ;;  %3904 = vmatprep.mubr.bf16.mxu0 %v3359_v46  ;;  %v2205_v43 = vadd.f32 %v7799_v33, %v7947_v40 }
 0x234   : > { %v5545_v60 = vadd.f32 %v2560_v52, %v2175_v48  ;;  %v2562_v56 = vpop.f32.mrb[43].mxu0  ;;  %3905 = vmatmul.mubr.bf16.gmra.mrb[100].mxu0 %v3358_v11  ;;  %v3274_v0 = vmax.f32 %v5541_v50, 0.0  ;;  %v2203_v48 = vadd.f32 %v7794_v29, %v7952_v41  ;;  %v8695_v52 = vld [vmem:[#allocation2_spill] sm:$0xff]  ;;  %v6541_v29 = vld [vmem:[%s8686_s5 + $0x40] sm:$0xff]  }
 0x235   : > { %v5547_v37 = vadd.f32 %v2562_v56, %v2177_v61  ;;  %v3275_v39 = vmax.f32 %v5543_v12, 0.0  ;;  %5348 = vmatprep.subr.bf16.mxu1 %v6541_v29 }
 0x236   : > { %v3278_v25 = vmax.f32 %v5545_v60, 0.0  ;;  %v2207_v60 = vadd.f32 %v8695_v52, %v7952_v41  ;;  %v6544_v52 = vld [vmem:[%s8686_s5 + $0x8] sm:$0xff]  }
 0x237   : > { %v3279_v26 = vmax.f32 %v5547_v37, 0.0 }
 0x238   : > { %v3362_v59 = vpack.c.bf16 %v3278_v25, %v3274_v0 }
 0x239   : > { %v3363_v19 = vpack.c.bf16 %v3279_v26, %v3275_v39  ;;  %v2566_v51 = vpop.f32.mrb[44].mxu0 }
 0x23a   : > { %v5549_v53 = vadd.f32 %v2566_v51, %v2181_v36  ;;  %v2568_v31 = vpop.f32.mrb[45].mxu0  ;;  %v6542_v51 = vld [vmem:[%s8686_s5] sm:$0xff]  }
 0x23b   : > { %v5551_v3 = vadd.f32 %v2568_v31, %v2183_v1  ;;  %v2570_v44 = vpop.f32.mrb[46].mxu0  ;;  %3914 = vmatprep.mubr.bf16.mxu0 %v3363_v19  ;;  %5349 = vmatpush3.bf16.msra.mxu1 %v6542_v51 }
 0x23c   : > { %v5553_v16 = vadd.f32 %v2570_v44, %v2185_v23  ;;  %v2572_v58 = vpop.f32.mrb[47].mxu0  ;;  %3915 = vmatmul.mubr.bf16.gmra.mrb[104].mxu0 %v3362_v59  ;;  %v3282_v7 = vmax.f32 %v5549_v53, 0.0  ;;  %v8696_v59 = vld [vmem:[#allocation3_spill] sm:$0xff]  ;;  %v8697_v23 = vld [vmem:[#allocation4_spill] sm:$0xff] }
 0x23d   : > { %v5555_v49 = vadd.f32 %v2572_v58, %v2187_v4  ;;  %v3283_v35 = vmax.f32 %v5551_v3, 0.0  ;;  %v2211_v1 = vadd.f32 %v8696_v59, %v7947_v40  ;;  %v2213_v53 = vadd.f32 %v8697_v23, %v7952_v41  ;;  %v8698_v3 = vld [vmem:[#allocation5_spill] sm:$0xff]  ;;  %v6548_v23 = vld [vmem:[%s8686_s5 + $0x18] sm:$0xff]  }
 0x23e   : > { %v3286_v45 = vmax.f32 %v5553_v16, 0.0  ;;  %v2215_v44 = vadd.f32 %v8698_v3, %v7947_v40 }
 0x23f   : > { %v3287_v63 = vmax.f32 %v5555_v49, 0.0  ;;  %v8699_v49 = vld [vmem:[#allocation6_spill] sm:$0xff] }
 0x240   : > { %v3366_v2 = vpack.c.bf16 %v3286_v45, %v3282_v7  ;;  %v2217_v7 = vadd.f32 %v8699_v49, %v7952_v41 }
 0x241   : > { %v3367_v38 = vpack.c.bf16 %v3287_v63, %v3283_v35  ;;  %v2576_v24 = vpop.f32.mrb[48].mxu0 }
 0x242   : > { %v5557_v5 = vadd.f32 %v2576_v24, %v2191_v9  ;;  %v2578_v6 = vpop.f32.mrb[49].mxu0 }
 0x243   : > { %v5559_v42 = vadd.f32 %v2578_v6, %v2193_v10  ;;  %v2580_v34 = vpop.f32.mrb[50].mxu0  ;;  %3924 = vmatprep.mubr.bf16.mxu0 %v3367_v38 }
 0x244   : > { %v5561_v13 = vadd.f32 %v2580_v34, %v2195_v21  ;;  %v2582_v20 = vpop.f32.mrb[51].mxu0  ;;  %3925 = vmatmul.mubr.bf16.gmra.mrb[108].mxu0 %v3366_v2  ;;  %v3290_v11 = vmax.f32 %v5557_v5, 0.0  ;;  %v2221_v5 = vadd.f32 %v7840_v27, %v7947_v40  ;;  %v590_v27 = vsub.s32 3, %v7933_v14 }
 0x245   : > { %v5563_v22 = vadd.f32 %v2582_v20, %v2197_v47  ;;  %v3291_v57 = vmax.f32 %v5559_v42, 0.0  ;;  %v2223_v47 = vadd.f32 %v7842_v30, %v7952_v41 }
 0x246   : > { %v3294_v62 = vmax.f32 %v5561_v13, 0.0  ;;  %v2225_v13 = vadd.f32 %v7847_v8, %v7947_v40  ;;  %v6543_v8 = vld [vmem:[%s8686_s5 + $0x48] sm:$0xff]  }
 0x247   : > { %v3295_v46 = vmax.f32 %v5563_v22, 0.0  ;;  %5350 = vmatprep.subr.bf16.mxu1 %v6543_v8  ;;  %v6556_v8 = vld [vmem:[%s8686_s5 + $0x38] sm:$0xff]  }
 0x248   : > { %v3370_v54 = vpack.c.bf16 %v3294_v62, %v3290_v11  ;;  %v586_v11 = vsub.s32 2, %v7933_v14  ;;  %v8700_v62 = vld [vmem:[#allocation7_spill] sm:$0xff]  ;;  %5351 = vmatpush3.bf16.msra.mxu1 %v6544_v52 }
 0x249   : > { %v3371_v50 = vpack.c.bf16 %v3295_v46, %v3291_v57  ;;  %v2586_v15 = vpop.f32.mrb[52].mxu0  ;;  %v2227_v57 = vadd.f32 %v8700_v62, %v7952_v41 }
 0x24a   : > { %v5565_v61 = vadd.f32 %v2586_v15, %v2201_v28  ;;  %v2588_v12 = vpop.f32.mrb[53].mxu0  ;;  %v8164_v15 = vrot.slane %v7939_v18, %v586_v11  ;;  %v6554_v11 = vld [vmem:[%s8686_s5 + $0x30] sm:$0xff]  }
 0x24b   : > { %v5567_v56 = vadd.f32 %v2588_v12, %v2203_v48  ;;  %v2590_v37 = vpop.f32.mrb[54].mxu0  ;;  %3934 = vmatprep.mubr.bf16.mxu0 %v3371_v50 }
 0x24c   : > { %v5569_v0 = vadd.f32 %v2590_v37, %v2205_v43  ;;  %v2592_v25 = vpop.f32.mrb[55].mxu0  ;;  %3935 = vmatmul.mubr.bf16.gmra.mrb[112].mxu0 %v3370_v54  ;;  %v3298_v39 = vmax.f32 %v5565_v61, 0.0  ;;  %v8167_v61 = vrot.slane %v7939_v18, %v590_v27 }
 0x24d   : > { %v5571_v55 = vadd.f32 %v2592_v25, %v2207_v60  ;;  %v3299_v36 = vmax.f32 %v5567_v56, 0.0 }
 0x24e   : > { %v3302_v26 = vmax.f32 %v5569_v0, 0.0 }
 0x24f   : > { %v3303_v33 = vmax.f32 %v5571_v55, 0.0 }
 0x250   : > { %v3374_v19 = vpack.c.bf16 %v3302_v26, %v3298_v39  ;;  %v6545_v39 = vld [vmem:[%s8686_s5 + $0x50] sm:$0xff]  }
 0x251   : > { %v3375_v31 = vpack.c.bf16 %v3303_v33, %v3299_v36  ;;  %v2596_v4 = vpop.f32.mrb[56].mxu0  ;;  %v6546_v26 = vld [vmem:[%s8686_s5 + $0x10] sm:$0xff]   ;;  %v6547_v36 = vld [vmem:[%s8686_s5 + $0x58] sm:$0xff]   ;;  %5352 = vmatprep.subr.bf16.mxu1 %v6545_v39 }
 0x252   : > { %v5573_v16 = vadd.f32 %v2596_v4, %v2211_v1  ;;  %v2598_v58 = vpop.f32.mrb[57].mxu0  ;;  %5353 = vmatpush3.bf16.msra.mxu1 %v6546_v26 }
 0x253   : > { %v5575_v45 = vadd.f32 %v2598_v58, %v2213_v53  ;;  %v2600_v35 = vpop.f32.mrb[58].mxu0  ;;  %3944 = vmatprep.mubr.bf16.mxu0 %v3375_v31  ;;  %5354 = vmatprep.subr.bf16.mxu1 %v6547_v36  ;;  %v6549_v31 = vld [vmem:[%s8686_s5 + $0x60] sm:$0xff]  }
 0x254   : > { %v5577_v63 = vadd.f32 %v2600_v35, %v2215_v44  ;;  %v2602_v9 = vpop.f32.mrb[59].mxu0  ;;  %3945 = vmatmul.mubr.bf16.gmra.mrb[116].mxu0 %v3374_v19  ;;  %v3306_v10 = vmax.f32 %v5573_v16, 0.0 }
 0x255   : > { %v5579_v2 = vadd.f32 %v2602_v9, %v2217_v7  ;;  %v3307_v24 = vmax.f32 %v5575_v45, 0.0  ;;  %v6550_v7 = vld [vmem:[%s8686_s5 + $0x20] sm:$0xff]  }
 0x256   : > { %v3310_v38 = vmax.f32 %v5577_v63, 0.0  ;;  %5355 = vmatpush3.bf16.msra.mxu1 %v6548_v23  ;;  %v6551_v63 = vld [vmem:[%s8686_s5 + $0x68] sm:$0xff]  }
 0x257   : > { %v3311_v21 = vmax.f32 %v5579_v2, 0.0  ;;  %5356 = vmatprep.subr.bf16.mxu1 %v6549_v31 }
 0x258   : > { %v3378_v6 = vpack.c.bf16 %v3310_v38, %v3306_v10 }
 0x259   : > { %v3379_v42 = vpack.c.bf16 %v3311_v21, %v3307_v24  ;;  %v2606_v34 = vpop.f32.mrb[60].mxu0  ;;  %v6552_v21 = vld [vmem:[%s8686_s5 + $0x28] sm:$0xff]  }
 0x25a   : > { %v5581_v20 = vadd.f32 %v2606_v34, %v2221_v5  ;;  %v2608_v22 = vpop.f32.mrb[61].mxu0  ;;  %5357 = vmatpush3.bf16.msra.mxu1 %v6550_v7 }
 0x25b   : > { %v5583_v46 = vadd.f32 %v2608_v22, %v2223_v47  ;;  %v2610_v28 = vpop.f32.mrb[62].mxu0  ;;  %3954 = vmatprep.mubr.bf16.mxu0 %v3379_v42  ;;  %5358 = vmatprep.subr.bf16.mxu1 %v6551_v63 }
 0x25c   : > { %v5585_v54 = vadd.f32 %v2610_v28, %v2225_v13  ;;  %v2612_v48 = vpop.f32.mrb[63].mxu0  ;;  %3955 = vmatmul.mubr.bf16.gmra.mrb[120].mxu0 %v3378_v6  ;;  %v3314_v40 = vmax.f32 %v5581_v20, 0.0  ;;  %v6553_v6 = vld [vmem:[%s8686_s5 + $0x70] sm:$0xff]  }
 0x25d   : > { %v5587_v30 = vadd.f32 %v2612_v48, %v2227_v57  ;;  %v3315_v43 = vmax.f32 %v5583_v46, 0.0  ;;  %v6555_v46 = vld [vmem:[%s8686_s5 + $0x78] sm:$0xff]  }
 0x25e   : > { %v3318_v50 = vmax.f32 %v5585_v54, 0.0  ;;  %5359 = vmatpush3.bf16.msra.mxu1 %v6552_v21 }
 0x25f   : > { %v3319_v41 = vmax.f32 %v5587_v30, 0.0  ;;  %5360 = vmatprep.subr.bf16.mxu1 %v6553_v6 }
 0x260   : > { %v3382_v12 = vpack.c.bf16 %v3318_v50, %v3314_v40 }
 0x261   : > { %v3383_v60 = vpack.c.bf16 %v3319_v41, %v3315_v43  ;;  %v3035_v56 = vpop.f32.mrb[32].mxu1 }
 0x262   : > { %v5588_v37 = vadd.f32 %v3035_v56, %v8164_v15  ;;  %v3037_v0 = vpop.f32.mrb[33].mxu1  ;;  %5361 = vmatpush3.bf16.msra.mxu1 %v6554_v11 }
 0x263   : > { %v5589_v25 = vadd.f32 %v3037_v0, %v8167_v61  ;;  %v3039_v55 = vpop.f32.mrb[34].mxu1  ;;  %3964 = vmatprep.mubr.bf16.mxu0 %v3383_v60  ;;  %5362 = vmatprep.subr.bf16.mxu1 %v6555_v46 }
 0x264   : > { %v5590_v29 = vadd.f32 %v3039_v55, %v8164_v15  ;;  %v3041_v18 = vpop.f32.mrb[35].mxu1  ;;  %3965 = vmatmul.mubr.bf16.gmra.mrb[124].mxu0 %v3382_v12  ;;  %v3196_v59 = vmax.f32 %v5588_v37, 0.0 }
 0x265   : > { %v5591_v33 = vadd.f32 %v3041_v18, %v8167_v61  ;;  %v3197_v19 = vmax.f32 %v5589_v25, 0.0 }
 0x266   : > { %v3200_v1 = vmax.f32 %v5590_v29, 0.0  ;;  %5363 = vmatpush3.bf16.msra.mxu1 %v6556_v8 }
 0x267   : > { %v3201_v51 = vmax.f32 %v5591_v33, 0.0 }
 0x268   : > { %v3324_v53 = vpack.c.bf16 %v3200_v1, %v3196_v59 }
 0x269   : > { %v3325_v4 = vpack.c.bf16 %v3201_v51, %v3197_v19  ;;  %v3045_v3 = vpop.f32.mrb[36].mxu1 }
 0x26a   : > { %v5592_v44 = vadd.f32 %v3045_v3, %v8164_v15  ;;  %v3047_v16 = vpop.f32.mrb[37].mxu1 }
 0x26b   : > { %v5593_v58 = vadd.f32 %v3047_v16, %v8167_v61  ;;  %v3049_v49 = vpop.f32.mrb[38].mxu1  ;;  %4007 = vmatprep.mubr.bf16.mxu0 %v3325_v4 }
 0x26c   : > { %v5594_v45 = vadd.f32 %v3049_v49, %v8164_v15  ;;  %v3051_v35 = vpop.f32.mrb[39].mxu1  ;;  %4008 = vmatmul.mubr.bf16.vlgmr.msra.gmra.mrb[64].mxu0 %v3324_v53  ;;  %v3204_v2 = vmax.f32 %v5592_v44, 0.0 }
 0x26d   : > { %v5595_v9 = vadd.f32 %v3051_v35, %v8167_v61  ;;  %v3205_v38 = vmax.f32 %v5593_v58, 0.0 }
 0x26e   : > { %v3208_v10 = vmax.f32 %v5594_v45, 0.0 }
 0x26f   : > { %v3209_v24 = vmax.f32 %v5595_v9, 0.0 }
 0x270   : > { %v3328_v5 = vpack.c.bf16 %v3208_v10, %v3204_v2 }
 0x271   : > { %v3329_v47 = vpack.c.bf16 %v3209_v24, %v3205_v38  ;;  %v3055_v42 = vpop.f32.mrb[40].mxu1 }
 0x272   : > { %v5596_v34 = vadd.f32 %v3055_v42, %v8164_v15  ;;  %v3057_v13 = vpop.f32.mrb[41].mxu1 }
 0x273   : > { %v5597_v20 = vadd.f32 %v3057_v13, %v8167_v61  ;;  %v3059_v22 = vpop.f32.mrb[42].mxu1  ;;  %4017 = vmatprep.mubr.bf16.mxu0 %v3329_v47 }
 0x274   : > { %v5598_v62 = vadd.f32 %v3059_v22, %v8164_v15  ;;  %v3061_v57 = vpop.f32.mrb[43].mxu1  ;;  %4018 = vmatmul.mubr.bf16.gmra.mrb[68].mxu0 %v3328_v5  ;;  %v3212_v27 = vmax.f32 %v5596_v34, 0.0 }
 0x275   : > { %v5599_v28 = vadd.f32 %v3061_v57, %v8167_v61  ;;  %v3213_v48 = vmax.f32 %v5597_v20, 0.0 }
 0x276   : > { %v3216_v54 = vmax.f32 %v5598_v62, 0.0 }
 0x277   : > { %v3217_v30 = vmax.f32 %v5599_v28, 0.0 }
 0x278   : > { %v3332_v40 = vpack.c.bf16 %v3216_v54, %v3212_v27 }
 0x279   : > { %v3333_v50 = vpack.c.bf16 %v3217_v30, %v3213_v48  ;;  %v3065_v43 = vpop.f32.mrb[44].mxu1 }
 0x27a   : > { %v5600_v41 = vadd.f32 %v3065_v43, %v8164_v15  ;;  %v3067_v12 = vpop.f32.mrb[45].mxu1 }
 0x27b   : > { %v5601_v52 = vadd.f32 %v3067_v12, %v8167_v61  ;;  %v3069_v60 = vpop.f32.mrb[46].mxu1  ;;  %4027 = vmatprep.mubr.bf16.mxu0 %v3333_v50 }
 0x27c   : > { %v5602_v56 = vadd.f32 %v3069_v60, %v8164_v15  ;;  %v3071_v37 = vpop.f32.mrb[47].mxu1  ;;  %4028 = vmatmul.mubr.bf16.gmra.mrb[72].mxu0 %v3332_v40  ;;  %v3220_v25 = vmax.f32 %v5600_v41, 0.0 }
 0x27d   : > { %v5603_v0 = vadd.f32 %v3071_v37, %v8167_v61  ;;  %v3221_v29 = vmax.f32 %v5601_v52, 0.0 }
 0x27e   : > { %v3224_v55 = vmax.f32 %v5602_v56, 0.0 }
 0x27f   : > { %v3225_v18 = vmax.f32 %v5603_v0, 0.0 }
 0x280   : > { %v3336_v39 = vpack.c.bf16 %v3224_v55, %v3220_v25 }
 0x281   : > { %v3337_v26 = vpack.c.bf16 %v3225_v18, %v3221_v29  ;;  %v3075_v36 = vpop.f32.mrb[48].mxu1 }
 0x282   : > { %v5604_v33 = vadd.f32 %v3075_v36, %v8164_v15  ;;  %v3077_v59 = vpop.f32.mrb[49].mxu1 }
 0x283   : > { %v5605_v1 = vadd.f32 %v3077_v59, %v8167_v61  ;;  %v3079_v19 = vpop.f32.mrb[50].mxu1  ;;  %4037 = vmatprep.mubr.bf16.mxu0 %v3337_v26 }
 0x284   : > { %v5606_v51 = vadd.f32 %v3079_v19, %v8164_v15  ;;  %v3081_v23 = vpop.f32.mrb[51].mxu1  ;;  %4038 = vmatmul.mubr.bf16.gmra.mrb[76].mxu0 %v3336_v39  ;;  %v3228_v31 = vmax.f32 %v5604_v33, 0.0 }
 0x285   : > { %v5607_v53 = vadd.f32 %v3081_v23, %v8167_v61  ;;  %v3229_v3 = vmax.f32 %v5605_v1, 0.0 }
 0x286   : > { %v3232_v4 = vmax.f32 %v5606_v51, 0.0 }
 0x287   : > { %v3233_v44 = vmax.f32 %v5607_v53, 0.0 }
 0x288   : > { %v3340_v16 = vpack.c.bf16 %v3232_v4, %v3228_v31 }
 0x289   : > { %v3341_v58 = vpack.c.bf16 %v3233_v44, %v3229_v3  ;;  %v3085_v49 = vpop.f32.mrb[52].mxu1 }
 0x28a   : > { %v5608_v7 = vadd.f32 %v3085_v49, %v8164_v15  ;;  %v3087_v45 = vpop.f32.mrb[53].mxu1 }
 0x28b   : > { %v5609_v35 = vadd.f32 %v3087_v45, %v8167_v61  ;;  %v3089_v63 = vpop.f32.mrb[54].mxu1  ;;  %4047 = vmatprep.mubr.bf16.mxu0 %v3341_v58 }
 0x28c   : > { %v5610_v9 = vadd.f32 %v3089_v63, %v8164_v15  ;;  %v3091_v2 = vpop.f32.mrb[55].mxu1  ;;  %4048 = vmatmul.mubr.bf16.gmra.mrb[80].mxu0 %v3340_v16  ;;  %v3236_v38 = vmax.f32 %v5608_v7, 0.0 }
 0x28d   : > { %v5611_v10 = vadd.f32 %v3091_v2, %v8167_v61  ;;  %v3237_v21 = vmax.f32 %v5609_v35, 0.0 }
 0x28e   : > { %v3240_v24 = vmax.f32 %v5610_v9, 0.0 }
 0x28f   : > { %v3241_v5 = vmax.f32 %v5611_v10, 0.0 }
 0x290   : > { %v3344_v6 = vpack.c.bf16 %v3240_v24, %v3236_v38 }
 0x291   : > { %v3345_v47 = vpack.c.bf16 %v3241_v5, %v3237_v21  ;;  %v3095_v42 = vpop.f32.mrb[56].mxu1 }
 0x292   : > { %v5612_v34 = vadd.f32 %v3095_v42, %v8164_v15  ;;  %v3097_v13 = vpop.f32.mrb[57].mxu1 }
 0x293   : > { %v5613_v20 = vadd.f32 %v3097_v13, %v8167_v61  ;;  %v3099_v22 = vpop.f32.mrb[58].mxu1  ;;  %4057 = vmatprep.mubr.bf16.mxu0 %v3345_v47 }
 0x294   : > { %v5614_v11 = vadd.f32 %v3099_v22, %v8164_v15  ;;  %v3101_v62 = vpop.f32.mrb[59].mxu1  ;;  %4058 = vmatmul.mubr.bf16.gmra.mrb[84].mxu0 %v3344_v6  ;;  %v3244_v46 = vmax.f32 %v5612_v34, 0.0 }
 0x295   : > { %v5615_v57 = vadd.f32 %v3101_v62, %v8167_v61  ;;  %v3245_v27 = vmax.f32 %v5613_v20, 0.0 }
 0x296   : > { %v3248_v28 = vmax.f32 %v5614_v11, 0.0 }
 0x297   : > { %v3249_v54 = vmax.f32 %v5615_v57, 0.0 }
 0x298   : > { %v3348_v48 = vpack.c.bf16 %v3248_v28, %v3244_v46 }
 0x299   : > { %v3349_v30 = vpack.c.bf16 %v3249_v54, %v3245_v27  ;;  %v3105_v8 = vpop.f32.mrb[60].mxu1 }
 0x29a   : > { %v5616_v40 = vadd.f32 %v3105_v8, %v8164_v15  ;;  %v3107_v50 = vpop.f32.mrb[61].mxu1 }
 0x29b   : > { %v5617_v43 = vadd.f32 %v3107_v50, %v8167_v61  ;;  %v3109_v41 = vpop.f32.mrb[62].mxu1  ;;  %4067 = vmatprep.mubr.bf16.mxu0 %v3349_v30 }
 0x29c   : > { %v5618_v12 = vadd.f32 %v3109_v41, %v8164_v15  ;;  %v3111_v52 = vpop.f32.mrb[63].mxu1  ;;  %4068 = vmatmul.mubr.bf16.gmra.mrb[88].mxu0 %v3348_v48  ;;  %v3252_v56 = vmax.f32 %v5616_v40, 0.0 }
 0x29d   : > { %v5619_v60 = vadd.f32 %v3111_v52, %v8167_v61  ;;  %v3253_v0 = vmax.f32 %v5617_v43, 0.0 }
 0x29e   : > { %v3256_v37 = vmax.f32 %v5618_v12, 0.0 }
 0x29f   : > { %v3257_v25 = vmax.f32 %v5619_v60, 0.0 }
 0x2a0   : > { %v3352_v55 = vpack.c.bf16 %v3256_v37, %v3252_v56 }
 0x2a1   : > { %v3353_v29 = vpack.c.bf16 %v3257_v25, %v3253_v0  ;;  %v3115_v18 = vpop.f32.mrb[64].mxu1 }
 0x2a2   : > { %v5620_v39 = vadd.f32 %v3115_v18, %v8164_v15  ;;  %v3117_v26 = vpop.f32.mrb[65].mxu1 }
 0x2a3   : > { %v5621_v36 = vadd.f32 %v3117_v26, %v8167_v61  ;;  %v3119_v33 = vpop.f32.mrb[66].mxu1  ;;  %4077 = vmatprep.mubr.bf16.mxu0 %v3353_v29 }
 0x2a4   : > { %v5622_v59 = vadd.f32 %v3119_v33, %v8164_v15  ;;  %v3121_v1 = vpop.f32.mrb[67].mxu1  ;;  %4078 = vmatmul.mubr.bf16.gmra.mrb[92].mxu0 %v3352_v55  ;;  %v3260_v51 = vmax.f32 %v5620_v39, 0.0 }
 0x2a5   : > { %v5623_v19 = vadd.f32 %v3121_v1, %v8167_v61  ;;  %v3261_v53 = vmax.f32 %v5621_v36, 0.0 }
 0x2a6   : > { %v3264_v23 = vmax.f32 %v5622_v59, 0.0 }
 0x2a7   : > { %v3265_v31 = vmax.f32 %v5623_v19, 0.0 }
 0x2a8   : > { %v3356_v4 = vpack.c.bf16 %v3264_v23, %v3260_v51 }
 0x2a9   : > { %v3357_v3 = vpack.c.bf16 %v3265_v31, %v3261_v53  ;;  %v3125_v44 = vpop.f32.mrb[68].mxu1 }
 0x2aa   : > { %v5624_v16 = vadd.f32 %v3125_v44, %v8164_v15  ;;  %v3127_v58 = vpop.f32.mrb[69].mxu1 }
 0x2ab   : > { %v5625_v49 = vadd.f32 %v3127_v58, %v8167_v61  ;;  %v3129_v7 = vpop.f32.mrb[70].mxu1  ;;  %4087 = vmatprep.mubr.bf16.mxu0 %v3357_v3 }
 0x2ac   : > { %v5626_v45 = vadd.f32 %v3129_v7, %v8164_v15  ;;  %v3131_v35 = vpop.f32.mrb[71].mxu1  ;;  %4088 = vmatmul.mubr.bf16.gmra.mrb[96].mxu0 %v3356_v4  ;;  %v3268_v9 = vmax.f32 %v5624_v16, 0.0 }
 0x2ad   : > { %v5627_v63 = vadd.f32 %v3131_v35, %v8167_v61  ;;  %v3269_v10 = vmax.f32 %v5625_v49, 0.0 }
 0x2ae   : > { %v3272_v2 = vmax.f32 %v5626_v45, 0.0 }
 0x2af   : > { %v3273_v38 = vmax.f32 %v5627_v63, 0.0 }
 0x2b0   : > { %v3360_v24 = vpack.c.bf16 %v3272_v2, %v3268_v9 }
 0x2b1   : > { %v3361_v21 = vpack.c.bf16 %v3273_v38, %v3269_v10  ;;  %v3135_v5 = vpop.f32.mrb[72].mxu1 }
 0x2b2   : > { %v5628_v6 = vadd.f32 %v3135_v5, %v8164_v15  ;;  %v3137_v47 = vpop.f32.mrb[73].mxu1 }
 0x2b3   : > { %v5629_v42 = vadd.f32 %v3137_v47, %v8167_v61  ;;  %v3139_v34 = vpop.f32.mrb[74].mxu1  ;;  %4097 = vmatprep.mubr.bf16.mxu0 %v3361_v21 }
 0x2b4   : > { %v5630_v13 = vadd.f32 %v3139_v34, %v8164_v15  ;;  %v3141_v20 = vpop.f32.mrb[75].mxu1  ;;  %4098 = vmatmul.mubr.bf16.gmra.mrb[100].mxu0 %v3360_v24  ;;  %v3276_v11 = vmax.f32 %v5628_v6, 0.0 }
 0x2b5   : > { %v5631_v22 = vadd.f32 %v3141_v20, %v8167_v61  ;;  %v3277_v57 = vmax.f32 %v5629_v42, 0.0 }
 0x2b6   : > { %v3280_v62 = vmax.f32 %v5630_v13, 0.0 }
 0x2b7   : > { %v3281_v46 = vmax.f32 %v5631_v22, 0.0 }
 0x2b8   : > { %v3364_v28 = vpack.c.bf16 %v3280_v62, %v3276_v11 }
 0x2b9   : > { %v3365_v27 = vpack.c.bf16 %v3281_v46, %v3277_v57  ;;  %v3145_v54 = vpop.f32.mrb[76].mxu1 }
 0x2ba   : > { %v5632_v48 = vadd.f32 %v3145_v54, %v8164_v15  ;;  %v3147_v30 = vpop.f32.mrb[77].mxu1 }
 0x2bb   : > { %v5633_v8 = vadd.f32 %v3147_v30, %v8167_v61  ;;  %v3149_v40 = vpop.f32.mrb[78].mxu1  ;;  %4107 = vmatprep.mubr.bf16.mxu0 %v3365_v27 }
 0x2bc   : > { %v5634_v50 = vadd.f32 %v3149_v40, %v8164_v15  ;;  %v3151_v43 = vpop.f32.mrb[79].mxu1  ;;  %4108 = vmatmul.mubr.bf16.gmra.mrb[104].mxu0 %v3364_v28  ;;  %v3284_v12 = vmax.f32 %v5632_v48, 0.0 }
 0x2bd   : > { %v5635_v41 = vadd.f32 %v3151_v43, %v8167_v61  ;;  %v3285_v60 = vmax.f32 %v5633_v8, 0.0 }
 0x2be   : > { %v3288_v52 = vmax.f32 %v5634_v50, 0.0 }
 0x2bf   : > { %v3289_v56 = vmax.f32 %v5635_v41, 0.0 }
 0x2c0   : > { %v3368_v37 = vpack.c.bf16 %v3288_v52, %v3284_v12 }
 0x2c1   : > { %v3369_v0 = vpack.c.bf16 %v3289_v56, %v3285_v60  ;;  %v3155_v25 = vpop.f32.mrb[80].mxu1  ;;  %v3450_v56 = vld [vmem:[%s8685_s4] sm:$0x3] }
 0x2c2   : > { %v5636_v55 = vadd.f32 %v3155_v25, %v8164_v15  ;;  %v3157_v29 = vpop.f32.mrb[81].mxu1 }
 0x2c3   : > { %v5637_v18 = vadd.f32 %v3157_v29, %v8167_v61  ;;  %v3159_v39 = vpop.f32.mrb[82].mxu1  ;;  %4117 = vmatprep.mubr.bf16.mxu0 %v3369_v0 }
 0x2c4   : > { %v5638_v26 = vadd.f32 %v3159_v39, %v8164_v15  ;;  %v3161_v36 = vpop.f32.mrb[83].mxu1  ;;  %4118 = vmatmul.mubr.bf16.gmra.mrb[108].mxu0 %v3368_v37  ;;  %v3292_v59 = vmax.f32 %v5636_v55, 0.0  ;;  %v8277_v37 = vrot.slane %v3450_v56, %v578_v17 }
 0x2c5   : > { %v5639_v33 = vadd.f32 %v3161_v36, %v8167_v61  ;;  %v3293_v19 = vmax.f32 %v5637_v18, 0.0 }
 0x2c6   : > { %v3296_v1 = vmax.f32 %v5638_v26, 0.0 }
 0x2c7   : > { %v3297_v51 = vmax.f32 %v5639_v33, 0.0 }
 0x2c8   : > { %v3372_v23 = vpack.c.bf16 %v3296_v1, %v3292_v59 }
 0x2c9   : > { %v3373_v53 = vpack.c.bf16 %v3297_v51, %v3293_v19  ;;  %v3165_v31 = vpop.f32.mrb[84].mxu1 }
 0x2ca   : > { %v5640_v4 = vadd.f32 %v3165_v31, %v8164_v15  ;;  %v3167_v3 = vpop.f32.mrb[85].mxu1 }
 0x2cb   : > { %v5641_v44 = vadd.f32 %v3167_v3, %v8167_v61  ;;  %v3169_v16 = vpop.f32.mrb[86].mxu1  ;;  %4127 = vmatprep.mubr.bf16.mxu0 %v3373_v53 }
 0x2cc   : > { %v5642_v58 = vadd.f32 %v3169_v16, %v8164_v15  ;;  %v3171_v49 = vpop.f32.mrb[87].mxu1  ;;  %4128 = vmatmul.mubr.bf16.gmra.mrb[112].mxu0 %v3372_v23  ;;  %v3300_v45 = vmax.f32 %v5640_v4, 0.0 }
 0x2cd   : > { %v5643_v7 = vadd.f32 %v3171_v49, %v8167_v61  ;;  %v3301_v63 = vmax.f32 %v5641_v44, 0.0 }
 0x2ce   : > { %v3304_v35 = vmax.f32 %v5642_v58, 0.0 }
 0x2cf   : > { %v3305_v9 = vmax.f32 %v5643_v7, 0.0 }
 0x2d0   : > { %v3376_v2 = vpack.c.bf16 %v3304_v35, %v3300_v45 }
 0x2d1   : > { %v3377_v10 = vpack.c.bf16 %v3305_v9, %v3301_v63  ;;  %v3175_v38 = vpop.f32.mrb[88].mxu1 }
 0x2d2   : > { %v5644_v24 = vadd.f32 %v3175_v38, %v8164_v15  ;;  %v3177_v21 = vpop.f32.mrb[89].mxu1 }
 0x2d3   : > { %v5645_v5 = vadd.f32 %v3177_v21, %v8167_v61  ;;  %v3179_v6 = vpop.f32.mrb[90].mxu1  ;;  %4137 = vmatprep.mubr.bf16.mxu0 %v3377_v10 }
 0x2d4   : > { %v5646_v47 = vadd.f32 %v3179_v6, %v8164_v15  ;;  %v3181_v42 = vpop.f32.mrb[91].mxu1  ;;  %4138 = vmatmul.mubr.bf16.gmra.mrb[116].mxu0 %v3376_v2  ;;  %v3308_v13 = vmax.f32 %v5644_v24, 0.0 }
 0x2d5   : > { %v5647_v34 = vadd.f32 %v3181_v42, %v8167_v61  ;;  %v3309_v22 = vmax.f32 %v5645_v5, 0.0 }
 0x2d6   : > { %v3312_v20 = vmax.f32 %v5646_v47, 0.0 }
 0x2d7   : > { %v3313_v11 = vmax.f32 %v5647_v34, 0.0 }
 0x2d8   : > { %v3380_v62 = vpack.c.bf16 %v3312_v20, %v3308_v13 }
 0x2d9   : > { %v3381_v57 = vpack.c.bf16 %v3313_v11, %v3309_v22  ;;  %v3185_v46 = vpop.f32.mrb[92].mxu1 }
 0x2da   : > { %v5648_v28 = vadd.f32 %v3185_v46, %v8164_v15  ;;  %v3187_v27 = vpop.f32.mrb[93].mxu1 }
 0x2db   : > { %v5649_v54 = vadd.f32 %v3187_v27, %v8167_v61  ;;  %v3189_v48 = vpop.f32.mrb[94].mxu1  ;;  %4147 = vmatprep.mubr.bf16.mxu0 %v3381_v57 }
 0x2dc   : > { %v5650_v30 = vadd.f32 %v3189_v48, %v8164_v15  ;;  %v3191_v8 = vpop.f32.mrb[95].mxu1  ;;  %4148 = vmatmul.mubr.bf16.gmra.mrb[120].mxu0 %v3380_v62  ;;  %v3316_v50 = vmax.f32 %v5648_v28, 0.0  ;;  %v8281_v15 = vrot.slane %v3450_v56, %v582_v32 }
 0x2dd   : > { %v5651_v40 = vadd.f32 %v3191_v8, %v8167_v61  ;;  %v3317_v41 = vmax.f32 %v5649_v54, 0.0 }
 0x2de   : > { %v3320_v43 = vmax.f32 %v5650_v30, 0.0 }
 0x2df   : > { %v3321_v12 = vmax.f32 %v5651_v40, 0.0 }
 0x2e0   : > { %v3384_v52 = vpack.c.bf16 %v3320_v43, %v3316_v50 }
 0x2e1   : > { %v3385_v60 = vpack.c.bf16 %v3321_v12, %v3317_v41 }
 0x2e3   : > { %4157 = vmatprep.mubr.bf16.mxu0 %v3385_v60 }
 0x2e4   : > { %4158 = vmatmul.mubr.bf16.gmra.mrb[124].mxu0 %v3384_v52 }
 0x33f   : > { %v4009_v61 = vpop.f32.mrb[64].mxu0 }
 0x340   : > { %v5652_v0 = vadd.f32 %v4009_v61, %v8277_v37  ;;  %v4011_v25 = vpop.f32.mrb[65].mxu0 }
 0x341   : > { %v5653_v55 = vadd.f32 %v4011_v25, %v8281_v15  ;;  %v4013_v29 = vpop.f32.mrb[66].mxu0 }
 0x342   : > { %v5654_v18 = vadd.f32 %v4013_v29, %v8277_v37  ;;  %v4015_v39 = vpop.f32.mrb[67].mxu0  ;;  %v4168_v36 = vmax.f32 %v5652_v0, 0.0 }
 0x343   : > { %v5655_v26 = vadd.f32 %v4015_v39, %v8281_v15  ;;  %v4169_v17 = vmax.f32 %v5653_v55, 0.0 }
 0x344   : > { %v4170_v33 = vmax.f32 %v5654_v18, 0.0 }
 0x345   : > { %v4171_v59 = vmax.f32 %v5655_v26, 0.0 }
 0x346   : > { %v4232_v1 = vpack.c.bf16 %v4170_v33, %v4168_v36 }
 0x347   : > { %v4233_v14 = vpack.c.bf16 %v4171_v59, %v4169_v17  ;;  %v4019_v32 = vpop.f32.mrb[68].mxu0 }
 0x348   : > { %v5656_v19 = vadd.f32 %v4019_v32, %v8277_v37  ;;  %v4021_v51 = vpop.f32.mrb[69].mxu0 }
 0x349   : > { %v5657_v23 = vadd.f32 %v4021_v51, %v8281_v15  ;;  %v4023_v53 = vpop.f32.mrb[70].mxu0  ;;  %4431 = vmatprep.mubr.bf16.mxu1 %v4233_v14 }
 0x34a   : > { %v5658_v31 = vadd.f32 %v4023_v53, %v8277_v37  ;;  %v4025_v4 = vpop.f32.mrb[71].mxu0  ;;  %4432 = vmatmul.mubr.bf16.vlgmr.msra.gmra.mrb[96].mxu1 %v4232_v1  ;;  %v4172_v44 = vmax.f32 %v5656_v19, 0.0 }
 0x34b   : > { %v5659_v3 = vadd.f32 %v4025_v4, %v8281_v15  ;;  %v4173_v58 = vmax.f32 %v5657_v23, 0.0 }
 0x34c   : > { %v4174_v16 = vmax.f32 %v5658_v31, 0.0 }
 0x34d   : > { %v4175_v49 = vmax.f32 %v5659_v3, 0.0 }
 0x34e   : > { %v4234_v7 = vpack.c.bf16 %v4174_v16, %v4172_v44 }
 0x34f   : > { %v4235_v45 = vpack.c.bf16 %v4175_v49, %v4173_v58  ;;  %v4029_v35 = vpop.f32.mrb[72].mxu0 }
 0x350   : > { %v5660_v63 = vadd.f32 %v4029_v35, %v8277_v37  ;;  %v4031_v9 = vpop.f32.mrb[73].mxu0 }
 0x351   : > { %v5661_v2 = vadd.f32 %v4031_v9, %v8281_v15  ;;  %v4033_v10 = vpop.f32.mrb[74].mxu0  ;;  %4439 = vmatprep.mubr.bf16.mxu1 %v4235_v45 }
 0x352   : > { %v5662_v38 = vadd.f32 %v4033_v10, %v8277_v37  ;;  %v4035_v24 = vpop.f32.mrb[75].mxu0  ;;  %4440 = vmatmul.mubr.bf16.gmra.mrb[100].mxu1 %v4234_v7  ;;  %v4176_v5 = vmax.f32 %v5660_v63, 0.0 }
 0x353   : > { %v5663_v21 = vadd.f32 %v4035_v24, %v8281_v15  ;;  %v4177_v47 = vmax.f32 %v5661_v2, 0.0 }
 0x354   : > { %v4178_v6 = vmax.f32 %v5662_v38, 0.0 }
 0x355   : > { %v4179_v42 = vmax.f32 %v5663_v21, 0.0 }
 0x356   : > { %v4236_v34 = vpack.c.bf16 %v4178_v6, %v4176_v5 }
 0x357   : > { %v4237_v13 = vpack.c.bf16 %v4179_v42, %v4177_v47  ;;  %v4039_v20 = vpop.f32.mrb[76].mxu0 }
 0x358   : > { %v5664_v22 = vadd.f32 %v4039_v20, %v8277_v37  ;;  %v4041_v11 = vpop.f32.mrb[77].mxu0 }
 0x359   : > { %v5665_v62 = vadd.f32 %v4041_v11, %v8281_v15  ;;  %v4043_v57 = vpop.f32.mrb[78].mxu0  ;;  %4447 = vmatprep.mubr.bf16.mxu1 %v4237_v13 }
 0x35a   : > { %v5666_v46 = vadd.f32 %v4043_v57, %v8277_v37  ;;  %v4045_v28 = vpop.f32.mrb[79].mxu0  ;;  %4448 = vmatmul.mubr.bf16.gmra.mrb[104].mxu1 %v4236_v34  ;;  %v4180_v54 = vmax.f32 %v5664_v22, 0.0 }
 0x35b   : > { %v5667_v27 = vadd.f32 %v4045_v28, %v8281_v15  ;;  %v4181_v30 = vmax.f32 %v5665_v62, 0.0 }
 0x35c   : > { %v4182_v48 = vmax.f32 %v5666_v46, 0.0 }
 0x35d   : > { %v4183_v8 = vmax.f32 %v5667_v27, 0.0 }
 0x35e   : > { %v4238_v40 = vpack.c.bf16 %v4182_v48, %v4180_v54 }
 0x35f   : > { %v4239_v50 = vpack.c.bf16 %v4183_v8, %v4181_v30  ;;  %v4049_v43 = vpop.f32.mrb[80].mxu0 }
 0x360   : > { %v5668_v41 = vadd.f32 %v4049_v43, %v8277_v37  ;;  %v4051_v12 = vpop.f32.mrb[81].mxu0 }
 0x361   : > { %v5669_v52 = vadd.f32 %v4051_v12, %v8281_v15  ;;  %v4053_v60 = vpop.f32.mrb[82].mxu0  ;;  %4455 = vmatprep.mubr.bf16.mxu1 %v4239_v50 }
 0x362   : > { %v5670_v56 = vadd.f32 %v4053_v60, %v8277_v37  ;;  %v4055_v61 = vpop.f32.mrb[83].mxu0  ;;  %4456 = vmatmul.mubr.bf16.gmra.mrb[108].mxu1 %v4238_v40  ;;  %v4184_v25 = vmax.f32 %v5668_v41, 0.0 }
 0x363   : > { %v5671_v0 = vadd.f32 %v4055_v61, %v8281_v15  ;;  %v4185_v29 = vmax.f32 %v5669_v52, 0.0 }
 0x364   : > { %v4186_v55 = vmax.f32 %v5670_v56, 0.0 }
 0x365   : > { %v4187_v18 = vmax.f32 %v5671_v0, 0.0 }
 0x366   : > { %v4240_v39 = vpack.c.bf16 %v4186_v55, %v4184_v25 }
 0x367   : > { %v4241_v26 = vpack.c.bf16 %v4187_v18, %v4185_v29  ;;  %v4059_v36 = vpop.f32.mrb[84].mxu0 }
 0x368   : > { %v5672_v33 = vadd.f32 %v4059_v36, %v8277_v37  ;;  %v4061_v17 = vpop.f32.mrb[85].mxu0 }
 0x369   : > { %v5673_v59 = vadd.f32 %v4061_v17, %v8281_v15  ;;  %v4063_v1 = vpop.f32.mrb[86].mxu0  ;;  %4463 = vmatprep.mubr.bf16.mxu1 %v4241_v26 }
 0x36a   : > { %v5674_v14 = vadd.f32 %v4063_v1, %v8277_v37  ;;  %v4065_v32 = vpop.f32.mrb[87].mxu0  ;;  %4464 = vmatmul.mubr.bf16.gmra.mrb[112].mxu1 %v4240_v39  ;;  %v4188_v51 = vmax.f32 %v5672_v33, 0.0 }
 0x36b   : > { %v5675_v19 = vadd.f32 %v4065_v32, %v8281_v15  ;;  %v4189_v53 = vmax.f32 %v5673_v59, 0.0 }
 0x36c   : > { %v4190_v23 = vmax.f32 %v5674_v14, 0.0 }
 0x36d   : > { %v4191_v31 = vmax.f32 %v5675_v19, 0.0 }
 0x36e   : > { %v4242_v4 = vpack.c.bf16 %v4190_v23, %v4188_v51 }
 0x36f   : > { %v4243_v3 = vpack.c.bf16 %v4191_v31, %v4189_v53  ;;  %v4069_v44 = vpop.f32.mrb[88].mxu0 }
 0x370   : > { %v5676_v16 = vadd.f32 %v4069_v44, %v8277_v37  ;;  %v4071_v58 = vpop.f32.mrb[89].mxu0 }
 0x371   : > { %v5677_v49 = vadd.f32 %v4071_v58, %v8281_v15  ;;  %v4073_v7 = vpop.f32.mrb[90].mxu0  ;;  %4471 = vmatprep.mubr.bf16.mxu1 %v4243_v3 }
 0x372   : > { %v5678_v45 = vadd.f32 %v4073_v7, %v8277_v37  ;;  %v4075_v35 = vpop.f32.mrb[91].mxu0  ;;  %4472 = vmatmul.mubr.bf16.gmra.mrb[116].mxu1 %v4242_v4  ;;  %v4192_v9 = vmax.f32 %v5676_v16, 0.0 }
 0x373   : > { %v5679_v63 = vadd.f32 %v4075_v35, %v8281_v15  ;;  %v4193_v10 = vmax.f32 %v5677_v49, 0.0 }
 0x374   : > { %v4194_v2 = vmax.f32 %v5678_v45, 0.0 }
 0x375   : > { %v4195_v38 = vmax.f32 %v5679_v63, 0.0 }
 0x376   : > { %v4244_v24 = vpack.c.bf16 %v4194_v2, %v4192_v9 }
 0x377   : > { %v4245_v21 = vpack.c.bf16 %v4195_v38, %v4193_v10  ;;  %v4079_v5 = vpop.f32.mrb[92].mxu0 }
 0x378   : > { %v5680_v6 = vadd.f32 %v4079_v5, %v8277_v37  ;;  %v4081_v47 = vpop.f32.mrb[93].mxu0 }
 0x379   : > { %v5681_v42 = vadd.f32 %v4081_v47, %v8281_v15  ;;  %v4083_v34 = vpop.f32.mrb[94].mxu0  ;;  %4479 = vmatprep.mubr.bf16.mxu1 %v4245_v21 }
 0x37a   : > { %v5682_v13 = vadd.f32 %v4083_v34, %v8277_v37  ;;  %v4085_v20 = vpop.f32.mrb[95].mxu0  ;;  %4480 = vmatmul.mubr.bf16.gmra.mrb[120].mxu1 %v4244_v24  ;;  %v4196_v11 = vmax.f32 %v5680_v6, 0.0 }
 0x37b   : > { %v5683_v22 = vadd.f32 %v4085_v20, %v8281_v15  ;;  %v4197_v57 = vmax.f32 %v5681_v42, 0.0 }
 0x37c   : > { %v4198_v62 = vmax.f32 %v5682_v13, 0.0 }
 0x37d   : > { %v4199_v46 = vmax.f32 %v5683_v22, 0.0 }
 0x37e   : > { %v4246_v28 = vpack.c.bf16 %v4198_v62, %v4196_v11 }
 0x37f   : > { %v4247_v27 = vpack.c.bf16 %v4199_v46, %v4197_v57  ;;  %v4089_v54 = vpop.f32.mrb[96].mxu0 }
 0x380   : > { %v5684_v48 = vadd.f32 %v4089_v54, %v8277_v37  ;;  %v4091_v30 = vpop.f32.mrb[97].mxu0 }
 0x381   : > { %v5685_v8 = vadd.f32 %v4091_v30, %v8281_v15  ;;  %v4093_v40 = vpop.f32.mrb[98].mxu0  ;;  %4487 = vmatprep.mubr.bf16.mxu1 %v4247_v27 }
 0x382   : > { %v5686_v50 = vadd.f32 %v4093_v40, %v8277_v37  ;;  %v4095_v43 = vpop.f32.mrb[99].mxu0  ;;  %4488 = vmatmul.mubr.bf16.gmra.mrb[124].mxu1 %v4246_v28  ;;  %v4200_v12 = vmax.f32 %v5684_v48, 0.0 }
 0x383   : > { %v5687_v41 = vadd.f32 %v4095_v43, %v8281_v15  ;;  %v4201_v60 = vmax.f32 %v5685_v8, 0.0 }
 0x384   : > { %v4202_v52 = vmax.f32 %v5686_v50, 0.0 }
 0x385   : > { %v4203_v56 = vmax.f32 %v5687_v41, 0.0 }
 0x386   : > { %v4248_v61 = vpack.c.bf16 %v4202_v52, %v4200_v12 }
 0x387   : > { %v4249_v0 = vpack.c.bf16 %v4203_v56, %v4201_v60  ;;  %v4099_v25 = vpop.f32.mrb[100].mxu0 }
 0x388   : > { %v5688_v55 = vadd.f32 %v4099_v25, %v8277_v37  ;;  %v4101_v29 = vpop.f32.mrb[101].mxu0 }
 0x389   : > { %v5689_v18 = vadd.f32 %v4101_v29, %v8281_v15  ;;  %v4103_v39 = vpop.f32.mrb[102].mxu0  ;;  %4495 = vmatprep.mubr.bf16.mxu1 %v4249_v0 }
 0x38a   : > { %v5690_v26 = vadd.f32 %v4103_v39, %v8277_v37  ;;  %v4105_v36 = vpop.f32.mrb[103].mxu0  ;;  %4496 = vmatmul.mubr.bf16.gmra.mrb[128].mxu1 %v4248_v61  ;;  %v4204_v17 = vmax.f32 %v5688_v55, 0.0 }
 0x38b   : > { %v5691_v33 = vadd.f32 %v4105_v36, %v8281_v15  ;;  %v4205_v1 = vmax.f32 %v5689_v18, 0.0 }
 0x38c   : > { %v4206_v59 = vmax.f32 %v5690_v26, 0.0 }
 0x38d   : > { %v4207_v14 = vmax.f32 %v5691_v33, 0.0 }
 0x38e   : > { %v4250_v32 = vpack.c.bf16 %v4206_v59, %v4204_v17 }
 0x38f   : > { %v4251_v19 = vpack.c.bf16 %v4207_v14, %v4205_v1  ;;  %v4109_v51 = vpop.f32.mrb[104].mxu0 }
 0x390   : > { %v5692_v23 = vadd.f32 %v4109_v51, %v8277_v37  ;;  %v4111_v53 = vpop.f32.mrb[105].mxu0 }
 0x391   : > { %v5693_v31 = vadd.f32 %v4111_v53, %v8281_v15  ;;  %v4113_v4 = vpop.f32.mrb[106].mxu0  ;;  %4503 = vmatprep.mubr.bf16.mxu1 %v4251_v19 }
 0x392   : > { %v5694_v3 = vadd.f32 %v4113_v4, %v8277_v37  ;;  %v4115_v44 = vpop.f32.mrb[107].mxu0  ;;  %4504 = vmatmul.mubr.bf16.gmra.mrb[132].mxu1 %v4250_v32  ;;  %v4208_v58 = vmax.f32 %v5692_v23, 0.0 }
 0x393   : > { %v5695_v16 = vadd.f32 %v4115_v44, %v8281_v15  ;;  %v4209_v7 = vmax.f32 %v5693_v31, 0.0 }
 0x394   : > { %v4210_v49 = vmax.f32 %v5694_v3, 0.0 }
 0x395   : > { %v4211_v45 = vmax.f32 %v5695_v16, 0.0 }
 0x396   : > { %v4252_v35 = vpack.c.bf16 %v4210_v49, %v4208_v58 }
 0x397   : > { %v4253_v63 = vpack.c.bf16 %v4211_v45, %v4209_v7  ;;  %v4119_v9 = vpop.f32.mrb[108].mxu0 }
 0x398   : > { %v5696_v2 = vadd.f32 %v4119_v9, %v8277_v37  ;;  %v4121_v10 = vpop.f32.mrb[109].mxu0 }
 0x399   : > { %v5697_v38 = vadd.f32 %v4121_v10, %v8281_v15  ;;  %v4123_v24 = vpop.f32.mrb[110].mxu0  ;;  %4511 = vmatprep.mubr.bf16.mxu1 %v4253_v63 }
 0x39a   : > { %v5698_v21 = vadd.f32 %v4123_v24, %v8277_v37  ;;  %v4125_v5 = vpop.f32.mrb[111].mxu0  ;;  %4512 = vmatmul.mubr.bf16.gmra.mrb[136].mxu1 %v4252_v35  ;;  %v4212_v47 = vmax.f32 %v5696_v2, 0.0 }
 0x39b   : > { %v5699_v6 = vadd.f32 %v4125_v5, %v8281_v15  ;;  %v4213_v34 = vmax.f32 %v5697_v38, 0.0 }
 0x39c   : > { %v4214_v42 = vmax.f32 %v5698_v21, 0.0 }
 0x39d   : > { %v4215_v13 = vmax.f32 %v5699_v6, 0.0 }
 0x39e   : > { %v4254_v20 = vpack.c.bf16 %v4214_v42, %v4212_v47 }
 0x39f   : > { %v4255_v22 = vpack.c.bf16 %v4215_v13, %v4213_v34  ;;  %v4129_v11 = vpop.f32.mrb[112].mxu0  ;;  %v8350_v34 = vld [vmem:[%s8687_s6] ss:$0 sm:$0xff] }
 0x3a0   : > { %v5700_v62 = vadd.f32 %v4129_v11, %v8277_v37  ;;  %v4131_v57 = vpop.f32.mrb[113].mxu0 }
 0x3a1   : > { %v5701_v46 = vadd.f32 %v4131_v57, %v8281_v15  ;;  %v4133_v28 = vpop.f32.mrb[114].mxu0  ;;  %4519 = vmatprep.mubr.bf16.mxu1 %v4255_v22 }
 0x3a2   : > { %v5702_v27 = vadd.f32 %v4133_v28, %v8277_v37  ;;  %v4135_v54 = vpop.f32.mrb[115].mxu0  ;;  %4520 = vmatmul.mubr.bf16.gmra.mrb[140].mxu1 %v4254_v20  ;;  %v4216_v30 = vmax.f32 %v5700_v62, 0.0 }
 0x3a3   : > { %v5703_v48 = vadd.f32 %v4135_v54, %v8281_v15  ;;  %v4217_v40 = vmax.f32 %v5701_v46, 0.0 }
 0x3a4   : > { %v4218_v8 = vmax.f32 %v5702_v27, 0.0 }
 0x3a5   : > { %v4219_v50 = vmax.f32 %v5703_v48, 0.0 }
 0x3a6   : > { %v4256_v43 = vpack.c.bf16 %v4218_v8, %v4216_v30 }
 0x3a7   : > { %v4257_v41 = vpack.c.bf16 %v4219_v50, %v4217_v40  ;;  %v4139_v12 = vpop.f32.mrb[116].mxu0 }
 0x3a8   : > { %v5704_v52 = vadd.f32 %v4139_v12, %v8277_v37  ;;  %v4141_v60 = vpop.f32.mrb[117].mxu0 }
 0x3a9   : > { %v5705_v56 = vadd.f32 %v4141_v60, %v8281_v15  ;;  %v4143_v61 = vpop.f32.mrb[118].mxu0  ;;  %4527 = vmatprep.mubr.bf16.mxu1 %v4257_v41 }
 0x3aa   : > { %v5706_v0 = vadd.f32 %v4143_v61, %v8277_v37  ;;  %v4145_v25 = vpop.f32.mrb[119].mxu0  ;;  %4528 = vmatmul.mubr.bf16.gmra.mrb[144].mxu1 %v4256_v43  ;;  %v4220_v29 = vmax.f32 %v5704_v52, 0.0 }
 0x3ab   : > { %v5707_v55 = vadd.f32 %v4145_v25, %v8281_v15  ;;  %v4221_v39 = vmax.f32 %v5705_v56, 0.0 }
 0x3ac   : > { %v4222_v18 = vmax.f32 %v5706_v0, 0.0 }
 0x3ad   : > { %v4223_v26 = vmax.f32 %v5707_v55, 0.0 }
 0x3ae   : > { %v4258_v36 = vpack.c.bf16 %v4222_v18, %v4220_v29 }
 0x3af   : > { %v4259_v33 = vpack.c.bf16 %v4223_v26, %v4221_v39  ;;  %v4149_v17 = vpop.f32.mrb[120].mxu0 }
 0x3b0   : > { %v5708_v59 = vadd.f32 %v4149_v17, %v8277_v37  ;;  %v4151_v1 = vpop.f32.mrb[121].mxu0 }
 0x3b1   : > { %v5709_v14 = vadd.f32 %v4151_v1, %v8281_v15  ;;  %v4153_v32 = vpop.f32.mrb[122].mxu0  ;;  %4535 = vmatprep.mubr.bf16.mxu1 %v4259_v33 }
 0x3b2   : > { %v5710_v19 = vadd.f32 %v4153_v32, %v8277_v37  ;;  %v4155_v51 = vpop.f32.mrb[123].mxu0  ;;  %4536 = vmatmul.mubr.bf16.gmra.mrb[148].mxu1 %v4258_v36  ;;  %v4224_v53 = vmax.f32 %v5708_v59, 0.0 }
 0x3b3   : > { %v5711_v23 = vadd.f32 %v4155_v51, %v8281_v15  ;;  %v4225_v4 = vmax.f32 %v5709_v14, 0.0 }
 0x3b4   : > { %v4226_v31 = vmax.f32 %v5710_v19, 0.0 }
 0x3b5   : > { %v4227_v3 = vmax.f32 %v5711_v23, 0.0 }
 0x3b6   : > { %v4260_v44 = vpack.c.bf16 %v4226_v31, %v4224_v53 }
 0x3b7   : > { %v4261_v16 = vpack.c.bf16 %v4227_v3, %v4225_v4  ;;  %v4159_v58 = vpop.f32.mrb[124].mxu0 }
 0x3b8   : > { %v5712_v49 = vadd.f32 %v4159_v58, %v8277_v37  ;;  %v4161_v7 = vpop.f32.mrb[125].mxu0 }
 0x3b9   : > { %v5713_v45 = vadd.f32 %v4161_v7, %v8281_v15  ;;  %v4163_v35 = vpop.f32.mrb[126].mxu0  ;;  %4543 = vmatprep.mubr.bf16.mxu1 %v4261_v16 }
 0x3ba   : > { %v5714_v63 = vadd.f32 %v4163_v35, %v8277_v37  ;;  %v4165_v9 = vpop.f32.mrb[127].mxu0  ;;  %4544 = vmatmul.mubr.bf16.gmra.mrb[152].mxu1 %v4260_v44  ;;  %v4228_v10 = vmax.f32 %v5712_v49, 0.0 }
 0x3bb   : > { %v5715_v2 = vadd.f32 %v4165_v9, %v8281_v15  ;;  %v4229_v24 = vmax.f32 %v5713_v45, 0.0 }
 0x3bc   : > { %v4230_v38 = vmax.f32 %v5714_v63, 0.0 }
 0x3bd   : > { %v4231_v21 = vmax.f32 %v5715_v2, 0.0 }
 0x3be   : > { %v4262_v5 = vpack.c.bf16 %v4230_v38, %v4228_v10 }
 0x3bf   : > { %v4263_v6 = vpack.c.bf16 %v4231_v21, %v4229_v24 }
 0x3c1   : > { %4551 = vmatprep.mubr.bf16.mxu1 %v4263_v6 }
 0x3c2   : > { %4552 = vmatmul.mubr.bf16.gmra.mrb[156].mxu1 %v4262_v5 }
 0x41d   : > { %v5364_v47 = vpop.f32.mrb[96].mxu1 }
 0x41e   : > { %v5365_v42 = vpop.f32.mrb[97].mxu1 }
 0x41f   : > { %v5366_v37 = vadd.f32 %v5365_v42, %v5364_v47  ;;  %v5367_v13 = vpop.f32.mrb[98].mxu1 }
 0x420   : > { %v5368_v20 = vpop.f32.mrb[99].mxu1 }
 0x421   : > { %v5369_v22 = vadd.f32 %v5368_v20, %v5367_v13  ;;  %v8353_v15 = vadd.f32 %v5366_v37, %v8350_v34 }
 0x423   : > { %4560 = vmax.xlane.f32.xlu0 %v8353_v15  ;;  %v8357_v62 = vadd.f32 %v5369_v22, %v8350_v34 }
 0x425   : > { %v5370_v11 = vpop.f32.mrb[100].mxu1 }
 0x426   : > { %v5371_v57 = vpop.f32.mrb[101].mxu1 }
 0x427   : > { %v5372_v46 = vadd.f32 %v5371_v57, %v5370_v11  ;;  %v5373_v28 = vpop.f32.mrb[102].mxu1  ;;  %4562 = vmax.xlane.f32.xlu0 %v8357_v62 }
 0x428   : > { %v5374_v27 = vpop.f32.mrb[103].mxu1 }
 0x429   : > { %v5375_v54 = vadd.f32 %v5374_v27, %v5373_v28  ;;  %v8361_v48 = vadd.f32 %v5372_v46, %v8350_v34 }
 0x42b   : > { %4564 = vmax.xlane.f32.xlu1 %v8361_v48  ;;  %v8365_v8 = vadd.f32 %v5375_v54, %v8350_v34 }
 0x42d   : > { %v5376_v30 = vpop.f32.mrb[104].mxu1 }
 0x42e   : > { %v5377_v40 = vpop.f32.mrb[105].mxu1 }
 0x42f   : > { %v5378_v50 = vadd.f32 %v5377_v40, %v5376_v30  ;;  %v5379_v43 = vpop.f32.mrb[106].mxu1  ;;  %4566 = vmax.xlane.f32.xlu1 %v8365_v8 }
 0x430   : > { %v5380_v41 = vpop.f32.mrb[107].mxu1 }
 0x431   : > { %v5381_v12 = vadd.f32 %v5380_v41, %v5379_v43  ;;  %v8369_v52 = vadd.f32 %v5378_v50, %v8350_v34 }
 0x433   : > { %4568 = vmax.xlane.f32.xlu0 %v8369_v52  ;;  %v8373_v60 = vadd.f32 %v5381_v12, %v8350_v34 }
 0x435   : > { %v5382_v56 = vpop.f32.mrb[108].mxu1  ;;  %4570 = vmax.xlane.f32.xlu1 %v8373_v60 }
 0x436   : > { %v5383_v61 = vpop.f32.mrb[109].mxu1 }
 0x437   : > { %v5384_v0 = vadd.f32 %v5383_v61, %v5382_v56  ;;  %v5385_v25 = vpop.f32.mrb[110].mxu1 }
 0x438   : > { %v5386_v55 = vpop.f32.mrb[111].mxu1 }
 0x439   : > { %v5387_v29 = vadd.f32 %v5386_v55, %v5385_v25  ;;  %v8377_v18 = vadd.f32 %v5384_v0, %v8350_v34 }
 0x43b   : > { %4572 = vmax.xlane.f32.xlu0 %v8377_v18  ;;  %v8381_v39 = vadd.f32 %v5387_v29, %v8350_v34 }
 0x43d   : > { %v5388_v26 = vpop.f32.mrb[112].mxu1  ;;  %4574 = vmax.xlane.f32.xlu1 %v8381_v39 }
 0x43e   : > { %v5389_v36 = vpop.f32.mrb[113].mxu1 }
 0x43f   : > { %v5390_v33 = vadd.f32 %v5389_v36, %v5388_v26  ;;  %v5391_v17 = vpop.f32.mrb[114].mxu1 }
 0x440   : > { %v5392_v59 = vpop.f32.mrb[115].mxu1 }
 0x441   : > { %v5393_v1 = vadd.f32 %v5392_v59, %v5391_v17  ;;  %v8385_v14 = vadd.f32 %v5390_v33, %v8350_v34 }
 0x443   : > { %4576 = vmax.xlane.f32.xlu0 %v8385_v14  ;;  %v8389_v32 = vadd.f32 %v5393_v1, %v8350_v34 }
 0x445   : > { %v5394_v19 = vpop.f32.mrb[116].mxu1  ;;  %4578 = vmax.xlane.f32.xlu1 %v8389_v32 }
 0x446   : > { %v5395_v51 = vpop.f32.mrb[117].mxu1 }
 0x447   : > { %v5396_v23 = vadd.f32 %v5395_v51, %v5394_v19  ;;  %v5397_v53 = vpop.f32.mrb[118].mxu1 }
 0x448   : > { %v5398_v31 = vpop.f32.mrb[119].mxu1 }
 0x449   : > { %v5399_v4 = vadd.f32 %v5398_v31, %v5397_v53  ;;  %v8393_v3 = vadd.f32 %v5396_v23, %v8350_v34 }
 0x44b   : > { %4580 = vmax.xlane.f32.xlu0 %v8393_v3  ;;  %v8397_v44 = vadd.f32 %v5399_v4, %v8350_v34 }
 0x44d   : > { %v5400_v16 = vpop.f32.mrb[120].mxu1  ;;  %4582 = vmax.xlane.f32.xlu1 %v8397_v44 }
 0x44e   : > { %v5401_v58 = vpop.f32.mrb[121].mxu1 }
 0x44f   : > { %v5402_v49 = vadd.f32 %v5401_v58, %v5400_v16  ;;  %v5403_v7 = vpop.f32.mrb[122].mxu1 }
 0x450   : > { %v5404_v45 = vpop.f32.mrb[123].mxu1 }
 0x451   : > { %v5405_v35 = vadd.f32 %v5404_v45, %v5403_v7  ;;  %v8401_v63 = vadd.f32 %v5402_v49, %v8350_v34 }
 0x453   : > { %4584 = vmax.xlane.f32.xlu0 %v8401_v63  ;;  %v8405_v9 = vadd.f32 %v5405_v35, %v8350_v34 }
 0x455   : > { %v5406_v2 = vpop.f32.mrb[124].mxu1  ;;  %4586 = vmax.xlane.f32.xlu1 %v8405_v9 }
 0x456   : > { %v5407_v10 = vpop.f32.mrb[125].mxu1 }
 0x457   : > { %v5408_v38 = vadd.f32 %v5407_v10, %v5406_v2  ;;  %v5409_v24 = vpop.f32.mrb[126].mxu1 }
 0x458   : > { %v5410_v21 = vpop.f32.mrb[127].mxu1 }
 0x459   : > { %v5411_v5 = vadd.f32 %v5410_v21, %v5409_v24  ;;  %v8409_v6 = vadd.f32 %v5408_v38, %v8350_v34 }
 0x45b   : > { %4588 = vmax.xlane.f32.xlu0 %v8409_v6  ;;  %v8413_v47 = vadd.f32 %v5411_v5, %v8350_v34 }
 0x45d   : > { %v5412_v42 = vpop.f32.mrb[128].mxu1  ;;  %4590 = vmax.xlane.f32.xlu1 %v8413_v47 }
 0x45e   : > { %v5413_v37 = vpop.f32.mrb[129].mxu1 }
 0x45f   : > { %v5414_v13 = vadd.f32 %v5413_v37, %v5412_v42  ;;  %v5415_v20 = vpop.f32.mrb[130].mxu1 }
 0x460   : > { %v5416_v22 = vpop.f32.mrb[131].mxu1 }
 0x461   : > { %v5417_v11 = vadd.f32 %v5416_v22, %v5415_v20  ;;  %v8417_v57 = vadd.f32 %v5414_v13, %v8350_v34 }
 0x463   : > { %4592 = vmax.xlane.f32.xlu0 %v8417_v57  ;;  %v8421_v46 = vadd.f32 %v5417_v11, %v8350_v34 }
 0x465   : > { %v5418_v28 = vpop.f32.mrb[132].mxu1  ;;  %4594 = vmax.xlane.f32.xlu1 %v8421_v46 }
 0x466   : > { %v5419_v27 = vpop.f32.mrb[133].mxu1 }
 0x467   : > { %v5420_v54 = vadd.f32 %v5419_v27, %v5418_v28  ;;  %v5421_v30 = vpop.f32.mrb[134].mxu1 }
 0x468   : > { %v5422_v40 = vpop.f32.mrb[135].mxu1 }
 0x469   : > { %v5423_v50 = vadd.f32 %v5422_v40, %v5421_v30  ;;  %v8425_v43 = vadd.f32 %v5420_v54, %v8350_v34 }
 0x46b   : > { %4596 = vmax.xlane.f32.xlu0 %v8425_v43  ;;  %v8429_v41 = vadd.f32 %v5423_v50, %v8350_v34 }
 0x46d   : > { %v5424_v12 = vpop.f32.mrb[136].mxu1  ;;  %4598 = vmax.xlane.f32.xlu1 %v8429_v41 }
 0x46e   : > { %v5425_v56 = vpop.f32.mrb[137].mxu1 }
 0x46f   : > { %v5426_v61 = vadd.f32 %v5425_v56, %v5424_v12  ;;  %v5427_v0 = vpop.f32.mrb[138].mxu1 }
 0x470   : > { %v5428_v25 = vpop.f32.mrb[139].mxu1 }
 0x471   : > { %v5429_v55 = vadd.f32 %v5428_v25, %v5427_v0  ;;  %v8433_v29 = vadd.f32 %v5426_v61, %v8350_v34 }
 0x473   : > { %4600 = vmax.xlane.f32.xlu0 %v8433_v29  ;;  %v8437_v26 = vadd.f32 %v5429_v55, %v8350_v34 }
 0x475   : > { %v5430_v36 = vpop.f32.mrb[140].mxu1  ;;  %4602 = vmax.xlane.f32.xlu1 %v8437_v26 }
 0x476   : > { %v5431_v33 = vpop.f32.mrb[141].mxu1 }
 0x477   : > { %v5432_v17 = vadd.f32 %v5431_v33, %v5430_v36  ;;  %v5433_v59 = vpop.f32.mrb[142].mxu1 }
 0x478   : > { %v5434_v1 = vpop.f32.mrb[143].mxu1 }
 0x479   : > { %v5435_v19 = vadd.f32 %v5434_v1, %v5433_v59  ;;  %v8441_v51 = vadd.f32 %v5432_v17, %v8350_v34 }
 0x47b   : > { %4604 = vmax.xlane.f32.xlu0 %v8441_v51  ;;  %v8445_v23 = vadd.f32 %v5435_v19, %v8350_v34 }
 0x47d   : > { %v5436_v53 = vpop.f32.mrb[144].mxu1  ;;  %4606 = vmax.xlane.f32.xlu1 %v8445_v23 }
 0x47e   : > { %v5437_v31 = vpop.f32.mrb[145].mxu1 }
 0x47f   : > { %v5438_v4 = vadd.f32 %v5437_v31, %v5436_v53  ;;  %v5439_v16 = vpop.f32.mrb[146].mxu1 }
 0x480   : > { %v5440_v58 = vpop.f32.mrb[147].mxu1 }
 0x481   : > { %v5441_v49 = vadd.f32 %v5440_v58, %v5439_v16  ;;  %v8449_v7 = vadd.f32 %v5438_v4, %v8350_v34 }
 0x483   : > { %4608 = vmax.xlane.f32.xlu0 %v8449_v7  ;;  %v8453_v45 = vadd.f32 %v5441_v49, %v8350_v34 }
 0x485   : > { %v5442_v35 = vpop.f32.mrb[148].mxu1  ;;  %4610 = vmax.xlane.f32.xlu1 %v8453_v45 }
 0x486   : > { %v5443_v2 = vpop.f32.mrb[149].mxu1 }
 0x487   : > { %v5444_v10 = vadd.f32 %v5443_v2, %v5442_v35  ;;  %v5445_v38 = vpop.f32.mrb[150].mxu1 }
 0x488   : > { %v5446_v24 = vpop.f32.mrb[151].mxu1 }
 0x489   : > { %v5447_v21 = vadd.f32 %v5446_v24, %v5445_v38  ;;  %v8457_v5 = vadd.f32 %v5444_v10, %v8350_v34 }
 0x48b   : > { %4612 = vmax.xlane.f32.xlu0 %v8457_v5  ;;  %v8461_v42 = vadd.f32 %v5447_v21, %v8350_v34 }
 0x48d   : > { %v5448_v37 = vpop.f32.mrb[152].mxu1  ;;  %4614 = vmax.xlane.f32.xlu1 %v8461_v42 }
 0x48e   : > { %v5449_v13 = vpop.f32.mrb[153].mxu1 }
 0x48f   : > { %v5450_v20 = vadd.f32 %v5449_v13, %v5448_v37  ;;  %v5451_v22 = vpop.f32.mrb[154].mxu1 }
 0x490   : > { %v5452_v11 = vpop.f32.mrb[155].mxu1 }
 0x491   : > { %v5453_v28 = vadd.f32 %v5452_v11, %v5451_v22  ;;  %v8465_v27 = vadd.f32 %v5450_v20, %v8350_v34 }
 0x493   : > { %4616 = vmax.xlane.f32.xlu0 %v8465_v27  ;;  %v8469_v54 = vadd.f32 %v5453_v28, %v8350_v34 }
 0x495   : > { %v5454_v30 = vpop.f32.mrb[156].mxu1  ;;  %4618 = vmax.xlane.f32.xlu1 %v8469_v54 }
 0x496   : > { %v5455_v40 = vpop.f32.mrb[157].mxu1 }
 0x497   : > { %v5456_v50 = vadd.f32 %v5455_v40, %v5454_v30  ;;  %v5457_v12 = vpop.f32.mrb[158].mxu1 }
 0x498   : > { %v5458_v56 = vpop.f32.mrb[159].mxu1 }
 0x499   : > { %v5459_v61 = vadd.f32 %v5458_v56, %v5457_v12  ;;  %v8473_v0 = vadd.f32 %v5456_v50, %v8350_v34 }
 0x49b   : > { %4620 = vmax.xlane.f32.xlu0 %v8473_v0  ;;  %v8477_v25 = vadd.f32 %v5459_v61, %v8350_v34 }
 0x49d   : > { %4622 = vmax.xlane.f32.xlu1 %v8477_v25 }
 0x4b0   : > { %v4561_v55 = vpop.xlane.xlu0 %4560 }
 0x4b1   : > { %v8481_v36 = vsub.f32 %v8353_v15, %v4561_v55 }
 0x4b3   : > { %v4656_v33 = vmul.f32 1.442695, %v8481_v36 }
 0x4b4   : > { %v4563_v17 = vpop.xlane.xlu0 %4562 }
 0x4b5   : > { %6557 = vpow2.f32 %v4656_v33  ;;  %v8485_v59 = vsub.f32 %v8357_v62, %v4563_v17 }
 0x4b7   : > { %v4658_v1 = vmul.f32 1.442695, %v8485_v59 }
 0x4b8   : > { %v4565_v19 = vpop.xlane.xlu1 %4564 }
 0x4b9   : > { %6559 = vpow2.f32 %v4658_v1  ;;  %v8489_v34 = vsub.f32 %v8361_v48, %v4565_v19 }
 0x4bb   : > { %v4660_v53 = vmul.f32 1.442695, %v8489_v34 }
 0x4bc   : > { %v4567_v31 = vpop.xlane.xlu1 %4566 }
 0x4bd   : > { %6561 = vpow2.f32 %v4660_v53  ;;  %v8493_v15 = vsub.f32 %v8365_v8, %v4567_v31 }
 0x4bf   : > { %v6558_v4 = vpop.eup %6557  ;;  %v4662_v16 = vmul.f32 1.442695, %v8493_v15 }
 0x4c0   : > { %4720 = vadd.xlane.f32.xlu0 %v6558_v4  ;;  %v4569_v62 = vpop.xlane.xlu0 %4568 }
 0x4c1   : > { %6563 = vpow2.f32 %v4662_v16  ;;  %v8497_v58 = vsub.f32 %v8369_v52, %v4569_v62 }
 0x4c2   : > { %v4571_v49 = vpop.xlane.xlu1 %4570 }
 0x4c3   : > { %v6560_v35 = vpop.eup %6559  ;;  %v4664_v48 = vmul.f32 1.442695, %v8497_v58  ;;  %v8501_v2 = vsub.f32 %v8373_v60, %v4571_v49 }
 0x4c4   : > { %4722 = vadd.xlane.f32.xlu1 %v6560_v35 }
 0x4c5   : > { %6565 = vpow2.f32 %v4664_v48  ;;  %v4666_v8 = vmul.f32 1.442695, %v8501_v2 }
 0x4c7   : > { %v6562_v10 = vpop.eup %6561  ;;  %6567 = vpow2.f32 %v4666_v8 }
 0x4c8   : > { %4724 = vadd.xlane.f32.xlu0 %v6562_v10  ;;  %v4573_v38 = vpop.xlane.xlu0 %4572 }
 0x4c9   : > { %v8505_v24 = vsub.f32 %v8377_v18, %v4573_v38 }
 0x4ca   : > { %v4575_v52 = vpop.xlane.xlu1 %4574 }
 0x4cb   : > { %v6564_v21 = vpop.eup %6563  ;;  %v4668_v37 = vmul.f32 1.442695, %v8505_v24  ;;  %v8509_v13 = vsub.f32 %v8381_v39, %v4575_v52 }
 0x4cc   : > { %4726 = vadd.xlane.f32.xlu1 %v6564_v21 }
 0x4cd   : > { %6569 = vpow2.f32 %v4668_v37  ;;  %v4670_v60 = vmul.f32 1.442695, %v8509_v13 }
 0x4cf   : > { %v6566_v20 = vpop.eup %6565  ;;  %6571 = vpow2.f32 %v4670_v60 }
 0x4d0   : > { %4728 = vadd.xlane.f32.xlu0 %v6566_v20  ;;  %v4577_v22 = vpop.xlane.xlu0 %4576 }
 0x4d1   : > { %v6568_v11 = vpop.eup %6567  ;;  %v8513_v28 = vsub.f32 %v8385_v14, %v4577_v22 }
 0x4d2   : > { %v4579_v18 = vpop.xlane.xlu1 %4578  ;;  %4730 = vadd.xlane.f32.xlu1 %v6568_v11 }
 0x4d3   : > { %v4672_v30 = vmul.f32 1.442695, %v8513_v28  ;;  %v8517_v40 = vsub.f32 %v8389_v32, %v4579_v18 }
 0x4d5   : > { %6573 = vpow2.f32 %v4672_v30  ;;  %v4674_v39 = vmul.f32 1.442695, %v8517_v40 }
 0x4d7   : > { %v6570_v50 = vpop.eup %6569  ;;  %6575 = vpow2.f32 %v4674_v39 }
 0x4d8   : > { %4732 = vadd.xlane.f32.xlu0 %v6570_v50  ;;  %v4581_v12 = vpop.xlane.xlu0 %4580 }
 0x4d9   : > { %v6572_v56 = vpop.eup %6571  ;;  %v8521_v61 = vsub.f32 %v8393_v3, %v4581_v12 }
 0x4da   : > { %v4583_v14 = vpop.xlane.xlu1 %4582  ;;  %4734 = vadd.xlane.f32.xlu1 %v6572_v56 }
 0x4db   : > { %v4676_v55 = vmul.f32 1.442695, %v8521_v61  ;;  %v8525_v33 = vsub.f32 %v8397_v44, %v4583_v14 }
 0x4dd   : > { %6577 = vpow2.f32 %v4676_v55  ;;  %v4678_v32 = vmul.f32 1.442695, %v8525_v33 }
 0x4df   : > { %v6574_v17 = vpop.eup %6573  ;;  %6579 = vpow2.f32 %v4678_v32 }
 0x4e0   : > { %4736 = vadd.xlane.f32.xlu0 %v6574_v17  ;;  %v4585_v1 = vpop.xlane.xlu0 %4584 }
 0x4e1   : > { %v6576_v19 = vpop.eup %6575  ;;  %v8529_v53 = vsub.f32 %v8401_v63, %v4585_v1 }
 0x4e2   : > { %v4587_v3 = vpop.xlane.xlu1 %4586  ;;  %4738 = vadd.xlane.f32.xlu1 %v6576_v19 }
 0x4e3   : > { %v4680_v31 = vmul.f32 1.442695, %v8529_v53  ;;  %v8533_v4 = vsub.f32 %v8405_v9, %v4587_v3 }
 0x4e5   : > { %6581 = vpow2.f32 %v4680_v31  ;;  %v4682_v44 = vmul.f32 1.442695, %v8533_v4 }
 0x4e7   : > { %v6578_v16 = vpop.eup %6577  ;;  %6583 = vpow2.f32 %v4682_v44 }
 0x4e8   : > { %4740 = vadd.xlane.f32.xlu0 %v6578_v16  ;;  %v4589_v62 = vpop.xlane.xlu0 %4588 }
 0x4e9   : > { %v6580_v49 = vpop.eup %6579  ;;  %v8537_v35 = vsub.f32 %v8409_v6, %v4589_v62 }
 0x4ea   : > { %v4591_v63 = vpop.xlane.xlu1 %4590  ;;  %4742 = vadd.xlane.f32.xlu1 %v6580_v49 }
 0x4eb   : > { %v4684_v48 = vmul.f32 1.442695, %v8537_v35  ;;  %v8541_v8 = vsub.f32 %v8413_v47, %v4591_v63 }
 0x4ed   : > { %6585 = vpow2.f32 %v4684_v48  ;;  %v4686_v9 = vmul.f32 1.442695, %v8541_v8 }
 0x4ef   : > { %v6582_v10 = vpop.eup %6581  ;;  %6587 = vpow2.f32 %v4686_v9 }
 0x4f0   : > { %4744 = vadd.xlane.f32.xlu0 %v6582_v10  ;;  %v4593_v38 = vpop.xlane.xlu0 %4592 }
 0x4f1   : > { %v6584_v52 = vpop.eup %6583  ;;  %v8545_v21 = vsub.f32 %v8417_v57, %v4593_v38 }
 0x4f2   : > { %v4595_v6 = vpop.xlane.xlu1 %4594  ;;  %4746 = vadd.xlane.f32.xlu1 %v6584_v52 }
 0x4f3   : > { %v4688_v37 = vmul.f32 1.442695, %v8545_v21  ;;  %v8549_v60 = vsub.f32 %v8421_v46, %v4595_v6 }
 0x4f5   : > { %6589 = vpow2.f32 %v4688_v37  ;;  %v4690_v47 = vmul.f32 1.442695, %v8549_v60 }
 0x4f7   : > { %v6586_v20 = vpop.eup %6585  ;;  %6591 = vpow2.f32 %v4690_v47 }
 0x4f8   : > { %4748 = vadd.xlane.f32.xlu0 %v6586_v20  ;;  %v4597_v22 = vpop.xlane.xlu0 %4596 }
 0x4f9   : > { %v6588_v11 = vpop.eup %6587  ;;  %v8553_v18 = vsub.f32 %v8425_v43, %v4597_v22 }
 0x4fa   : > { %v4599_v57 = vpop.xlane.xlu1 %4598  ;;  %4750 = vadd.xlane.f32.xlu1 %v6588_v11 }
 0x4fb   : > { %v4692_v30 = vmul.f32 1.442695, %v8553_v18  ;;  %v8557_v39 = vsub.f32 %v8429_v41, %v4599_v57 }
 0x4fd   : > { %6593 = vpow2.f32 %v4692_v30  ;;  %v4694_v46 = vmul.f32 1.442695, %v8557_v39 }
 0x4ff   : > { %v6590_v50 = vpop.eup %6589  ;;  %6595 = vpow2.f32 %v4694_v46 }
 0x500   : > { %4752 = vadd.xlane.f32.xlu0 %v6590_v50  ;;  %v4601_v12 = vpop.xlane.xlu0 %4600 }
 0x501   : > { %v6592_v56 = vpop.eup %6591  ;;  %v8561_v14 = vsub.f32 %v8433_v29, %v4601_v12 }
 0x502   : > { %v4603_v43 = vpop.xlane.xlu1 %4602  ;;  %4754 = vadd.xlane.f32.xlu1 %v6592_v56 }
 0x503   : > { %v4696_v55 = vmul.f32 1.442695, %v8561_v14  ;;  %v8565_v32 = vsub.f32 %v8437_v26, %v4603_v43 }
 0x505   : > { %6597 = vpow2.f32 %v4696_v55  ;;  %v4698_v41 = vmul.f32 1.442695, %v8565_v32 }
 0x507   : > { %v6594_v17 = vpop.eup %6593  ;;  %6599 = vpow2.f32 %v4698_v41 }
 0x508   : > { %4756 = vadd.xlane.f32.xlu0 %v6594_v17  ;;  %v4605_v1 = vpop.xlane.xlu0 %4604 }
 0x509   : > { %v6596_v19 = vpop.eup %6595  ;;  %v8569_v3 = vsub.f32 %v8441_v51, %v4605_v1 }
 0x50a   : > { %v4607_v29 = vpop.xlane.xlu1 %4606  ;;  %4758 = vadd.xlane.f32.xlu1 %v6596_v19 }
 0x50b   : > { %v4700_v31 = vmul.f32 1.442695, %v8569_v3  ;;  %v8573_v44 = vsub.f32 %v8445_v23, %v4607_v29 }
 0x50d   : > { %6601 = vpow2.f32 %v4700_v31  ;;  %v4702_v26 = vmul.f32 1.442695, %v8573_v44 }
 0x50f   : > { %v6598_v16 = vpop.eup %6597  ;;  %6603 = vpow2.f32 %v4702_v26 }
 0x510   : > { %4760 = vadd.xlane.f32.xlu0 %v6598_v16  ;;  %v4609_v62 = vpop.xlane.xlu0 %4608 }
 0x511   : > { %v6600_v49 = vpop.eup %6599  ;;  %v8577_v63 = vsub.f32 %v8449_v7, %v4609_v62 }
 0x512   : > { %v4611_v51 = vpop.xlane.xlu1 %4610  ;;  %4762 = vadd.xlane.f32.xlu1 %v6600_v49 }
 0x513   : > { %v4704_v48 = vmul.f32 1.442695, %v8577_v63  ;;  %v8581_v9 = vsub.f32 %v8453_v45, %v4611_v51 }
 0x515   : > { %6605 = vpow2.f32 %v4704_v48  ;;  %v4706_v23 = vmul.f32 1.442695, %v8581_v9 }
 0x517   : > { %v6602_v10 = vpop.eup %6601  ;;  %6607 = vpow2.f32 %v4706_v23 }
 0x518   : > { %4764 = vadd.xlane.f32.xlu0 %v6602_v10  ;;  %v4613_v38 = vpop.xlane.xlu0 %4612 }
 0x519   : > { %v6604_v52 = vpop.eup %6603  ;;  %v8585_v6 = vsub.f32 %v8457_v5, %v4613_v38 }
 0x51a   : > { %v4615_v7 = vpop.xlane.xlu1 %4614  ;;  %4766 = vadd.xlane.f32.xlu1 %v6604_v52 }
 0x51b   : > { %v4708_v37 = vmul.f32 1.442695, %v8585_v6  ;;  %v8589_v47 = vsub.f32 %v8461_v42, %v4615_v7 }
 0x51d   : > { %6609 = vpow2.f32 %v4708_v37  ;;  %v4710_v45 = vmul.f32 1.442695, %v8589_v47 }
 0x51f   : > { %v6606_v20 = vpop.eup %6605  ;;  %6611 = vpow2.f32 %v4710_v45 }
 0x520   : > { %4768 = vadd.xlane.f32.xlu0 %v6606_v20  ;;  %v4617_v22 = vpop.xlane.xlu0 %4616 }
 0x521   : > { %v6608_v11 = vpop.eup %6607  ;;  %v8593_v57 = vsub.f32 %v8465_v27, %v4617_v22 }
 0x522   : > { %v4619_v5 = vpop.xlane.xlu1 %4618  ;;  %4770 = vadd.xlane.f32.xlu1 %v6608_v11 }
 0x523   : > { %v4712_v30 = vmul.f32 1.442695, %v8593_v57  ;;  %v8597_v46 = vsub.f32 %v8469_v54, %v4619_v5 }
 0x525   : > { %6613 = vpow2.f32 %v4712_v30  ;;  %v4714_v42 = vmul.f32 1.442695, %v8597_v46 }
 0x527   : > { %v6610_v50 = vpop.eup %6609  ;;  %6615 = vpow2.f32 %v4714_v42 }
 0x528   : > { %4772 = vadd.xlane.f32.xlu0 %v6610_v50  ;;  %v4621_v12 = vpop.xlane.xlu0 %4620 }
 0x529   : > { %v6612_v56 = vpop.eup %6611  ;;  %v8601_v43 = vsub.f32 %v8473_v0, %v4621_v12 }
 0x52a   : > { %v4623_v27 = vpop.xlane.xlu1 %4622  ;;  %4774 = vadd.xlane.f32.xlu1 %v6612_v56 }
 0x52b   : > { %v4716_v55 = vmul.f32 1.442695, %v8601_v43  ;;  %v8605_v41 = vsub.f32 %v8477_v25, %v4623_v27 }
 0x52d   : > { %6617 = vpow2.f32 %v4716_v55  ;;  %v4718_v54 = vmul.f32 1.442695, %v8605_v41 }
 0x52f   : > { %v6614_v17 = vpop.eup %6613  ;;  %6619 = vpow2.f32 %v4718_v54 }
 0x530   : > { %4776 = vadd.xlane.f32.xlu0 %v6614_v17 }
 0x531   : > { %v6616_v1 = vpop.eup %6615 }
 0x532   : > { %4778 = vadd.xlane.f32.xlu1 %v6616_v1 }
 0x537   : > { %v6618_v19 = vpop.eup %6617 }
 0x538   : > { %4780 = vadd.xlane.f32.xlu0 %v6618_v19 }
 0x539   : > { %v6620_v0 = vpop.eup %6619 }
 0x53a   : > { %4782 = vadd.xlane.f32.xlu1 %v6620_v0 }
 0x54d   : > { %v4721_v29 = vpop.xlane.xlu0 %4720 }
 0x54e   : > { %6621 = vlog2.f32 %v4721_v29 }
 0x551   : > { %v4723_v31 = vpop.xlane.xlu1 %4722 }
 0x552   : > { %6623 = vlog2.f32 %v4723_v31 }
 0x555   : > { %v4725_v26 = vpop.xlane.xlu0 %4724 }
 0x556   : > { %6625 = vlog2.f32 %v4725_v26 }
 0x558   : > { %v6622_v25 = vpop.eup %6621 }
 0x559   : > { %v4785_v16 = vmul.f32 0.6931472, %v6622_v25  ;;  %v4727_v62 = vpop.xlane.xlu1 %4726 }
 0x55a   : > { %6627 = vlog2.f32 %v4727_v62 }
 0x55b   : > { %v4848_v49 = vsub.f32 %v8481_v36, %v4785_v16 }
 0x55c   : > { %v6624_v51 = vpop.eup %6623 }
 0x55d   : > { %4880 = vst [vmem:[%s8612_s15] sm:$0xff] %v4848_v49  ;;  %v4787_v48 = vmul.f32 0.6931472, %v6624_v51  ;;  %v4729_v23 = vpop.xlane.xlu0 %4728 }
 0x55e   : > { %6629 = vlog2.f32 %v4729_v23 }
 0x55f   : > { %v4849_v10 = vsub.f32 %v8485_v59, %v4787_v48  ;;  %v4731_v38 = vpop.xlane.xlu1 %4730 }
 0x560   : > { %v6626_v52 = vpop.eup %6625  ;;  %6631 = vlog2.f32 %v4731_v38 }
 0x561   : > { %4881 = vst [vmem:[%s8612_s15 + $0x8] sm:$0xff] %v4849_v10  ;;  %v4789_v7 = vmul.f32 0.6931472, %v6626_v52 }
 0x563   : > { %v4850_v37 = vsub.f32 %v8489_v34, %v4789_v7 }
 0x564   : > { %v6628_v45 = vpop.eup %6627 }
 0x565   : > { %4882 = vst [vmem:[%s8612_s15 + $0x10] sm:$0xff] %v4850_v37  ;;  %v4791_v20 = vmul.f32 0.6931472, %v6628_v45  ;;  %v4733_v36 = vpop.xlane.xlu0 %4732 }
 0x566   : > { %6633 = vlog2.f32 %v4733_v36 }
 0x567   : > { %v4851_v22 = vsub.f32 %v8493_v15, %v4791_v20  ;;  %v4735_v11 = vpop.xlane.xlu1 %4734 }
 0x568   : > { %v6630_v5 = vpop.eup %6629  ;;  %6635 = vlog2.f32 %v4735_v11 }
 0x569   : > { %4883 = vst [vmem:[%s8612_s15 + $0x18] sm:$0xff] %v4851_v22  ;;  %v4793_v59 = vmul.f32 0.6931472, %v6630_v5 }
 0x56a   : > { %v6632_v30 = vpop.eup %6631 }
 0x56b   : > { %v4852_v42 = vsub.f32 %v8497_v58, %v4793_v59  ;;  %v4795_v50 = vmul.f32 0.6931472, %v6632_v30 }
 0x56d   : > { %4884 = vst [vmem:[%s8612_s15 + $0x20] sm:$0xff] %v4852_v42  ;;  %v4853_v34 = vsub.f32 %v8501_v2, %v4795_v50  ;;  %v4737_v12 = vpop.xlane.xlu0 %4736 }
 0x56e   : > { %6637 = vlog2.f32 %v4737_v12 }
 0x56f   : > { %4885 = vst [vmem:[%s8612_s15 + $0x28] sm:$0xff] %v4853_v34  ;;  %v4739_v56 = vpop.xlane.xlu1 %4738 }
 0x570   : > { %v6634_v27 = vpop.eup %6633  ;;  %6639 = vlog2.f32 %v4739_v56 }
 0x571   : > { %v4797_v15 = vmul.f32 0.6931472, %v6634_v27 }
 0x572   : > { %v6636_v55 = vpop.eup %6635 }
 0x573   : > { %v4854_v54 = vsub.f32 %v8505_v24, %v4797_v15  ;;  %v4799_v17 = vmul.f32 0.6931472, %v6636_v55 }
 0x575   : > { %4886 = vst [vmem:[%s8612_s15 + $0x30] sm:$0xff] %v4854_v54  ;;  %v4855_v58 = vsub.f32 %v8509_v13, %v4799_v17  ;;  %v4741_v1 = vpop.xlane.xlu0 %4740 }
 0x576   : > { %6641 = vlog2.f32 %v4741_v1 }
 0x577   : > { %4887 = vst [vmem:[%s8612_s15 + $0x38] sm:$0xff] %v4855_v58  ;;  %v4743_v2 = vpop.xlane.xlu1 %4742 }
 0x578   : > { %v6638_v19 = vpop.eup %6637  ;;  %6643 = vlog2.f32 %v4743_v2 }
 0x579   : > { %v4801_v0 = vmul.f32 0.6931472, %v6638_v19 }
 0x57a   : > { %v6640_v29 = vpop.eup %6639 }
 0x57b   : > { %v4856_v31 = vsub.f32 %v8513_v28, %v4801_v0  ;;  %v4803_v26 = vmul.f32 0.6931472, %v6640_v29 }
 0x57d   : > { %4888 = vst [vmem:[%s8612_s15 + $0x40] sm:$0xff] %v4856_v31  ;;  %v4857_v24 = vsub.f32 %v8517_v40, %v4803_v26  ;;  %v4745_v25 = vpop.xlane.xlu0 %4744 }
 0x57e   : > { %6645 = vlog2.f32 %v4745_v25 }
 0x57f   : > { %4889 = vst [vmem:[%s8612_s15 + $0x48] sm:$0xff] %v4857_v24  ;;  %v4747_v13 = vpop.xlane.xlu1 %4746 }
 0x580   : > { %v6642_v16 = vpop.eup %6641  ;;  %6647 = vlog2.f32 %v4747_v13 }
 0x581   : > { %v4805_v62 = vmul.f32 0.6931472, %v6642_v16 }
 0x582   : > { %v6644_v49 = vpop.eup %6643 }
 0x583   : > { %v4858_v51 = vsub.f32 %v8521_v61, %v4805_v62  ;;  %v4807_v48 = vmul.f32 0.6931472, %v6644_v49 }
 0x585   : > { %4890 = vst [vmem:[%s8612_s15 + $0x50] sm:$0xff] %v4858_v51  ;;  %v4859_v28 = vsub.f32 %v8525_v33, %v4807_v48  ;;  %v4749_v23 = vpop.xlane.xlu0 %4748 }
 0x586   : > { %6649 = vlog2.f32 %v4749_v23 }
 0x587   : > { %4891 = vst [vmem:[%s8612_s15 + $0x58] sm:$0xff] %v4859_v28  ;;  %v4751_v40 = vpop.xlane.xlu1 %4750 }
 0x588   : > { %v6646_v10 = vpop.eup %6645  ;;  %6651 = vlog2.f32 %v4751_v40 }
 0x589   : > { %v4809_v38 = vmul.f32 0.6931472, %v6646_v10 }
 0x58a   : > { %v6648_v52 = vpop.eup %6647 }
 0x58b   : > { %v4860_v7 = vsub.f32 %v8529_v53, %v4809_v38  ;;  %v4811_v37 = vmul.f32 0.6931472, %v6648_v52 }
 0x58d   : > { %4892 = vst [vmem:[%s8612_s15 + $0x60] sm:$0xff] %v4860_v7  ;;  %v4861_v61 = vsub.f32 %v8533_v4, %v4811_v37  ;;  %v4753_v45 = vpop.xlane.xlu0 %4752 }
 0x58e   : > { %6653 = vlog2.f32 %v4753_v45 }
 0x58f   : > { %4893 = vst [vmem:[%s8612_s15 + $0x68] sm:$0xff] %v4861_v61  ;;  %v4755_v33 = vpop.xlane.xlu1 %4754 }
 0x590   : > { %v6650_v20 = vpop.eup %6649  ;;  %6655 = vlog2.f32 %v4755_v33 }
 0x591   : > { %v4813_v36 = vmul.f32 0.6931472, %v6650_v20 }
 0x592   : > { %v6652_v22 = vpop.eup %6651 }
 0x593   : > { %v4862_v11 = vsub.f32 %v8537_v35, %v4813_v36  ;;  %v4815_v5 = vmul.f32 0.6931472, %v6652_v22 }
 0x595   : > { %4894 = vst [vmem:[%s8612_s15 + $0x70] sm:$0xff] %v4862_v11  ;;  %v4863_v53 = vsub.f32 %v8541_v8, %v4815_v5  ;;  %v4757_v59 = vpop.xlane.xlu0 %4756 }
 0x596   : > { %6657 = vlog2.f32 %v4757_v59 }
 0x597   : > { %4895 = vst [vmem:[%s8612_s15 + $0x78] sm:$0xff] %v4863_v53  ;;  %v4759_v4 = vpop.xlane.xlu1 %4758 }
 0x598   : > { %v6654_v30 = vpop.eup %6653  ;;  %6659 = vlog2.f32 %v4759_v4 }
 0x599   : > { %v4817_v42 = vmul.f32 0.6931472, %v6654_v30 }
 0x59a   : > { %v6656_v50 = vpop.eup %6655 }
 0x59b   : > { %v4864_v34 = vsub.f32 %v8545_v21, %v4817_v42  ;;  %v4819_v12 = vmul.f32 0.6931472, %v6656_v50 }
 0x59d   : > { %4896 = vst [vmem:[%s8612_s15 + $0x80] sm:$0xff] %v4864_v34  ;;  %v4865_v35 = vsub.f32 %v8549_v60, %v4819_v12  ;;  %v4761_v56 = vpop.xlane.xlu0 %4760 }
 0x59e   : > { %6661 = vlog2.f32 %v4761_v56 }
 0x59f   : > { %4897 = vst [vmem:[%s8612_s15 + $0x88] sm:$0xff] %v4865_v35  ;;  %v4763_v8 = vpop.xlane.xlu1 %4762 }
 0x5a0   : > { %v6658_v27 = vpop.eup %6657  ;;  %6663 = vlog2.f32 %v4763_v8 }
 0x5a1   : > { %v4821_v15 = vmul.f32 0.6931472, %v6658_v27 }
 0x5a2   : > { %v6660_v55 = vpop.eup %6659 }
 0x5a3   : > { %v4866_v54 = vsub.f32 %v8553_v18, %v4821_v15  ;;  %v4823_v17 = vmul.f32 0.6931472, %v6660_v55 }
 0x5a5   : > { %4898 = vst [vmem:[%s8612_s15 + $0x90] sm:$0xff] %v4866_v54  ;;  %v4867_v21 = vsub.f32 %v8557_v39, %v4823_v17  ;;  %v4765_v58 = vpop.xlane.xlu0 %4764 }
 0x5a6   : > { %6665 = vlog2.f32 %v4765_v58 }
 0x5a7   : > { %4899 = vst [vmem:[%s8612_s15 + $0x98] sm:$0xff] %v4867_v21  ;;  %v4767_v60 = vpop.xlane.xlu1 %4766 }
 0x5a8   : > { %v6662_v1 = vpop.eup %6661  ;;  %6667 = vlog2.f32 %v4767_v60 }
 0x5a9   : > { %v4825_v2 = vmul.f32 0.6931472, %v6662_v1 }
 0x5aa   : > { %v6664_v19 = vpop.eup %6663 }
 0x5ab   : > { %v4868_v0 = vsub.f32 %v8561_v14, %v4825_v2  ;;  %v4827_v29 = vmul.f32 0.6931472, %v6664_v19 }
 0x5ad   : > { %4900 = vst [vmem:[%s8612_s15 + $0xa0] sm:$0xff] %v4868_v0  ;;  %v4869_v18 = vsub.f32 %v8565_v32, %v4827_v29  ;;  %v4769_v31 = vpop.xlane.xlu0 %4768 }
 0x5ae   : > { %6669 = vlog2.f32 %v4769_v31 }
 0x5af   : > { %4901 = vst [vmem:[%s8612_s15 + $0xa8] sm:$0xff] %v4869_v18  ;;  %v4771_v39 = vpop.xlane.xlu1 %4770 }
 0x5b0   : > { %v6666_v26 = vpop.eup %6665  ;;  %6671 = vlog2.f32 %v4771_v39 }
 0x5b1   : > { %v4829_v24 = vmul.f32 0.6931472, %v6666_v26 }
 0x5b2   : > { %v6668_v25 = vpop.eup %6667 }
 0x5b3   : > { %v4870_v13 = vsub.f32 %v8569_v3, %v4829_v24  ;;  %v4831_v16 = vmul.f32 0.6931472, %v6668_v25 }
 0x5b5   : > { %4902 = vst [vmem:[%s8612_s15 + $0xb0] sm:$0xff] %v4870_v13  ;;  %v4871_v14 = vsub.f32 %v8573_v44, %v4831_v16  ;;  %v4773_v62 = vpop.xlane.xlu0 %4772 }
 0x5b6   : > { %6673 = vlog2.f32 %v4773_v62 }
 0x5b7   : > { %4903 = vst [vmem:[%s8612_s15 + $0xb8] sm:$0xff] %v4871_v14  ;;  %v4775_v32 = vpop.xlane.xlu1 %4774 }
 0x5b8   : > { %v6670_v49 = vpop.eup %6669  ;;  %6675 = vlog2.f32 %v4775_v32 }
 0x5b9   : > { %v4833_v51 = vmul.f32 0.6931472, %v6670_v49 }
 0x5ba   : > { %v6672_v48 = vpop.eup %6671 }
 0x5bb   : > { %v4872_v28 = vsub.f32 %v8577_v63, %v4833_v51  ;;  %v4835_v23 = vmul.f32 0.6931472, %v6672_v48 }
 0x5bd   : > { %4904 = vst [vmem:[%s8612_s15 + $0xc0] sm:$0xff] %v4872_v28  ;;  %v4873_v3 = vsub.f32 %v8581_v9, %v4835_v23  ;;  %v4777_v40 = vpop.xlane.xlu0 %4776 }
 0x5be   : > { %6677 = vlog2.f32 %v4777_v40 }
 0x5bf   : > { %4905 = vst [vmem:[%s8612_s15 + $0xc8] sm:$0xff] %v4873_v3  ;;  %v4779_v44 = vpop.xlane.xlu1 %4778 }
 0x5c0   : > { %v6674_v10 = vpop.eup %6673  ;;  %6679 = vlog2.f32 %v4779_v44 }
 0x5c1   : > { %v4837_v38 = vmul.f32 0.6931472, %v6674_v10 }
 0x5c2   : > { %v6676_v52 = vpop.eup %6675 }
 0x5c3   : > { %v4874_v7 = vsub.f32 %v8585_v6, %v4837_v38  ;;  %v4839_v37 = vmul.f32 0.6931472, %v6676_v52 }
 0x5c5   : > { %4906 = vst [vmem:[%s8612_s15 + $0xd0] sm:$0xff] %v4874_v7  ;;  %v4875_v63 = vsub.f32 %v8589_v47, %v4839_v37  ;;  %v4781_v61 = vpop.xlane.xlu0 %4780 }
 0x5c6   : > { %6681 = vlog2.f32 %v4781_v61 }
 0x5c7   : > { %4907 = vst [vmem:[%s8612_s15 + $0xd8] sm:$0xff] %v4875_v63  ;;  %v4783_v9 = vpop.xlane.xlu1 %4782 }
 0x5c8   : > { %v6678_v45 = vpop.eup %6677  ;;  %6683 = vlog2.f32 %v4783_v9 }
 0x5c9   : > { %v4841_v33 = vmul.f32 0.6931472, %v6678_v45 }
 0x5ca   : > { %v6680_v20 = vpop.eup %6679 }
 0x5cb   : > { %v4876_v36 = vsub.f32 %v8593_v57, %v4841_v33  ;;  %v4843_v22 = vmul.f32 0.6931472, %v6680_v20 }
 0x5cd   : > { %4908 = vst [vmem:[%s8612_s15 + $0xe0] sm:$0xff] %v4876_v36  ;;  %v4877_v6 = vsub.f32 %v8597_v46, %v4843_v22 }
 0x5cf   : > { %4909 = vst [vmem:[%s8612_s15 + $0xe8] sm:$0xff] %v4877_v6 }
 0x5d0   : > { %v6682_v11 = vpop.eup %6681 }
 0x5d1   : > { %v4845_v5 = vmul.f32 0.6931472, %v6682_v11 }
 0x5d2   : > { %v6684_v47 = vpop.eup %6683 }
 0x5d3   : > { %v4878_v53 = vsub.f32 %v8601_v43, %v4845_v5  ;;  %v4847_v59 = vmul.f32 0.6931472, %v6684_v47 }
 0x5d5   : > { %4910 = vst [vmem:[%s8612_s15 + $0xf0] sm:$0xff] %v4878_v53  ;;  %v4879_v4 = vsub.f32 %v8605_v41, %v4847_v59 }
 0x5d7   : > { %4911 = vst [vmem:[%s8612_s15 + $0xf8] sm:$0xff] %v4879_v4 }
 0x5d8 PF: > { %s17_s24 = sadd.s32 1, %s6703_s24  }
 0x5d9   : > { %p14_p4 = scmp.ge.s32.totalorder %s17_s24, 4  }
 0x5db   :  { %16 = sbr.rel (!%p14_p4) target bundleno = 1 (0x1), region = 78 }

</bundles_post_ra>
